<compile_context>
chip_gen: v5e
topology: v5e:2x2
jax: 0.10.0
libtpu: 0.0.40
codegen_flags: <defaults>
</compile_context>

<pallas_src>
import jax
import jax.numpy as jnp
from jax.experimental import pallas as pl
from jax.experimental.pallas import tpu as pltpu

EPS = 1e-5  # torch.nn.BatchNorm2d default eps


def _make_fused_kernel(N, C, H, W, Cout, Cin, KH, KW):
    Ho, Wo = H - KH + 1, W - KW + 1
    inv_total1 = 1.0 / float(N * C * H * W)
    inv_total2 = 1.0 / float(N * Cout * Ho * Wo)

    def kernel(w_ref, b_ref, x_ref, o_ref):
        x = x_ref[...]                                   # (N, C, H, W), VMEM-resident

        # ---- BN#1: whole-tensor training-mode stats (two-pass, stable) ----
        m1 = jnp.sum(x) * inv_total1
        d1 = x - m1
        var1 = jnp.sum(d1 * d1) * inv_total1             # biased variance
        inv1 = jax.lax.rsqrt(var1 + EPS)                 # EUP rsqrt

        # ---- Conv2d with BN#1 folded into weights/bias --------------------
        # conv(BN1(x))[o] = inv1*conv_nobias(x)[o] + (b[o] - inv1*m1*sum(w[o]))
        accs = [jnp.zeros((N, Ho, Wo), dtype=jnp.float32) for _ in range(Cout)]
        wsums = [jnp.float32(0.0) for _ in range(Cout)]
        for c in range(Cin):
            for kh in range(KH):
                for kw in range(KW):
                    # One static shifted slice per tap, shared by all Cout
                    patch = x[:, c, kh:kh + Ho, kw:kw + Wo]          # (N, Ho, Wo)
                    for o in range(Cout):
                        wv = w_ref[((o * Cin + c) * KH + kh) * KW + kw]  # SMEM scalar
                        wsums[o] = wsums[o] + wv
                        accs[o] = accs[o] + wv * patch

        ys = [inv1 * accs[o] + (b_ref[o] - inv1 * m1 * wsums[o])
              for o in range(Cout)]                      # conv output, per channel

        # ---- BN#2: stats over the vreg-resident conv output (two-pass) ----
        s = jnp.sum(ys[0])
        for o in range(1, Cout):
            s = s + jnp.sum(ys[o])
        m2 = s * inv_total2
        ss = jnp.float32(0.0)
        for o in range(Cout):
            d2 = ys[o] - m2
            ss = ss + jnp.sum(d2 * d2)
        inv2 = jax.lax.rsqrt(ss * inv_total2 + EPS)

        # ---- Normalize + store per channel (no reshape/concat relayout) ---
        for o in range(Cout):
            o_ref[:, o, :, :] = (ys[o] - m2) * inv2

    return kernel


def model_forward(x, w, b):
    """x: (N, C, H, W) f32 (NCHW); w: (Cout, Cin, KH, KW) f32; b: (Cout,) f32."""
    N, C, H, W = x.shape
    Cout, Cin, KH, KW = w.shape
    Ho, Wo = H - KH + 1, W - KW + 1

    kernel = _make_fused_kernel(N, C, H, W, Cout, Cin, KH, KW)
    return pl.pallas_call(
        kernel,
        out_shape=jax.ShapeDtypeStruct((N, Cout, Ho, Wo), jnp.float32),
        in_specs=[
            pl.BlockSpec(memory_space=pltpu.MemorySpace.SMEM),   # w, flat (Cout*Cin*KH*KW,)
            pl.BlockSpec(memory_space=pltpu.MemorySpace.SMEM),   # bias (Cout,)
            pl.BlockSpec(memory_space=pltpu.MemorySpace.VMEM),   # x, whole tensor
        ],
        out_specs=pl.BlockSpec(memory_space=pltpu.MemorySpace.VMEM),
    )(w.reshape(-1), b, x)


if __name__ == "__main__":
    key = jax.random.PRNGKey(0)
    kx, kw, kb = jax.random.split(key, 3)

    N, C, H, W = 2, 3, 16, 16
    Cout, Cin, KH, KW = 3, 3, 3, 3

    x = jax.random.normal(kx, (N, C, H, W), dtype=jnp.float32)

    # Deterministic Conv2d(3, 3, 3) parameters (PyTorch-style uniform bounds).
    fan_in = Cin * KH * KW
    bound = 1.0 / (fan_in ** 0.5)
    w = jax.random.uniform(kw, (Cout, Cin, KH, KW), jnp.float32, -bound, bound)
    b = jax.random.uniform(kb, (Cout,), jnp.float32, -bound, bound)

    out = jax.jit(model_forward)(x, w, b)
    jax.block_until_ready(out)
    assert out.shape == (N, Cout, H - KH + 1, W - KW + 1)
    print("KERNEL_OK")
</pallas_src>

<mosaic_0001>
module attributes {stable_mosaic.version = 11 : i64} {
  func.func @kernel(%arg0: memref<81xf32, #tpu.memory_space<smem>>, %arg1: memref<3xf32, #tpu.memory_space<smem>>, %arg2: memref<2x3x16x16xf32, #tpu.memory_space<vmem>>, %arg3: memref<2x3x14x14xf32, #tpu.memory_space<vmem>>) attributes {dimension_semantics = [], scalar_prefetch = 0 : i64, scratch_operands = 0 : i64, tpu.core_type = #tpu.core_type<tc>} {
    %c0 = arith.constant 0 : index
    %c0_0 = arith.constant 0 : index
    %c0_1 = arith.constant 0 : index
    %c0_2 = arith.constant 0 : index
    %0 = vector.load %arg2[%c0, %c0_0, %c0_1, %c0_2] : memref<2x3x16x16xf32, #tpu.memory_space<vmem>>, vector<2x3x16x16xf32>
    %1 = vector.shape_cast %0 : vector<2x3x16x16xf32> to vector<1x2x3x16x16xf32>
    %cst = arith.constant dense<0.000000e+00> : vector<1xf32>
    %2 = vector.multi_reduction <add>, %1, %cst [1, 2, 3, 4] : vector<1x2x3x16x16xf32> to vector<1xf32>
    %3 = vector.shape_cast %2 : vector<1xf32> to vector<1x1x1x1x1xf32>
    %4 = vector.extract %3[0, 0, 0, 0, 0] : f32 from vector<1x1x1x1x1xf32>
    %cst_3 = arith.constant 6.51041686E-4 : f32
    %5 = arith.mulf %4, %cst_3 : f32
    %6 = vector.broadcast %5 : f32 to vector<2x3x16x16xf32>
    %7 = arith.subf %0, %6 : vector<2x3x16x16xf32>
    %8 = arith.mulf %7, %7 : vector<2x3x16x16xf32>
    %9 = vector.shape_cast %8 : vector<2x3x16x16xf32> to vector<1x2x3x16x16xf32>
    %cst_4 = arith.constant dense<0.000000e+00> : vector<1xf32>
    %10 = vector.multi_reduction <add>, %9, %cst_4 [1, 2, 3, 4] : vector<1x2x3x16x16xf32> to vector<1xf32>
    %11 = vector.shape_cast %10 : vector<1xf32> to vector<1x1x1x1x1xf32>
    %12 = vector.extract %11[0, 0, 0, 0, 0] : f32 from vector<1x1x1x1x1xf32>
    %cst_5 = arith.constant 6.51041686E-4 : f32
    %13 = arith.mulf %12, %cst_5 : f32
    %cst_6 = arith.constant 9.99999974E-6 : f32
    %14 = arith.addf %13, %cst_6 : f32
    %15 = math.rsqrt %14 : f32
    %cst_7 = arith.constant 0.000000e+00 : f32
    %16 = vector.broadcast %cst_7 : f32 to vector<2x14x14xf32>
    %cst_8 = arith.constant 0.000000e+00 : f32
    %17 = vector.broadcast %cst_8 : f32 to vector<2x14x14xf32>
    %cst_9 = arith.constant 0.000000e+00 : f32
    %18 = vector.broadcast %cst_9 : f32 to vector<2x14x14xf32>
    %19 = vector.extract_strided_slice %0 {offsets = [0, 0, 0, 0], sizes = [2, 1, 14, 14], strides = [1, 1, 1, 1]} : vector<2x3x16x16xf32> to vector<2x1x14x14xf32>
    %20 = vector.shape_cast %19 : vector<2x1x14x14xf32> to vector<2x14x14xf32>
    %c0_10 = arith.constant 0 : index
    %21 = memref.load %arg0[%c0_10] : memref<81xf32, #tpu.memory_space<smem>>
    %cst_11 = arith.constant 0.000000e+00 : f32
    %22 = arith.addf %cst_11, %21 : f32
    %23 = vector.broadcast %21 : f32 to vector<2x14x14xf32>
    %24 = arith.mulf %23, %20 : vector<2x14x14xf32>
    %25 = arith.addf %16, %24 : vector<2x14x14xf32>
    %c27 = arith.constant 27 : index
    %26 = memref.load %arg0[%c27] : memref<81xf32, #tpu.memory_space<smem>>
    %cst_12 = arith.constant 0.000000e+00 : f32
    %27 = arith.addf %cst_12, %26 : f32
    %28 = vector.broadcast %26 : f32 to vector<2x14x14xf32>
    %29 = arith.mulf %28, %20 : vector<2x14x14xf32>
    %30 = arith.addf %17, %29 : vector<2x14x14xf32>
    %c54 = arith.constant 54 : index
    %31 = memref.load %arg0[%c54] : memref<81xf32, #tpu.memory_space<smem>>
    %cst_13 = arith.constant 0.000000e+00 : f32
    %32 = arith.addf %cst_13, %31 : f32
    %33 = vector.broadcast %31 : f32 to vector<2x14x14xf32>
    %34 = arith.mulf %33, %20 : vector<2x14x14xf32>
    %35 = arith.addf %18, %34 : vector<2x14x14xf32>
    %36 = vector.extract_strided_slice %0 {offsets = [0, 0, 0, 1], sizes = [2, 1, 14, 14], strides = [1, 1, 1, 1]} : vector<2x3x16x16xf32> to vector<2x1x14x14xf32>
    %37 = vector.shape_cast %36 : vector<2x1x14x14xf32> to vector<2x14x14xf32>
    %c1 = arith.constant 1 : index
    %38 = memref.load %arg0[%c1] : memref<81xf32, #tpu.memory_space<smem>>
    %39 = arith.addf %22, %38 : f32
    %40 = vector.broadcast %38 : f32 to vector<2x14x14xf32>
    %41 = arith.mulf %40, %37 : vector<2x14x14xf32>
    %42 = arith.addf %25, %41 : vector<2x14x14xf32>
    %c28 = arith.constant 28 : index
    %43 = memref.load %arg0[%c28] : memref<81xf32, #tpu.memory_space<smem>>
    %44 = arith.addf %27, %43 : f32
    %45 = vector.broadcast %43 : f32 to vector<2x14x14xf32>
    %46 = arith.mulf %45, %37 : vector<2x14x14xf32>
    %47 = arith.addf %30, %46 : vector<2x14x14xf32>
    %c55 = arith.constant 55 : index
    %48 = memref.load %arg0[%c55] : memref<81xf32, #tpu.memory_space<smem>>
    %49 = arith.addf %32, %48 : f32
    %50 = vector.broadcast %48 : f32 to vector<2x14x14xf32>
    %51 = arith.mulf %50, %37 : vector<2x14x14xf32>
    %52 = arith.addf %35, %51 : vector<2x14x14xf32>
    %53 = vector.extract_strided_slice %0 {offsets = [0, 0, 0, 2], sizes = [2, 1, 14, 14], strides = [1, 1, 1, 1]} : vector<2x3x16x16xf32> to vector<2x1x14x14xf32>
    %54 = vector.shape_cast %53 : vector<2x1x14x14xf32> to vector<2x14x14xf32>
    %c2 = arith.constant 2 : index
    %55 = memref.load %arg0[%c2] : memref<81xf32, #tpu.memory_space<smem>>
    %56 = arith.addf %39, %55 : f32
    %57 = vector.broadcast %55 : f32 to vector<2x14x14xf32>
    %58 = arith.mulf %57, %54 : vector<2x14x14xf32>
    %59 = arith.addf %42, %58 : vector<2x14x14xf32>
    %c29 = arith.constant 29 : index
    %60 = memref.load %arg0[%c29] : memref<81xf32, #tpu.memory_space<smem>>
    %61 = arith.addf %44, %60 : f32
    %62 = vector.broadcast %60 : f32 to vector<2x14x14xf32>
    %63 = arith.mulf %62, %54 : vector<2x14x14xf32>
    %64 = arith.addf %47, %63 : vector<2x14x14xf32>
    %c56 = arith.constant 56 : index
    %65 = memref.load %arg0[%c56] : memref<81xf32, #tpu.memory_space<smem>>
    %66 = arith.addf %49, %65 : f32
    %67 = vector.broadcast %65 : f32 to vector<2x14x14xf32>
    %68 = arith.mulf %67, %54 : vector<2x14x14xf32>
    %69 = arith.addf %52, %68 : vector<2x14x14xf32>
    %70 = vector.extract_strided_slice %0 {offsets = [0, 0, 1, 0], sizes = [2, 1, 14, 14], strides = [1, 1, 1, 1]} : vector<2x3x16x16xf32> to vector<2x1x14x14xf32>
    %71 = vector.shape_cast %70 : vector<2x1x14x14xf32> to vector<2x14x14xf32>
    %c3 = arith.constant 3 : index
    %72 = memref.load %arg0[%c3] : memref<81xf32, #tpu.memory_space<smem>>
    %73 = arith.addf %56, %72 : f32
    %74 = vector.broadcast %72 : f32 to vector<2x14x14xf32>
    %75 = arith.mulf %74, %71 : vector<2x14x14xf32>
    %76 = arith.addf %59, %75 : vector<2x14x14xf32>
    %c30 = arith.constant 30 : index
    %77 = memref.load %arg0[%c30] : memref<81xf32, #tpu.memory_space<smem>>
    %78 = arith.addf %61, %77 : f32
    %79 = vector.broadcast %77 : f32 to vector<2x14x14xf32>
    %80 = arith.mulf %79, %71 : vector<2x14x14xf32>
    %81 = arith.addf %64, %80 : vector<2x14x14xf32>
    %c57 = arith.constant 57 : index
    %82 = memref.load %arg0[%c57] : memref<81xf32, #tpu.memory_space<smem>>
    %83 = arith.addf %66, %82 : f32
    %84 = vector.broadcast %82 : f32 to vector<2x14x14xf32>
    %85 = arith.mulf %84, %71 : vector<2x14x14xf32>
    %86 = arith.addf %69, %85 : vector<2x14x14xf32>
    %87 = vector.extract_strided_slice %0 {offsets = [0, 0, 1, 1], sizes = [2, 1, 14, 14], strides = [1, 1, 1, 1]} : vector<2x3x16x16xf32> to vector<2x1x14x14xf32>
    %88 = vector.shape_cast %87 : vector<2x1x14x14xf32> to vector<2x14x14xf32>
    %c4 = arith.constant 4 : index
    %89 = memref.load %arg0[%c4] : memref<81xf32, #tpu.memory_space<smem>>
    %90 = arith.addf %73, %89 : f32
    %91 = vector.broadcast %89 : f32 to vector<2x14x14xf32>
    %92 = arith.mulf %91, %88 : vector<2x14x14xf32>
    %93 = arith.addf %76, %92 : vector<2x14x14xf32>
    %c31 = arith.constant 31 : index
    %94 = memref.load %arg0[%c31] : memref<81xf32, #tpu.memory_space<smem>>
    %95 = arith.addf %78, %94 : f32
    %96 = vector.broadcast %94 : f32 to vector<2x14x14xf32>
    %97 = arith.mulf %96, %88 : vector<2x14x14xf32>
    %98 = arith.addf %81, %97 : vector<2x14x14xf32>
    %c58 = arith.constant 58 : index
    %99 = memref.load %arg0[%c58] : memref<81xf32, #tpu.memory_space<smem>>
    %100 = arith.addf %83, %99 : f32
    %101 = vector.broadcast %99 : f32 to vector<2x14x14xf32>
    %102 = arith.mulf %101, %88 : vector<2x14x14xf32>
    %103 = arith.addf %86, %102 : vector<2x14x14xf32>
    %104 = vector.extract_strided_slice %0 {offsets = [0, 0, 1, 2], sizes = [2, 1, 14, 14], strides = [1, 1, 1, 1]} : vector<2x3x16x16xf32> to vector<2x1x14x14xf32>
    %105 = vector.shape_cast %104 : vector<2x1x14x14xf32> to vector<2x14x14xf32>
    %c5 = arith.constant 5 : index
    %106 = memref.load %arg0[%c5] : memref<81xf32, #tpu.memory_space<smem>>
    %107 = arith.addf %90, %106 : f32
    %108 = vector.broadcast %106 : f32 to vector<2x14x14xf32>
    %109 = arith.mulf %108, %105 : vector<2x14x14xf32>
    %110 = arith.addf %93, %109 : vector<2x14x14xf32>
    %c32 = arith.constant 32 : index
    %111 = memref.load %arg0[%c32] : memref<81xf32, #tpu.memory_space<smem>>
    %112 = arith.addf %95, %111 : f32
    %113 = vector.broadcast %111 : f32 to vector<2x14x14xf32>
    %114 = arith.mulf %113, %105 : vector<2x14x14xf32>
    %115 = arith.addf %98, %114 : vector<2x14x14xf32>
    %c59 = arith.constant 59 : index
    %116 = memref.load %arg0[%c59] : memref<81xf32, #tpu.memory_space<smem>>
    %117 = arith.addf %100, %116 : f32
    %118 = vector.broadcast %116 : f32 to vector<2x14x14xf32>
    %119 = arith.mulf %118, %105 : vector<2x14x14xf32>
    %120 = arith.addf %103, %119 : vector<2x14x14xf32>
    %121 = vector.extract_strided_slice %0 {offsets = [0, 0, 2, 0], sizes = [2, 1, 14, 14], strides = [1, 1, 1, 1]} : vector<2x3x16x16xf32> to vector<2x1x14x14xf32>
    %122 = vector.shape_cast %121 : vector<2x1x14x14xf32> to vector<2x14x14xf32>
    %c6 = arith.constant 6 : index
    %123 = memref.load %arg0[%c6] : memref<81xf32, #tpu.memory_space<smem>>
    %124 = arith.addf %107, %123 : f32
    %125 = vector.broadcast %123 : f32 to vector<2x14x14xf32>
    %126 = arith.mulf %125, %122 : vector<2x14x14xf32>
    %127 = arith.addf %110, %126 : vector<2x14x14xf32>
    %c33 = arith.constant 33 : index
    %128 = memref.load %arg0[%c33] : memref<81xf32, #tpu.memory_space<smem>>
    %129 = arith.addf %112, %128 : f32
    %130 = vector.broadcast %128 : f32 to vector<2x14x14xf32>
    %131 = arith.mulf %130, %122 : vector<2x14x14xf32>
    %132 = arith.addf %115, %131 : vector<2x14x14xf32>
    %c60 = arith.constant 60 : index
    %133 = memref.load %arg0[%c60] : memref<81xf32, #tpu.memory_space<smem>>
    %134 = arith.addf %117, %133 : f32
    %135 = vector.broadcast %133 : f32 to vector<2x14x14xf32>
    %136 = arith.mulf %135, %122 : vector<2x14x14xf32>
    %137 = arith.addf %120, %136 : vector<2x14x14xf32>
    %138 = vector.extract_strided_slice %0 {offsets = [0, 0, 2, 1], sizes = [2, 1, 14, 14], strides = [1, 1, 1, 1]} : vector<2x3x16x16xf32> to vector<2x1x14x14xf32>
    %139 = vector.shape_cast %138 : vector<2x1x14x14xf32> to vector<2x14x14xf32>
    %c7 = arith.constant 7 : index
    %140 = memref.load %arg0[%c7] : memref<81xf32, #tpu.memory_space<smem>>
    %141 = arith.addf %124, %140 : f32
    %142 = vector.broadcast %140 : f32 to vector<2x14x14xf32>
    %143 = arith.mulf %142, %139 : vector<2x14x14xf32>
    %144 = arith.addf %127, %143 : vector<2x14x14xf32>
    %c34 = arith.constant 34 : index
    %145 = memref.load %arg0[%c34] : memref<81xf32, #tpu.memory_space<smem>>
    %146 = arith.addf %129, %145 : f32
    %147 = vector.broadcast %145 : f32 to vector<2x14x14xf32>
    %148 = arith.mulf %147, %139 : vector<2x14x14xf32>
    %149 = arith.addf %132, %148 : vector<2x14x14xf32>
    %c61 = arith.constant 61 : index
    %150 = memref.load %arg0[%c61] : memref<81xf32, #tpu.memory_space<smem>>
    %151 = arith.addf %134, %150 : f32
    %152 = vector.broadcast %150 : f32 to vector<2x14x14xf32>
    %153 = arith.mulf %152, %139 : vector<2x14x14xf32>
    %154 = arith.addf %137, %153 : vector<2x14x14xf32>
    %155 = vector.extract_strided_slice %0 {offsets = [0, 0, 2, 2], sizes = [2, 1, 14, 14], strides = [1, 1, 1, 1]} : vector<2x3x16x16xf32> to vector<2x1x14x14xf32>
    %156 = vector.shape_cast %155 : vector<2x1x14x14xf32> to vector<2x14x14xf32>
    %c8 = arith.constant 8 : index
    %157 = memref.load %arg0[%c8] : memref<81xf32, #tpu.memory_space<smem>>
    %158 = arith.addf %141, %157 : f32
    %159 = vector.broadcast %157 : f32 to vector<2x14x14xf32>
    %160 = arith.mulf %159, %156 : vector<2x14x14xf32>
    %161 = arith.addf %144, %160 : vector<2x14x14xf32>
    %c35 = arith.constant 35 : index
    %162 = memref.load %arg0[%c35] : memref<81xf32, #tpu.memory_space<smem>>
    %163 = arith.addf %146, %162 : f32
    %164 = vector.broadcast %162 : f32 to vector<2x14x14xf32>
    %165 = arith.mulf %164, %156 : vector<2x14x14xf32>
    %166 = arith.addf %149, %165 : vector<2x14x14xf32>
    %c62 = arith.constant 62 : index
    %167 = memref.load %arg0[%c62] : memref<81xf32, #tpu.memory_space<smem>>
    %168 = arith.addf %151, %167 : f32
    %169 = vector.broadcast %167 : f32 to vector<2x14x14xf32>
    %170 = arith.mulf %169, %156 : vector<2x14x14xf32>
    %171 = arith.addf %154, %170 : vector<2x14x14xf32>
    %172 = vector.extract_strided_slice %0 {offsets = [0, 1, 0, 0], sizes = [2, 1, 14, 14], strides = [1, 1, 1, 1]} : vector<2x3x16x16xf32> to vector<2x1x14x14xf32>
    %173 = vector.shape_cast %172 : vector<2x1x14x14xf32> to vector<2x14x14xf32>
    %c9 = arith.constant 9 : index
    %174 = memref.load %arg0[%c9] : memref<81xf32, #tpu.memory_space<smem>>
    %175 = arith.addf %158, %174 : f32
    %176 = vector.broadcast %174 : f32 to vector<2x14x14xf32>
    %177 = arith.mulf %176, %173 : vector<2x14x14xf32>
    %178 = arith.addf %161, %177 : vector<2x14x14xf32>
    %c36 = arith.constant 36 : index
    %179 = memref.load %arg0[%c36] : memref<81xf32, #tpu.memory_space<smem>>
    %180 = arith.addf %163, %179 : f32
    %181 = vector.broadcast %179 : f32 to vector<2x14x14xf32>
    %182 = arith.mulf %181, %173 : vector<2x14x14xf32>
    %183 = arith.addf %166, %182 : vector<2x14x14xf32>
    %c63 = arith.constant 63 : index
    %184 = memref.load %arg0[%c63] : memref<81xf32, #tpu.memory_space<smem>>
    %185 = arith.addf %168, %184 : f32
    %186 = vector.broadcast %184 : f32 to vector<2x14x14xf32>
    %187 = arith.mulf %186, %173 : vector<2x14x14xf32>
    %188 = arith.addf %171, %187 : vector<2x14x14xf32>
    %189 = vector.extract_strided_slice %0 {offsets = [0, 1, 0, 1], sizes = [2, 1, 14, 14], strides = [1, 1, 1, 1]} : vector<2x3x16x16xf32> to vector<2x1x14x14xf32>
    %190 = vector.shape_cast %189 : vector<2x1x14x14xf32> to vector<2x14x14xf32>
    %c10 = arith.constant 10 : index
    %191 = memref.load %arg0[%c10] : memref<81xf32, #tpu.memory_space<smem>>
    %192 = arith.addf %175, %191 : f32
    %193 = vector.broadcast %191 : f32 to vector<2x14x14xf32>
    %194 = arith.mulf %193, %190 : vector<2x14x14xf32>
    %195 = arith.addf %178, %194 : vector<2x14x14xf32>
    %c37 = arith.constant 37 : index
    %196 = memref.load %arg0[%c37] : memref<81xf32, #tpu.memory_space<smem>>
    %197 = arith.addf %180, %196 : f32
    %198 = vector.broadcast %196 : f32 to vector<2x14x14xf32>
    %199 = arith.mulf %198, %190 : vector<2x14x14xf32>
    %200 = arith.addf %183, %199 : vector<2x14x14xf32>
    %c64 = arith.constant 64 : index
    %201 = memref.load %arg0[%c64] : memref<81xf32, #tpu.memory_space<smem>>
    %202 = arith.addf %185, %201 : f32
    %203 = vector.broadcast %201 : f32 to vector<2x14x14xf32>
    %204 = arith.mulf %203, %190 : vector<2x14x14xf32>
    %205 = arith.addf %188, %204 : vector<2x14x14xf32>
    %206 = vector.extract_strided_slice %0 {offsets = [0, 1, 0, 2], sizes = [2, 1, 14, 14], strides = [1, 1, 1, 1]} : vector<2x3x16x16xf32> to vector<2x1x14x14xf32>
    %207 = vector.shape_cast %206 : vector<2x1x14x14xf32> to vector<2x14x14xf32>
    %c11 = arith.constant 11 : index
    %208 = memref.load %arg0[%c11] : memref<81xf32, #tpu.memory_space<smem>>
    %209 = arith.addf %192, %208 : f32
    %210 = vector.broadcast %208 : f32 to vector<2x14x14xf32>
    %211 = arith.mulf %210, %207 : vector<2x14x14xf32>
    %212 = arith.addf %195, %211 : vector<2x14x14xf32>
    %c38 = arith.constant 38 : index
    %213 = memref.load %arg0[%c38] : memref<81xf32, #tpu.memory_space<smem>>
    %214 = arith.addf %197, %213 : f32
    %215 = vector.broadcast %213 : f32 to vector<2x14x14xf32>
    %216 = arith.mulf %215, %207 : vector<2x14x14xf32>
    %217 = arith.addf %200, %216 : vector<2x14x14xf32>
    %c65 = arith.constant 65 : index
    %218 = memref.load %arg0[%c65] : memref<81xf32, #tpu.memory_space<smem>>
    %219 = arith.addf %202, %218 : f32
    %220 = vector.broadcast %218 : f32 to vector<2x14x14xf32>
    %221 = arith.mulf %220, %207 : vector<2x14x14xf32>
    %222 = arith.addf %205, %221 : vector<2x14x14xf32>
    %223 = vector.extract_strided_slice %0 {offsets = [0, 1, 1, 0], sizes = [2, 1, 14, 14], strides = [1, 1, 1, 1]} : vector<2x3x16x16xf32> to vector<2x1x14x14xf32>
    %224 = vector.shape_cast %223 : vector<2x1x14x14xf32> to vector<2x14x14xf32>
    %c12 = arith.constant 12 : index
    %225 = memref.load %arg0[%c12] : memref<81xf32, #tpu.memory_space<smem>>
    %226 = arith.addf %209, %225 : f32
    %227 = vector.broadcast %225 : f32 to vector<2x14x14xf32>
    %228 = arith.mulf %227, %224 : vector<2x14x14xf32>
    %229 = arith.addf %212, %228 : vector<2x14x14xf32>
    %c39 = arith.constant 39 : index
    %230 = memref.load %arg0[%c39] : memref<81xf32, #tpu.memory_space<smem>>
    %231 = arith.addf %214, %230 : f32
    %232 = vector.broadcast %230 : f32 to vector<2x14x14xf32>
    %233 = arith.mulf %232, %224 : vector<2x14x14xf32>
    %234 = arith.addf %217, %233 : vector<2x14x14xf32>
    %c66 = arith.constant 66 : index
    %235 = memref.load %arg0[%c66] : memref<81xf32, #tpu.memory_space<smem>>
    %236 = arith.addf %219, %235 : f32
    %237 = vector.broadcast %235 : f32 to vector<2x14x14xf32>
    %238 = arith.mulf %237, %224 : vector<2x14x14xf32>
    %239 = arith.addf %222, %238 : vector<2x14x14xf32>
    %240 = vector.extract_strided_slice %0 {offsets = [0, 1, 1, 1], sizes = [2, 1, 14, 14], strides = [1, 1, 1, 1]} : vector<2x3x16x16xf32> to vector<2x1x14x14xf32>
    %241 = vector.shape_cast %240 : vector<2x1x14x14xf32> to vector<2x14x14xf32>
    %c13 = arith.constant 13 : index
    %242 = memref.load %arg0[%c13] : memref<81xf32, #tpu.memory_space<smem>>
    %243 = arith.addf %226, %242 : f32
    %244 = vector.broadcast %242 : f32 to vector<2x14x14xf32>
    %245 = arith.mulf %244, %241 : vector<2x14x14xf32>
    %246 = arith.addf %229, %245 : vector<2x14x14xf32>
    %c40 = arith.constant 40 : index
    %247 = memref.load %arg0[%c40] : memref<81xf32, #tpu.memory_space<smem>>
    %248 = arith.addf %231, %247 : f32
    %249 = vector.broadcast %247 : f32 to vector<2x14x14xf32>
    %250 = arith.mulf %249, %241 : vector<2x14x14xf32>
    %251 = arith.addf %234, %250 : vector<2x14x14xf32>
    %c67 = arith.constant 67 : index
    %252 = memref.load %arg0[%c67] : memref<81xf32, #tpu.memory_space<smem>>
    %253 = arith.addf %236, %252 : f32
    %254 = vector.broadcast %252 : f32 to vector<2x14x14xf32>
    %255 = arith.mulf %254, %241 : vector<2x14x14xf32>
    %256 = arith.addf %239, %255 : vector<2x14x14xf32>
    %257 = vector.extract_strided_slice %0 {offsets = [0, 1, 1, 2], sizes = [2, 1, 14, 14], strides = [1, 1, 1, 1]} : vector<2x3x16x16xf32> to vector<2x1x14x14xf32>
    %258 = vector.shape_cast %257 : vector<2x1x14x14xf32> to vector<2x14x14xf32>
    %c14 = arith.constant 14 : index
    %259 = memref.load %arg0[%c14] : memref<81xf32, #tpu.memory_space<smem>>
    %260 = arith.addf %243, %259 : f32
    %261 = vector.broadcast %259 : f32 to vector<2x14x14xf32>
    %262 = arith.mulf %261, %258 : vector<2x14x14xf32>
    %263 = arith.addf %246, %262 : vector<2x14x14xf32>
    %c41 = arith.constant 41 : index
    %264 = memref.load %arg0[%c41] : memref<81xf32, #tpu.memory_space<smem>>
    %265 = arith.addf %248, %264 : f32
    %266 = vector.broadcast %264 : f32 to vector<2x14x14xf32>
    %267 = arith.mulf %266, %258 : vector<2x14x14xf32>
    %268 = arith.addf %251, %267 : vector<2x14x14xf32>
    %c68 = arith.constant 68 : index
    %269 = memref.load %arg0[%c68] : memref<81xf32, #tpu.memory_space<smem>>
    %270 = arith.addf %253, %269 : f32
    %271 = vector.broadcast %269 : f32 to vector<2x14x14xf32>
    %272 = arith.mulf %271, %258 : vector<2x14x14xf32>
    %273 = arith.addf %256, %272 : vector<2x14x14xf32>
    %274 = vector.extract_strided_slice %0 {offsets = [0, 1, 2, 0], sizes = [2, 1, 14, 14], strides = [1, 1, 1, 1]} : vector<2x3x16x16xf32> to vector<2x1x14x14xf32>
    %275 = vector.shape_cast %274 : vector<2x1x14x14xf32> to vector<2x14x14xf32>
    %c15 = arith.constant 15 : index
    %276 = memref.load %arg0[%c15] : memref<81xf32, #tpu.memory_space<smem>>
    %277 = arith.addf %260, %276 : f32
    %278 = vector.broadcast %276 : f32 to vector<2x14x14xf32>
    %279 = arith.mulf %278, %275 : vector<2x14x14xf32>
    %280 = arith.addf %263, %279 : vector<2x14x14xf32>
    %c42 = arith.constant 42 : index
    %281 = memref.load %arg0[%c42] : memref<81xf32, #tpu.memory_space<smem>>
    %282 = arith.addf %265, %281 : f32
    %283 = vector.broadcast %281 : f32 to vector<2x14x14xf32>
    %284 = arith.mulf %283, %275 : vector<2x14x14xf32>
    %285 = arith.addf %268, %284 : vector<2x14x14xf32>
    %c69 = arith.constant 69 : index
    %286 = memref.load %arg0[%c69] : memref<81xf32, #tpu.memory_space<smem>>
    %287 = arith.addf %270, %286 : f32
    %288 = vector.broadcast %286 : f32 to vector<2x14x14xf32>
    %289 = arith.mulf %288, %275 : vector<2x14x14xf32>
    %290 = arith.addf %273, %289 : vector<2x14x14xf32>
    %291 = vector.extract_strided_slice %0 {offsets = [0, 1, 2, 1], sizes = [2, 1, 14, 14], strides = [1, 1, 1, 1]} : vector<2x3x16x16xf32> to vector<2x1x14x14xf32>
    %292 = vector.shape_cast %291 : vector<2x1x14x14xf32> to vector<2x14x14xf32>
    %c16 = arith.constant 16 : index
    %293 = memref.load %arg0[%c16] : memref<81xf32, #tpu.memory_space<smem>>
    %294 = arith.addf %277, %293 : f32
    %295 = vector.broadcast %293 : f32 to vector<2x14x14xf32>
    %296 = arith.mulf %295, %292 : vector<2x14x14xf32>
    %297 = arith.addf %280, %296 : vector<2x14x14xf32>
    %c43 = arith.constant 43 : index
    %298 = memref.load %arg0[%c43] : memref<81xf32, #tpu.memory_space<smem>>
    %299 = arith.addf %282, %298 : f32
    %300 = vector.broadcast %298 : f32 to vector<2x14x14xf32>
    %301 = arith.mulf %300, %292 : vector<2x14x14xf32>
    %302 = arith.addf %285, %301 : vector<2x14x14xf32>
    %c70 = arith.constant 70 : index
    %303 = memref.load %arg0[%c70] : memref<81xf32, #tpu.memory_space<smem>>
    %304 = arith.addf %287, %303 : f32
    %305 = vector.broadcast %303 : f32 to vector<2x14x14xf32>
    %306 = arith.mulf %305, %292 : vector<2x14x14xf32>
    %307 = arith.addf %290, %306 : vector<2x14x14xf32>
    %308 = vector.extract_strided_slice %0 {offsets = [0, 1, 2, 2], sizes = [2, 1, 14, 14], strides = [1, 1, 1, 1]} : vector<2x3x16x16xf32> to vector<2x1x14x14xf32>
    %309 = vector.shape_cast %308 : vector<2x1x14x14xf32> to vector<2x14x14xf32>
    %c17 = arith.constant 17 : index
    %310 = memref.load %arg0[%c17] : memref<81xf32, #tpu.memory_space<smem>>
    %311 = arith.addf %294, %310 : f32
    %312 = vector.broadcast %310 : f32 to vector<2x14x14xf32>
    %313 = arith.mulf %312, %309 : vector<2x14x14xf32>
    %314 = arith.addf %297, %313 : vector<2x14x14xf32>
    %c44 = arith.constant 44 : index
    %315 = memref.load %arg0[%c44] : memref<81xf32, #tpu.memory_space<smem>>
    %316 = arith.addf %299, %315 : f32
    %317 = vector.broadcast %315 : f32 to vector<2x14x14xf32>
    %318 = arith.mulf %317, %309 : vector<2x14x14xf32>
    %319 = arith.addf %302, %318 : vector<2x14x14xf32>
    %c71 = arith.constant 71 : index
    %320 = memref.load %arg0[%c71] : memref<81xf32, #tpu.memory_space<smem>>
    %321 = arith.addf %304, %320 : f32
    %322 = vector.broadcast %320 : f32 to vector<2x14x14xf32>
    %323 = arith.mulf %322, %309 : vector<2x14x14xf32>
    %324 = arith.addf %307, %323 : vector<2x14x14xf32>
    %325 = vector.extract_strided_slice %0 {offsets = [0, 2, 0, 0], sizes = [2, 1, 14, 14], strides = [1, 1, 1, 1]} : vector<2x3x16x16xf32> to vector<2x1x14x14xf32>
    %326 = vector.shape_cast %325 : vector<2x1x14x14xf32> to vector<2x14x14xf32>
    %c18 = arith.constant 18 : index
    %327 = memref.load %arg0[%c18] : memref<81xf32, #tpu.memory_space<smem>>
    %328 = arith.addf %311, %327 : f32
    %329 = vector.broadcast %327 : f32 to vector<2x14x14xf32>
    %330 = arith.mulf %329, %326 : vector<2x14x14xf32>
    %331 = arith.addf %314, %330 : vector<2x14x14xf32>
    %c45 = arith.constant 45 : index
    %332 = memref.load %arg0[%c45] : memref<81xf32, #tpu.memory_space<smem>>
    %333 = arith.addf %316, %332 : f32
    %334 = vector.broadcast %332 : f32 to vector<2x14x14xf32>
    %335 = arith.mulf %334, %326 : vector<2x14x14xf32>
    %336 = arith.addf %319, %335 : vector<2x14x14xf32>
    %c72 = arith.constant 72 : index
    %337 = memref.load %arg0[%c72] : memref<81xf32, #tpu.memory_space<smem>>
    %338 = arith.addf %321, %337 : f32
    %339 = vector.broadcast %337 : f32 to vector<2x14x14xf32>
    %340 = arith.mulf %339, %326 : vector<2x14x14xf32>
    %341 = arith.addf %324, %340 : vector<2x14x14xf32>
    %342 = vector.extract_strided_slice %0 {offsets = [0, 2, 0, 1], sizes = [2, 1, 14, 14], strides = [1, 1, 1, 1]} : vector<2x3x16x16xf32> to vector<2x1x14x14xf32>
    %343 = vector.shape_cast %342 : vector<2x1x14x14xf32> to vector<2x14x14xf32>
    %c19 = arith.constant 19 : index
    %344 = memref.load %arg0[%c19] : memref<81xf32, #tpu.memory_space<smem>>
    %345 = arith.addf %328, %344 : f32
    %346 = vector.broadcast %344 : f32 to vector<2x14x14xf32>
    %347 = arith.mulf %346, %343 : vector<2x14x14xf32>
    %348 = arith.addf %331, %347 : vector<2x14x14xf32>
    %c46 = arith.constant 46 : index
    %349 = memref.load %arg0[%c46] : memref<81xf32, #tpu.memory_space<smem>>
    %350 = arith.addf %333, %349 : f32
    %351 = vector.broadcast %349 : f32 to vector<2x14x14xf32>
    %352 = arith.mulf %351, %343 : vector<2x14x14xf32>
    %353 = arith.addf %336, %352 : vector<2x14x14xf32>
    %c73 = arith.constant 73 : index
    %354 = memref.load %arg0[%c73] : memref<81xf32, #tpu.memory_space<smem>>
    %355 = arith.addf %338, %354 : f32
    %356 = vector.broadcast %354 : f32 to vector<2x14x14xf32>
    %357 = arith.mulf %356, %343 : vector<2x14x14xf32>
    %358 = arith.addf %341, %357 : vector<2x14x14xf32>
    %359 = vector.extract_strided_slice %0 {offsets = [0, 2, 0, 2], sizes = [2, 1, 14, 14], strides = [1, 1, 1, 1]} : vector<2x3x16x16xf32> to vector<2x1x14x14xf32>
    %360 = vector.shape_cast %359 : vector<2x1x14x14xf32> to vector<2x14x14xf32>
    %c20 = arith.constant 20 : index
    %361 = memref.load %arg0[%c20] : memref<81xf32, #tpu.memory_space<smem>>
    %362 = arith.addf %345, %361 : f32
    %363 = vector.broadcast %361 : f32 to vector<2x14x14xf32>
    %364 = arith.mulf %363, %360 : vector<2x14x14xf32>
    %365 = arith.addf %348, %364 : vector<2x14x14xf32>
    %c47 = arith.constant 47 : index
    %366 = memref.load %arg0[%c47] : memref<81xf32, #tpu.memory_space<smem>>
    %367 = arith.addf %350, %366 : f32
    %368 = vector.broadcast %366 : f32 to vector<2x14x14xf32>
    %369 = arith.mulf %368, %360 : vector<2x14x14xf32>
    %370 = arith.addf %353, %369 : vector<2x14x14xf32>
    %c74 = arith.constant 74 : index
    %371 = memref.load %arg0[%c74] : memref<81xf32, #tpu.memory_space<smem>>
    %372 = arith.addf %355, %371 : f32
    %373 = vector.broadcast %371 : f32 to vector<2x14x14xf32>
    %374 = arith.mulf %373, %360 : vector<2x14x14xf32>
    %375 = arith.addf %358, %374 : vector<2x14x14xf32>
    %376 = vector.extract_strided_slice %0 {offsets = [0, 2, 1, 0], sizes = [2, 1, 14, 14], strides = [1, 1, 1, 1]} : vector<2x3x16x16xf32> to vector<2x1x14x14xf32>
    %377 = vector.shape_cast %376 : vector<2x1x14x14xf32> to vector<2x14x14xf32>
    %c21 = arith.constant 21 : index
    %378 = memref.load %arg0[%c21] : memref<81xf32, #tpu.memory_space<smem>>
    %379 = arith.addf %362, %378 : f32
    %380 = vector.broadcast %378 : f32 to vector<2x14x14xf32>
    %381 = arith.mulf %380, %377 : vector<2x14x14xf32>
    %382 = arith.addf %365, %381 : vector<2x14x14xf32>
    %c48 = arith.constant 48 : index
    %383 = memref.load %arg0[%c48] : memref<81xf32, #tpu.memory_space<smem>>
    %384 = arith.addf %367, %383 : f32
    %385 = vector.broadcast %383 : f32 to vector<2x14x14xf32>
    %386 = arith.mulf %385, %377 : vector<2x14x14xf32>
    %387 = arith.addf %370, %386 : vector<2x14x14xf32>
    %c75 = arith.constant 75 : index
    %388 = memref.load %arg0[%c75] : memref<81xf32, #tpu.memory_space<smem>>
    %389 = arith.addf %372, %388 : f32
    %390 = vector.broadcast %388 : f32 to vector<2x14x14xf32>
    %391 = arith.mulf %390, %377 : vector<2x14x14xf32>
    %392 = arith.addf %375, %391 : vector<2x14x14xf32>
    %393 = vector.extract_strided_slice %0 {offsets = [0, 2, 1, 1], sizes = [2, 1, 14, 14], strides = [1, 1, 1, 1]} : vector<2x3x16x16xf32> to vector<2x1x14x14xf32>
    %394 = vector.shape_cast %393 : vector<2x1x14x14xf32> to vector<2x14x14xf32>
    %c22 = arith.constant 22 : index
    %395 = memref.load %arg0[%c22] : memref<81xf32, #tpu.memory_space<smem>>
    %396 = arith.addf %379, %395 : f32
    %397 = vector.broadcast %395 : f32 to vector<2x14x14xf32>
    %398 = arith.mulf %397, %394 : vector<2x14x14xf32>
    %399 = arith.addf %382, %398 : vector<2x14x14xf32>
    %c49 = arith.constant 49 : index
    %400 = memref.load %arg0[%c49] : memref<81xf32, #tpu.memory_space<smem>>
    %401 = arith.addf %384, %400 : f32
    %402 = vector.broadcast %400 : f32 to vector<2x14x14xf32>
    %403 = arith.mulf %402, %394 : vector<2x14x14xf32>
    %404 = arith.addf %387, %403 : vector<2x14x14xf32>
    %c76 = arith.constant 76 : index
    %405 = memref.load %arg0[%c76] : memref<81xf32, #tpu.memory_space<smem>>
    %406 = arith.addf %389, %405 : f32
    %407 = vector.broadcast %405 : f32 to vector<2x14x14xf32>
    %408 = arith.mulf %407, %394 : vector<2x14x14xf32>
    %409 = arith.addf %392, %408 : vector<2x14x14xf32>
    %410 = vector.extract_strided_slice %0 {offsets = [0, 2, 1, 2], sizes = [2, 1, 14, 14], strides = [1, 1, 1, 1]} : vector<2x3x16x16xf32> to vector<2x1x14x14xf32>
    %411 = vector.shape_cast %410 : vector<2x1x14x14xf32> to vector<2x14x14xf32>
    %c23 = arith.constant 23 : index
    %412 = memref.load %arg0[%c23] : memref<81xf32, #tpu.memory_space<smem>>
    %413 = arith.addf %396, %412 : f32
    %414 = vector.broadcast %412 : f32 to vector<2x14x14xf32>
    %415 = arith.mulf %414, %411 : vector<2x14x14xf32>
    %416 = arith.addf %399, %415 : vector<2x14x14xf32>
    %c50 = arith.constant 50 : index
    %417 = memref.load %arg0[%c50] : memref<81xf32, #tpu.memory_space<smem>>
    %418 = arith.addf %401, %417 : f32
    %419 = vector.broadcast %417 : f32 to vector<2x14x14xf32>
    %420 = arith.mulf %419, %411 : vector<2x14x14xf32>
    %421 = arith.addf %404, %420 : vector<2x14x14xf32>
    %c77 = arith.constant 77 : index
    %422 = memref.load %arg0[%c77] : memref<81xf32, #tpu.memory_space<smem>>
    %423 = arith.addf %406, %422 : f32
    %424 = vector.broadcast %422 : f32 to vector<2x14x14xf32>
    %425 = arith.mulf %424, %411 : vector<2x14x14xf32>
    %426 = arith.addf %409, %425 : vector<2x14x14xf32>
    %427 = vector.extract_strided_slice %0 {offsets = [0, 2, 2, 0], sizes = [2, 1, 14, 14], strides = [1, 1, 1, 1]} : vector<2x3x16x16xf32> to vector<2x1x14x14xf32>
    %428 = vector.shape_cast %427 : vector<2x1x14x14xf32> to vector<2x14x14xf32>
    %c24 = arith.constant 24 : index
    %429 = memref.load %arg0[%c24] : memref<81xf32, #tpu.memory_space<smem>>
    %430 = arith.addf %413, %429 : f32
    %431 = vector.broadcast %429 : f32 to vector<2x14x14xf32>
    %432 = arith.mulf %431, %428 : vector<2x14x14xf32>
    %433 = arith.addf %416, %432 : vector<2x14x14xf32>
    %c51 = arith.constant 51 : index
    %434 = memref.load %arg0[%c51] : memref<81xf32, #tpu.memory_space<smem>>
    %435 = arith.addf %418, %434 : f32
    %436 = vector.broadcast %434 : f32 to vector<2x14x14xf32>
    %437 = arith.mulf %436, %428 : vector<2x14x14xf32>
    %438 = arith.addf %421, %437 : vector<2x14x14xf32>
    %c78 = arith.constant 78 : index
    %439 = memref.load %arg0[%c78] : memref<81xf32, #tpu.memory_space<smem>>
    %440 = arith.addf %423, %439 : f32
    %441 = vector.broadcast %439 : f32 to vector<2x14x14xf32>
    %442 = arith.mulf %441, %428 : vector<2x14x14xf32>
    %443 = arith.addf %426, %442 : vector<2x14x14xf32>
    %444 = vector.extract_strided_slice %0 {offsets = [0, 2, 2, 1], sizes = [2, 1, 14, 14], strides = [1, 1, 1, 1]} : vector<2x3x16x16xf32> to vector<2x1x14x14xf32>
    %445 = vector.shape_cast %444 : vector<2x1x14x14xf32> to vector<2x14x14xf32>
    %c25 = arith.constant 25 : index
    %446 = memref.load %arg0[%c25] : memref<81xf32, #tpu.memory_space<smem>>
    %447 = arith.addf %430, %446 : f32
    %448 = vector.broadcast %446 : f32 to vector<2x14x14xf32>
    %449 = arith.mulf %448, %445 : vector<2x14x14xf32>
    %450 = arith.addf %433, %449 : vector<2x14x14xf32>
    %c52 = arith.constant 52 : index
    %451 = memref.load %arg0[%c52] : memref<81xf32, #tpu.memory_space<smem>>
    %452 = arith.addf %435, %451 : f32
    %453 = vector.broadcast %451 : f32 to vector<2x14x14xf32>
    %454 = arith.mulf %453, %445 : vector<2x14x14xf32>
    %455 = arith.addf %438, %454 : vector<2x14x14xf32>
    %c79 = arith.constant 79 : index
    %456 = memref.load %arg0[%c79] : memref<81xf32, #tpu.memory_space<smem>>
    %457 = arith.addf %440, %456 : f32
    %458 = vector.broadcast %456 : f32 to vector<2x14x14xf32>
    %459 = arith.mulf %458, %445 : vector<2x14x14xf32>
    %460 = arith.addf %443, %459 : vector<2x14x14xf32>
    %461 = vector.extract_strided_slice %0 {offsets = [0, 2, 2, 2], sizes = [2, 1, 14, 14], strides = [1, 1, 1, 1]} : vector<2x3x16x16xf32> to vector<2x1x14x14xf32>
    %462 = vector.shape_cast %461 : vector<2x1x14x14xf32> to vector<2x14x14xf32>
    %c26 = arith.constant 26 : index
    %463 = memref.load %arg0[%c26] : memref<81xf32, #tpu.memory_space<smem>>
    %464 = arith.addf %447, %463 : f32
    %465 = vector.broadcast %463 : f32 to vector<2x14x14xf32>
    %466 = arith.mulf %465, %462 : vector<2x14x14xf32>
    %467 = arith.addf %450, %466 : vector<2x14x14xf32>
    %c53 = arith.constant 53 : index
    %468 = memref.load %arg0[%c53] : memref<81xf32, #tpu.memory_space<smem>>
    %469 = arith.addf %452, %468 : f32
    %470 = vector.broadcast %468 : f32 to vector<2x14x14xf32>
    %471 = arith.mulf %470, %462 : vector<2x14x14xf32>
    %472 = arith.addf %455, %471 : vector<2x14x14xf32>
    %c80 = arith.constant 80 : index
    %473 = memref.load %arg0[%c80] : memref<81xf32, #tpu.memory_space<smem>>
    %474 = arith.addf %457, %473 : f32
    %475 = vector.broadcast %473 : f32 to vector<2x14x14xf32>
    %476 = arith.mulf %475, %462 : vector<2x14x14xf32>
    %477 = arith.addf %460, %476 : vector<2x14x14xf32>
    %478 = vector.broadcast %15 : f32 to vector<2x14x14xf32>
    %479 = arith.mulf %478, %467 : vector<2x14x14xf32>
    %c0_14 = arith.constant 0 : index
    %480 = memref.load %arg1[%c0_14] : memref<3xf32, #tpu.memory_space<smem>>
    %481 = arith.mulf %15, %5 : f32
    %482 = arith.mulf %481, %464 : f32
    %483 = arith.subf %480, %482 : f32
    %484 = vector.broadcast %483 : f32 to vector<2x14x14xf32>
    %485 = arith.addf %479, %484 : vector<2x14x14xf32>
    %486 = vector.broadcast %15 : f32 to vector<2x14x14xf32>
    %487 = arith.mulf %486, %472 : vector<2x14x14xf32>
    %c1_15 = arith.constant 1 : index
    %488 = memref.load %arg1[%c1_15] : memref<3xf32, #tpu.memory_space<smem>>
    %489 = arith.mulf %15, %5 : f32
    %490 = arith.mulf %489, %469 : f32
    %491 = arith.subf %488, %490 : f32
    %492 = vector.broadcast %491 : f32 to vector<2x14x14xf32>
    %493 = arith.addf %487, %492 : vector<2x14x14xf32>
    %494 = vector.broadcast %15 : f32 to vector<2x14x14xf32>
    %495 = arith.mulf %494, %477 : vector<2x14x14xf32>
    %c2_16 = arith.constant 2 : index
    %496 = memref.load %arg1[%c2_16] : memref<3xf32, #tpu.memory_space<smem>>
    %497 = arith.mulf %15, %5 : f32
    %498 = arith.mulf %497, %474 : f32
    %499 = arith.subf %496, %498 : f32
    %500 = vector.broadcast %499 : f32 to vector<2x14x14xf32>
    %501 = arith.addf %495, %500 : vector<2x14x14xf32>
    %502 = vector.shape_cast %485 : vector<2x14x14xf32> to vector<1x2x14x14xf32>
    %cst_17 = arith.constant dense<0.000000e+00> : vector<1xf32>
    %503 = vector.multi_reduction <add>, %502, %cst_17 [1, 2, 3] : vector<1x2x14x14xf32> to vector<1xf32>
    %504 = vector.shape_cast %503 : vector<1xf32> to vector<1x1x1x1xf32>
    %505 = vector.extract %504[0, 0, 0, 0] : f32 from vector<1x1x1x1xf32>
    %506 = vector.shape_cast %493 : vector<2x14x14xf32> to vector<1x2x14x14xf32>
    %cst_18 = arith.constant dense<0.000000e+00> : vector<1xf32>
    %507 = vector.multi_reduction <add>, %506, %cst_18 [1, 2, 3] : vector<1x2x14x14xf32> to vector<1xf32>
    %508 = vector.shape_cast %507 : vector<1xf32> to vector<1x1x1x1xf32>
    %509 = vector.extract %508[0, 0, 0, 0] : f32 from vector<1x1x1x1xf32>
    %510 = arith.addf %505, %509 : f32
    %511 = vector.shape_cast %501 : vector<2x14x14xf32> to vector<1x2x14x14xf32>
    %cst_19 = arith.constant dense<0.000000e+00> : vector<1xf32>
    %512 = vector.multi_reduction <add>, %511, %cst_19 [1, 2, 3] : vector<1x2x14x14xf32> to vector<1xf32>
    %513 = vector.shape_cast %512 : vector<1xf32> to vector<1x1x1x1xf32>
    %514 = vector.extract %513[0, 0, 0, 0] : f32 from vector<1x1x1x1xf32>
    %515 = arith.addf %510, %514 : f32
    %cst_20 = arith.constant 8.50340118E-4 : f32
    %516 = arith.mulf %515, %cst_20 : f32
    %517 = vector.broadcast %516 : f32 to vector<2x14x14xf32>
    %518 = arith.subf %485, %517 : vector<2x14x14xf32>
    %519 = arith.mulf %518, %518 : vector<2x14x14xf32>
    %520 = vector.shape_cast %519 : vector<2x14x14xf32> to vector<1x2x14x14xf32>
    %cst_21 = arith.constant dense<0.000000e+00> : vector<1xf32>
    %521 = vector.multi_reduction <add>, %520, %cst_21 [1, 2, 3] : vector<1x2x14x14xf32> to vector<1xf32>
    %522 = vector.shape_cast %521 : vector<1xf32> to vector<1x1x1x1xf32>
    %523 = vector.extract %522[0, 0, 0, 0] : f32 from vector<1x1x1x1xf32>
    %cst_22 = arith.constant 0.000000e+00 : f32
    %524 = arith.addf %cst_22, %523 : f32
    %525 = vector.broadcast %516 : f32 to vector<2x14x14xf32>
    %526 = arith.subf %493, %525 : vector<2x14x14xf32>
    %527 = arith.mulf %526, %526 : vector<2x14x14xf32>
    %528 = vector.shape_cast %527 : vector<2x14x14xf32> to vector<1x2x14x14xf32>
    %cst_23 = arith.constant dense<0.000000e+00> : vector<1xf32>
    %529 = vector.multi_reduction <add>, %528, %cst_23 [1, 2, 3] : vector<1x2x14x14xf32> to vector<1xf32>
    %530 = vector.shape_cast %529 : vector<1xf32> to vector<1x1x1x1xf32>
    %531 = vector.extract %530[0, 0, 0, 0] : f32 from vector<1x1x1x1xf32>
    %532 = arith.addf %524, %531 : f32
    %533 = vector.broadcast %516 : f32 to vector<2x14x14xf32>
    %534 = arith.subf %501, %533 : vector<2x14x14xf32>
    %535 = arith.mulf %534, %534 : vector<2x14x14xf32>
    %536 = vector.shape_cast %535 : vector<2x14x14xf32> to vector<1x2x14x14xf32>
    %cst_24 = arith.constant dense<0.000000e+00> : vector<1xf32>
    %537 = vector.multi_reduction <add>, %536, %cst_24 [1, 2, 3] : vector<1x2x14x14xf32> to vector<1xf32>
    %538 = vector.shape_cast %537 : vector<1xf32> to vector<1x1x1x1xf32>
    %539 = vector.extract %538[0, 0, 0, 0] : f32 from vector<1x1x1x1xf32>
    %540 = arith.addf %532, %539 : f32
    %cst_25 = arith.constant 8.50340118E-4 : f32
    %541 = arith.mulf %540, %cst_25 : f32
    %cst_26 = arith.constant 9.99999974E-6 : f32
    %542 = arith.addf %541, %cst_26 : f32
    %543 = math.rsqrt %542 : f32
    %544 = vector.broadcast %516 : f32 to vector<2x14x14xf32>
    %545 = arith.subf %485, %544 : vector<2x14x14xf32>
    %546 = vector.broadcast %543 : f32 to vector<2x14x14xf32>
    %547 = arith.mulf %545, %546 : vector<2x14x14xf32>
    %c0_27 = arith.constant 0 : index
    %c0_28 = arith.constant 0 : index
    %c0_29 = arith.constant 0 : index
    %c0_30 = arith.constant 0 : index
    %548 = vector.load %arg3[%c0_27, %c0_28, %c0_29, %c0_30] : memref<2x3x14x14xf32, #tpu.memory_space<vmem>>, vector<2x1x14x14xf32>
    %549 = vector.shape_cast %548 : vector<2x1x14x14xf32> to vector<2x14x14xf32>
    %550 = vector.shape_cast %547 : vector<2x14x14xf32> to vector<2x1x14x14xf32>
    tpu.vector_store %arg3[%c0_27, %c0_28, %c0_29, %c0_30], %550 {strides = array<i32>} : memref<2x3x14x14xf32, #tpu.memory_space<vmem>>, vector<2x1x14x14xf32>,
    %551 = vector.broadcast %516 : f32 to vector<2x14x14xf32>
    %552 = arith.subf %493, %551 : vector<2x14x14xf32>
    %553 = vector.broadcast %543 : f32 to vector<2x14x14xf32>
    %554 = arith.mulf %552, %553 : vector<2x14x14xf32>
    %c0_31 = arith.constant 0 : index
    %c1_32 = arith.constant 1 : index
    %c0_33 = arith.constant 0 : index
    %c0_34 = arith.constant 0 : index
    %555 = vector.load %arg3[%c0_31, %c1_32, %c0_33, %c0_34] : memref<2x3x14x14xf32, #tpu.memory_space<vmem>>, vector<2x1x14x14xf32>
    %556 = vector.shape_cast %555 : vector<2x1x14x14xf32> to vector<2x14x14xf32>
    %557 = vector.shape_cast %554 : vector<2x14x14xf32> to vector<2x1x14x14xf32>
    tpu.vector_store %arg3[%c0_31, %c1_32, %c0_33, %c0_34], %557 {strides = array<i32>} : memref<2x3x14x14xf32, #tpu.memory_space<vmem>>, vector<2x1x14x14xf32>,
    %558 = vector.broadcast %516 : f32 to vector<2x14x14xf32>
    %559 = arith.subf %501, %558 : vector<2x14x14xf32>
    %560 = vector.broadcast %543 : f32 to vector<2x14x14xf32>
    %561 = arith.mulf %559, %560 : vector<2x14x14xf32>
    %c0_35 = arith.constant 0 : index
    %c2_36 = arith.constant 2 : index
    %c0_37 = arith.constant 0 : index
    %c0_38 = arith.constant 0 : index
    %562 = vector.load %arg3[%c0_35, %c2_36, %c0_37, %c0_38] : memref<2x3x14x14xf32, #tpu.memory_space<vmem>>, vector<2x1x14x14xf32>
    %563 = vector.shape_cast %562 : vector<2x1x14x14xf32> to vector<2x14x14xf32>
    %564 = vector.shape_cast %561 : vector<2x14x14xf32> to vector<2x1x14x14xf32>
    tpu.vector_store %arg3[%c0_35, %c2_36, %c0_37, %c0_38], %564 {strides = array<i32>} : memref<2x3x14x14xf32, #tpu.memory_space<vmem>>, vector<2x1x14x14xf32>,
    return
  }
}

</mosaic_0001>

<bundles_post_ra>
// kernel: model_forward.1
= control target key start
LH: loop header
LB: loop body
LE: loop exit
PB: predicated region body
PF: predicated region fallthrough
CT: control target
= control target key end

     0   :  { %s5677_s0 = inlined_call_operand.vmem [shape: f32[81], index: 0, kind: input, shape index: {}]   ;;  %s5678_s1 = inlined_call_operand.vmem [shape: f32[3], index: 1, kind: input, shape index: {}]   ;;  %s5679_s2 = inlined_call_operand.hbm [shape: f32[2,3,16,16], index: 2, kind: input, shape index: {}]   ;;  %s5680_s3 = inlined_call_operand.vmem [shape: f32[2,3,14,14], index: 3, kind: output, shape index: {}]  }
   0x1   :  { %5765 = sst [smem:[#allocation75_spill]] %s5680_s3 }
   0x2   :  { %8 = vsyncpa [#allocation4], 0 }
   0x3   :  { %9 = vsyncpa [#allocation6], 0  ;;  %s16_s14 = sshll.u32 %s5677_s0, 4  ;;  %s17_s14 = int_to_ptr.vmem [resolvable:$true] %s16_s14 }
   0x4   :  { %10 = vsyncpa [#allocation3], 0  ;;  %s25_s17 = sshll.u32 %s5678_s1, 4  ;;  %s2808_s18 = smov [#allocation2]   ;;  %s26_s17 = int_to_ptr.vmem [resolvable:$true] %s25_s17 }
   0x5   :  { %19 = dma.vmem_to_smem %s17_s14, 16, %s2808_s18, [#allocation4]  }
   0x6   :  { %s2809_s19 = smov [#allocation5]   ;;  %s33_s22 = sshll.u32 %s5679_s2, 4  ;;  %s34_s22 = int_to_ptr.hbm [resolvable:$true] %s33_s22 }
   0x7   :  { %28 = dma.vmem_to_smem %s26_s17, 16, %s2809_s19, [#allocation6]  }
   0x8   :  { %s2810_s23 = smov [#allocation7]   ;;  %s2811_s0 = smov 128  }
   0x9   :  { %s35_s24 = sshll.u32 %s2810_s23, 4  ;;  %s2812_s25 = smov 8   ;;  %s36_s24 = int_to_ptr.vmem [resolvable:$true] %s35_s24 }
   0xa   :  { %41 = dma.hbm_to_vmem [thread:$0]  %s34_s22, 1536, %s36_s24, [#allocation3], %s2811_s0, %s2811_s0, %s2812_s25  }
   0xb   :  { %2802 = dma.done.wait [#allocation4], 16  }
   0xc   :  { %2803 = vsyncadd [#allocation4], 4294967280 }
   0xd   :  { %2804 = dma.done.wait [#allocation6], 16  }
   0xe   :  { %2805 = vsyncadd [#allocation6], 4294967280 }
   0xf   :  { %2806 = dma.done.wait [#allocation3], 1536  }
  0x10   :  { %2807 = vsyncadd [#allocation3], 4294965760 }
  0x11   :  { %54 = sfence }
  0x12   :  { %s2844_s1 = sld [smem:[#allocation2]]  ;;  %vm67_vm0 = vcmask 130048   ;;  %v2854_v0 = vld [vmem:[#allocation7 + $0x30] sm:$0xff]  ;;  %v2856_v1 = vld [vmem:[#allocation7] sm:$0xff]  ;;  %v2860_v2 = vld [vmem:[#allocation7 + $0x8] sm:$0xff]  ;;  %s5685_s7 = smov 127  }
  0x13   :  { %s2846_s26 = sld [smem:[#allocation2 + $0x1]]  ;;  %v68_v4 = vsel %vm67_vm0, %v2856_v1, 0.0  ;;  %v69_v5 = vsel %vm67_vm0, %v2860_v2, 0.0  ;;  %v2875_v8 = vld [vmem:[#allocation7 + $0x10] sm:$0xff]  ;;  %v2885_v12 = vld [vmem:[#allocation7 + $0x38] sm:$0xff]  ;;  %v2904_v19 = vld [vmem:[#allocation7 + $0x20] sm:$0xff] }
  0x14   :  { %s2848_s2 = sld [smem:[#allocation2 + $0x1b]]  ;;  %v70_v11 = vadd.f32 %v69_v5, %v68_v4  ;;  %v71_v13 = vsel %vm67_vm0, %v2875_v8, 0.0  ;;  %v2893_v14 = vld [vmem:[#allocation7 + $0x18] sm:$0xff]  ;;  %v75_v21 = vsel %vm67_vm0, %v2904_v19, 0.0  ;;  %v2916_v22 = vld [vmem:[#allocation7 + $0x28] sm:$0xff]  ;;  %v79_v29 = vsel %vm67_vm0, %v2854_v0, 0.0 }
  0x15   :  { %s2850_s27 = sld [smem:[#allocation2 + $0x1c]]  ;;  %v73_v18 = vsel %vm67_vm0, %v2893_v14, 0.0  ;;  %v77_v26 = vsel %vm67_vm0, %v2916_v22, 0.0  ;;  %v81_v33 = vsel %vm67_vm0, %v2885_v12, 0.0  ;;  %v2952_v34 = vld [vmem:[#allocation7 + $0x40] sm:$0xff]  ;;  %v2960_v37 = vld [vmem:[#allocation7 + $0x48] sm:$0xff] }
  0x16   :  { %s2852_s28 = sld [smem:[#allocation2 + $0x36]]  ;;  %v72_v17 = vadd.f32 %v71_v13, %v70_v11  ;;  %v83_v36 = vsel %vm67_vm0, %v2952_v34, 0.0  ;;  %v85_v41 = vsel %vm67_vm0, %v2960_v37, 0.0  ;;  %v2966_v42 = vld [vmem:[#allocation7 + $0x50] sm:$0xff]  ;;  %v2973_v46 = vld [vmem:[#allocation7 + $0x58] sm:$0xff]  ;;  %vm378_vm1 = vcmask 1046528  }
  0x17   :  { %s2858_s29 = sld [smem:[#allocation2 + $0x37]]  ;;  %v87_v45 = vsel %vm67_vm0, %v2966_v42, 0.0  ;;  %v89_v50 = vsel %vm67_vm0, %v2973_v46, 0.0  ;;  %vm652_vm2 = vcmask 1045504   ;;  %vm2435_vm6 = vcmask 113664  }
  0x18   :  { %s2862_s30 = sld [smem:[#allocation2 + $0x2]]  ;;  %v74_v20 = vadd.f32 %v73_v18, %v72_v17  ;;  %vm2437_vm7 = vcmask 111616  }
  0x19   :  { %s206_s4 = sadd.f32 %s2846_s26, %s2844_s1  ;;  %v207_v3 = vstv %s2846_s26 }
  0x1a   :  { %v210_v6 = vmul.f32 %v207_v3, %v2854_v0  ;;  %v208_v7 = vmul.f32 %v207_v3, %v2856_v1  ;;  %s2873_s5 = sld [smem:[#allocation2 + $0x3]]  ;;  %v211_v15 = vmul.f32 %v207_v3, %v2885_v12  ;;  %v209_v16 = vmul.f32 %v207_v3, %v2860_v2 }
  0x1b   :  { %s233_s6 = sadd.f32 %s2850_s27, %s2848_s2  ;;  %v234_v9 = vstv %s2850_s27  ;;  %v76_v25 = vadd.f32 %v75_v21, %v74_v20 }
  0x1c   :  { %220 = vrot.lane.b32.xlu2 %v210_v6, %s5685_s7  ;;  %v235_v10 = vmul.f32 %v234_v9, %v2856_v1  ;;  %216 = vrot.lane.b32.xlu1 %v208_v7, %s5685_s7  ;;  %s2883_s8 = sld [smem:[#allocation2 + $0x1d]]  ;;  %v237_v23 = vmul.f32 %v234_v9, %v2854_v0  ;;  %v236_v24 = vmul.f32 %v234_v9, %v2860_v2 }
  0x1d   :  { %s260_s9 = sadd.f32 %s2858_s29, %s2852_s28  ;;  %v78_v27 = vadd.f32 %v77_v26, %v76_v25  ;;  %v261_v28 = vstv %s2858_s29  ;;  %v238_v31 = vmul.f32 %v234_v9, %v2885_v12  ;;  %s5682_s29 = smov 126  }
  0x1e   :  { %243 = vrot.lane.b32.xlu0 %v235_v10, %s5685_s7  ;;  %s287_s10 = sadd.f32 %s2862_s30, %s206_s4  ;;  %v262_v30 = vmul.f32 %v261_v28, %v2856_v1  ;;  %v264_v38 = vmul.f32 %v261_v28, %v2854_v0  ;;  %v263_v39 = vmul.f32 %v261_v28, %v2860_v2  ;;  %v288_v44 = vstv %s2862_s30 }
  0x1f   :  { %s2895_s11 = sld [smem:[#allocation2 + $0x1e]]  ;;  %v80_v32 = vadd.f32 %v79_v29, %v78_v27  ;;  %v290_v47 = vmul.f32 %v288_v44, %v2860_v2  ;;  %v289_v48 = vmul.f32 %v288_v44, %v2856_v1  ;;  %v292_v54 = vmul.f32 %v288_v44, %v2885_v12 }
  0x20   :  { %s368_s12 = sadd.f32 %s2873_s5, %s287_s10  ;;  %v265_v59 = vmul.f32 %v261_v28, %v2885_v12  ;;  %v291_v6 = vmul.f32 %v288_v44, %v2854_v0 }
  0x21   :  { %s2902_s13 = sld [smem:[#allocation2 + $0x38]]  ;;  %v82_v35 = vadd.f32 %v81_v33, %v80_v32 }
  0x22   :  { %s314_s14 = sadd.f32 %s2883_s8, %s233_s6  ;;  %v315_v52 = vstv %s2883_s8 }
  0x23   :  { %s2907_s15 = sld [smem:[#allocation2 + $0x39]]  ;;  %v84_v40 = vadd.f32 %v83_v36, %v82_v35  ;;  %v316_v53 = vmul.f32 %v315_v52, %v2856_v1  ;;  %v319_v55 = vmul.f32 %v315_v52, %v2885_v12  ;;  %v318_v56 = vmul.f32 %v315_v52, %v2854_v0 }
  0x24   :  { %222 = vrot.lane.b32.xlu2 %v211_v15, %s5685_s7  ;;  %218 = vrot.lane.b32.xlu1 %v209_v16, %s5685_s7  ;;  %s2911_s16 = sld [smem:[#allocation2 + $0x4]]  ;;  %v317_v16 = vmul.f32 %v315_v52, %v2860_v2 }
  0x25   :  { %s394_s17 = sadd.f32 %s2895_s11, %s314_s14  ;;  %v86_v43 = vadd.f32 %v85_v41, %v84_v40 }
  0x26   :  { %s2918_s18 = sld [smem:[#allocation2 + $0x1f]] }
  0x27   :  { %s341_s19 = sadd.f32 %s2902_s13, %s260_s9  ;;  %v88_v49 = vadd.f32 %v87_v45, %v86_v43  ;;  %v342_v57 = vstv %s2902_s13 }
  0x28   :  { %s2923_s20 = sld [smem:[#allocation2 + $0x3a]]  ;;  %v345_v60 = vmul.f32 %v342_v57, %v2854_v0  ;;  %v344_v61 = vmul.f32 %v342_v57, %v2860_v2  ;;  %v343_v26 = vmul.f32 %v342_v57, %v2856_v1  ;;  %v346_v36 = vmul.f32 %v342_v57, %v2885_v12 }
  0x29   :  { %s419_s21 = sadd.f32 %s2907_s15, %s341_s19  ;;  %v90_v51 = vadd.f32 %v89_v50, %v88_v49 }
  0x2a   :  { %s2929_s22 = sadd.f32 %s2911_s16, %s368_s12  ;;  %v445_v58 = vstv %s2911_s16 }
  0x2b   :  { %s2931_s23 = sld [smem:[#allocation2 + $0x5]]  ;;  %v447_v62 = vmul.f32 %v445_v58, %v2860_v2  ;;  %v446_v63 = vmul.f32 %v445_v58, %v2856_v1  ;;  %v449_v15 = vmul.f32 %v445_v58, %v2885_v12  ;;  %v448_v40 = vmul.f32 %v445_v58, %v2854_v0 }
  0x2c   :  { %247 = vrot.lane.b32.xlu2 %v237_v23, %s5685_s7  ;;  %245 = vrot.lane.b32.xlu1 %v236_v24, %s5685_s7  ;;  %s2936_s24 = sadd.f32 %s2918_s18, %s394_s17  ;;  %v478_v5 = vstv %s2918_s18 }
  0x2d   :  { %s2941_s0 = sld [smem:[#allocation2 + $0x20]]  ;;  %v455_v3 = vrot.slane %v447_v62, 1  ;;  %v454_v4 = vrot.slane %v446_v63, 1  ;;  %v479_v7 = vmul.f32 %v478_v5, %v2856_v1  ;;  %v480_v9 = vmul.f32 %v478_v5, %v2860_v2 }
  0x2e   :  { %s2944_s25 = sadd.f32 %s2923_s20, %s419_s21  ;;  %v458_v18 = vrot.slane %v449_v15, 1  ;;  %v482_v20 = vmul.f32 %v478_v5, %v2885_v12  ;;  %v481_v21 = vmul.f32 %v478_v5, %v2854_v0  ;;  %v511_v25 = vstv %s2923_s20 }
  0x2f   :  { %v456_v10 = vsel %vm378_vm1, %v454_v4, %v455_v3  ;;  %v487_v11 = vrot.slane %v479_v7, 1  ;;  %v488_v13 = vrot.slane %v480_v9, 1  ;;  %v514_v27 = vmul.f32 %v511_v25, %v2854_v0  ;;  %s3057_s30 = sld [smem:[#allocation2 + $0x3b]] }
  0x30   :  { %v491_v23 = vrot.slane %v482_v20, 1  ;;  %v490_v24 = vrot.slane %v481_v21, 1  ;;  %v3020_v28 = vmul.f32 %v511_v25, %v2885_v12  ;;  %v513_v32 = vmul.f32 %v511_v25, %v2860_v2  ;;  %s3073_s4 = sld [smem:[#allocation2 + $0x7]] }
  0x31   :  { %v489_v17 = vsel %vm378_vm1, %v487_v11, %v488_v13  ;;  %v544_v35 = vstv %s2931_s23  ;;  %v457_v44 = vrot.slane %v448_v40, 1  ;;  %s3090_s6 = sld [smem:[#allocation2 + $0x22]] }
  0x32   :  { %v492_v29 = vsel %vm378_vm1, %v490_v24, %v491_v23  ;;  %v546_v41 = vmul.f32 %v544_v35, %v2860_v2  ;;  %v545_v43 = vmul.f32 %v544_v35, %v2856_v1  ;;  %s3124_s8 = sld [smem:[#allocation2 + $0x3d]] }
  0x33   :  { %v577_v49 = vstv %s2941_s0  ;;  %v459_v50 = vsel %vm378_vm1, %v457_v44, %v458_v18  ;;  %s3142_s9 = sld [smem:[#allocation2 + $0x8]] }
  0x34   :  { %270 = vrot.lane.b32.xlu2 %v262_v30, %s5685_s7  ;;  %249 = vrot.lane.b32.xlu1 %v238_v31, %s5685_s7  ;;  %v523_v30 = vrot.slane %v514_v27, 1  ;;  %v524_v31 = vrot.slane %v3020_v28, 1  ;;  %v3047_v52 = vmul.f32 %v577_v49, %v2860_v2  ;;  %v580_v62 = vmul.f32 %v577_v49, %v2854_v0  ;;  %s3161_s10 = sld [smem:[#allocation2 + $0x23]] }
  0x35   :  { %v610_v7 = vstv %s3057_s30  ;;  %s3200_s12 = sld [smem:[#allocation2 + $0x3e]] }
  0x36   :  { %v3078_v11 = vmul.f32 %v610_v7, %v2885_v12  ;;  %v719_v21 = vstv %s3073_s4  ;;  %s3226_s13 = sld [smem:[#allocation2 + $0xa]] }
  0x37   :  { %v720_v27 = vmul.f32 %v719_v21, %v2856_v1  ;;  %v723_v44 = vmul.f32 %v719_v21, %v2885_v12  ;;  %s3243_s14 = sld [smem:[#allocation2 + $0x25]] }
  0x38   :  { %s3270_s16 = sld [smem:[#allocation2 + $0x40]] }
  0x39   :  { %s3285_s17 = sld [smem:[#allocation2 + $0xb]] }
  0x3a   :  { %s3301_s18 = sld [smem:[#allocation2 + $0x26]] }
  0x3b   :  { %s3337_s21 = sld [smem:[#allocation2 + $0x41]] }
  0x3c   :  { %274 = vrot.lane.b32.xlu2 %v264_v38, %s5685_s7  ;;  %272 = vrot.lane.b32.xlu1 %v263_v39, %s5685_s7  ;;  %v525_v38 = vsel %vm378_vm1, %v523_v30, %v524_v31  ;;  %v521_v39 = vrot.slane %v513_v32, 1  ;;  %s3347_s26 = sld [smem:[#allocation2 + $0xd]] }
  0x3d   :  { %s3402_s27 = sld [smem:[#allocation2 + $0x43]] }
  0x3e   :  { %s3423_s3 = sld [smem:[#allocation2 + $0x3c]] }
  0x42   :  { %5787 = sst [smem:[#allocation32_spill]] %s3347_s26 }
  0x44   :  { %299 = vrot.lane.b32.xlu2 %v290_v47, %s5682_s29  ;;  %297 = vrot.lane.b32.xlu1 %v289_v48, %s5682_s29  ;;  %v554_v47 = vrot.slane %v546_v41, 1  ;;  %v553_v48 = vrot.slane %v545_v43, 1 }
  0x48   :  { %91 = vadd.xlane.f32.xlu0 %v90_v51  ;;  %v578_v51 = vmul.f32 %v577_v49, %v2856_v1 }
  0x4c   :  { %324 = vrot.lane.b32.xlu2 %v316_v53, %s5682_s29  ;;  %303 = vrot.lane.b32.xlu1 %v292_v54, %s5682_s29  ;;  %v555_v53 = vsel %vm378_vm1, %v553_v48, %v554_v47  ;;  %v586_v54 = vrot.slane %v578_v51, 1  ;;  %v611_v51 = vmul.f32 %v610_v7, %v2856_v1 }
  0x54   :  { %330 = vrot.lane.b32.xlu2 %v319_v55, %s5682_s29  ;;  %328 = vrot.lane.b32.xlu1 %v318_v56, %s5682_s29  ;;  %v587_v55 = vrot.slane %v3047_v52, 1  ;;  %v548_v56 = vmul.f32 %v544_v35, %v2885_v12 }
  0x56   :  { %v588_v58 = vsel %vm378_vm1, %v586_v54, %v587_v55 }
  0x5c   :  { %276 = vrot.lane.b32.xlu0 %v265_v59, %s5685_s7  ;;  %355 = vrot.lane.b32.xlu2 %v345_v60, %s5682_s29  ;;  %v557_v59 = vrot.slane %v548_v56, 1  ;;  %v512_v60 = vmul.f32 %v511_v25, %v2856_v1  ;;  %v547_v25 = vmul.f32 %v544_v35, %v2854_v0  ;;  %v752_v35 = vstv %s3090_s6 }
  0x5d   :  { %353 = vrot.lane.b32.xlu1 %v344_v61, %s5682_s29  ;;  %v581_v61 = vmul.f32 %v577_v49, %v2885_v12  ;;  %v753_v40 = vmul.f32 %v752_v35, %v2856_v1  ;;  %v3112_v28 = vmul.f32 %v752_v35, %v2860_v2  ;;  %v755_v54 = vmul.f32 %v752_v35, %v2854_v0 }
  0x5e   :  { %v520_v63 = vrot.slane %v512_v60, 1  ;;  %v619_v56 = vrot.slane %v611_v51, 1 }
  0x5f   :  { %v590_v5 = vrot.slane %v581_v61, 1  ;;  %v761_v41 = vrot.slane %v753_v40, 2  ;;  %v762_v43 = vrot.slane %v3112_v28, 2  ;;  %v764_v61 = vrot.slane %v755_v54, 2 }
  0x60   :  { %v522_v9 = vsel %vm378_vm1, %v520_v63, %v521_v39 }
  0x61   :  { %v763_v49 = vsel %vm652_vm2, %v761_v41, %v762_v43  ;;  %v851_v41 = vstv %s3161_s10 }
  0x62   :  { %v852_v51 = vmul.f32 %v851_v41, %v2856_v1 }
  0x64   :  { %301 = vrot.lane.b32.xlu0 %v291_v6, %s5682_s29  ;;  %462 = vrot.lane.b32.xlu2 %v455_v3, %s5685_s7  ;;  %v589_v6 = vrot.slane %v580_v62, 1  ;;  %v785_v62 = vstv %s3124_s8 }
  0x65   :  { %460 = vrot.lane.b32.xlu1 %v456_v10, %s5685_s7  ;;  %v613_v10 = vmul.f32 %v610_v7, %v2854_v0  ;;  %v788_v52 = vmul.f32 %v785_v62, %v2854_v0 }
  0x67   :  { %v622_v15 = vrot.slane %v613_v10, 1  ;;  %v787_v10 = vmul.f32 %v785_v62, %v2860_v2 }
  0x6c   :  { %326 = vrot.lane.b32.xlu0 %v317_v16, %s5682_s29  ;;  %493 = vrot.lane.b32.xlu2 %v489_v17, %s5685_s7  ;;  %v623_v16 = vrot.slane %v3078_v11, 1  ;;  %v612_v17 = vmul.f32 %v610_v7, %v2860_v2  ;;  %v797_v7 = vrot.slane %v788_v52, 2  ;;  %v3187_v11 = vmul.f32 %v851_v41, %v2860_v2 }
  0x6d   :  { %466 = vrot.lane.b32.xlu1 %v458_v18, %s5685_s7 }
  0x6e   :  { %v620_v24 = vrot.slane %v612_v17, 1  ;;  %v3164_v17 = vstv %s3142_s9 }
  0x70   :  { %v621_v63 = vsel %vm378_vm1, %v619_v56, %v620_v24  ;;  %v860_v56 = vrot.slane %v852_v51, 2 }
  0x74   :  { %351 = vrot.lane.b32.xlu0 %v343_v26, %s5682_s29  ;;  %499 = vrot.lane.b32.xlu2 %v491_v23, %s5685_s7  ;;  %v624_v23 = vsel %vm378_vm1, %v622_v15, %v623_v16  ;;  %v721_v26 = vmul.f32 %v719_v21, %v2860_v2 }
  0x75   :  { %497 = vrot.lane.b32.xlu1 %v492_v29, %s5685_s7  ;;  %v556_v29 = vrot.slane %v547_v25, 1  ;;  %v722_v25 = vmul.f32 %v719_v21, %v2854_v0 }
  0x76   :  { %v3028_v33 = vpop.permute.xlu2 %220 }
  0x77   :  { %5766 = vst [vmem:[#allocation11_spill] sm:$0xff] %v3028_v33  ;;  %v3371_v33 = vstv %s3347_s26  ;;  %s5799_s26 = smov 127  }
  0x78   :  { %5791 = vst [vmem:[#allocation36_spill] sm:$0xff] %v3371_v33 }
  0x7c   :  { %357 = vrot.lane.b32.xlu0 %v346_v36, %s5682_s29  ;;  %530 = vrot.lane.b32.xlu2 %v525_v38, %s5685_s7  ;;  %v729_v36 = vrot.slane %v721_v26, 2  ;;  %v728_v38 = vrot.slane %v720_v27, 2  ;;  %v820_v26 = vmul.f32 %v3164_v17, %v2860_v2  ;;  %v819_v27 = vmul.f32 %v3164_v17, %v2856_v1 }
  0x7d   :  { %528 = vrot.lane.b32.xlu1 %v521_v39, %s5685_s7  ;;  %v558_v39 = vsel %vm378_vm1, %v556_v29, %v557_v59 }
  0x7e   :  { %v3041_v45 = vpop.permute.xlu2 %222  ;;  %v828_v40 = vrot.slane %v820_v26, 2 }
  0x84   :  { %464 = vrot.lane.b32.xlu0 %v459_v50, %s5685_s7  ;;  %561 = vrot.lane.b32.xlu2 %v554_v47, %s5682_s29  ;;  %v732_v50 = vrot.slane %v723_v44, 2 }
  0x85   :  { %559 = vrot.lane.b32.xlu1 %v555_v53, %s5682_s29  ;;  %v756_v53 = vmul.f32 %v752_v35, %v2885_v12 }
  0x86   :  { %v3055_v57 = vpop.permute.xlu2 %247 }
  0x87   :  { %v765_v60 = vrot.slane %v756_v53, 2 }
  0x8c   :  { %495 = vrot.lane.b32.xlu0 %v488_v13, %s5685_s7  ;;  %592 = vrot.lane.b32.xlu2 %v588_v58, %s5682_s29  ;;  %v591_v13 = vsel %vm378_vm1, %v589_v6, %v590_v5 }
  0x8d   :  { %565 = vrot.lane.b32.xlu1 %v557_v59, %s5682_s29 }
  0x8e   :  { %v3068_v3 = vpop.permute.xlu2 %270  ;;  %v3070_v4 = vpop.permute.xlu1 %216 }
  0x8f   :  { %5767 = vst [vmem:[#allocation12_spill] sm:$0xff] %v3068_v3 }
  0x90   :  { %v3150_v6 = vpop.permute.xlu0 %243 }
  0x94   :  { %526 = vrot.lane.b32.xlu0 %v522_v9, %s5685_s7  ;;  %598 = vrot.lane.b32.xlu2 %v590_v5, %s5682_s29  ;;  %v766_v5 = vsel %vm652_vm2, %v764_v61, %v765_v60 }
  0x95   :  { %596 = vrot.lane.b32.xlu1 %v591_v13, %s5682_s29 }
  0x96   :  { %v3086_v18 = vpop.permute.xlu2 %274  ;;  %v3088_v20 = vpop.permute.xlu1 %218 }
  0x9c   :  { %532 = vrot.lane.b32.xlu0 %v524_v31, %s5685_s7  ;;  %629 = vrot.lane.b32.xlu2 %v624_v23, %s5682_s29  ;;  %v730_v31 = vsel %vm652_vm2, %v728_v38, %v729_v36  ;;  %v731_v38 = vrot.slane %v722_v25, 2  ;;  %v854_v25 = vmul.f32 %v851_v41, %v2854_v0 }
  0x9d   :  { %627 = vrot.lane.b32.xlu1 %v620_v24, %s5682_s29  ;;  %v795_v24 = vrot.slane %v787_v10, 2  ;;  %v786_v10 = vmul.f32 %v785_v62, %v2856_v1 }
  0x9e   :  { %v3104_v30 = vpop.permute.xlu2 %299  ;;  %v3106_v32 = vpop.permute.xlu1 %245 }
  0x9f   :  { %5768 = vst [vmem:[#allocation13_spill] sm:$0xff] %v3106_v32  ;;  %v794_v26 = vrot.slane %v786_v10, 2 }
  0xa4   :  { %563 = vrot.lane.b32.xlu0 %v558_v39, %s5682_s29  ;;  %736 = vrot.lane.b32.xlu2 %v729_v36, %s5685_s7 }
  0xa5   :  { %734 = vrot.lane.b32.xlu1 %v730_v31, %s5685_s7  ;;  %v827_v31 = vrot.slane %v819_v27, 2 }
  0xa6   :  { %v3120_v47 = vpop.permute.xlu2 %324  ;;  %v3122_v48 = vpop.permute.xlu1 %249 }
  0xac   :  { %594 = vrot.lane.b32.xlu0 %v587_v55, %s5682_s29  ;;  %767 = vrot.lane.b32.xlu2 %v763_v49, %s5685_s7  ;;  %v3147_v55 = vmul.f32 %v785_v62, %v2885_v12  ;;  %v733_v49 = vsel %vm652_vm2, %v731_v38, %v732_v50  ;;  %v863_v38 = vrot.slane %v854_v25, 2  ;;  %v884_v62 = vstv %s3200_s12 }
  0xad   :  { %740 = vrot.lane.b32.xlu1 %v732_v50, %s5685_s7  ;;  %v822_v50 = vmul.f32 %v3164_v17, %v2885_v12  ;;  %v888_v28 = vmul.f32 %v884_v62, %v2885_v12 }
  0xae   :  { %v3137_v58 = vpop.permute.xlu2 %330  ;;  %v3139_v59 = vpop.permute.xlu1 %272  ;;  %v798_v9 = vrot.slane %v3147_v55, 2 }
  0xb0   :  { %v799_v23 = vsel %vm652_vm2, %v797_v7, %v798_v9  ;;  %v831_v7 = vrot.slane %v822_v50, 2  ;;  %v950_v50 = vstv %s3226_s13 }
  0xb4   :  { %625 = vrot.lane.b32.xlu0 %v621_v63, %s5682_s29  ;;  %773 = vrot.lane.b32.xlu2 %v765_v60, %s5685_s7  ;;  %v861_v60 = vrot.slane %v3187_v11, 2 }
  0xb5   :  { %771 = vrot.lane.b32.xlu1 %v766_v5, %s5685_s7 }
  0xb6   :  { %v3157_v13 = vpop.permute.xlu2 %355  ;;  %v3159_v15 = vpop.permute.xlu1 %297  ;;  %v862_v5 = vsel %vm652_vm2, %v860_v56, %v861_v60 }
  0xb7   :  { %5769 = vst [vmem:[#allocation14_spill] sm:$0xff] %v3159_v15 }
  0xbb   :  { %v92_v29 = vpop.xlane.xlu0 %91 }
  0xbc   :  { %v93_v36 = vrot.slane %v92_v29, 4  ;;  %631 = vrot.lane.b32.xlu0 %v623_v16, %s5682_s29  ;;  %804 = vrot.lane.b32.xlu2 %v799_v23, %s5685_s7  ;;  %v829_v16 = vsel %vm652_vm2, %v827_v31, %v828_v40  ;;  %v855_v23 = vmul.f32 %v851_v41, %v2885_v12  ;;  %v887_v31 = vmul.f32 %v884_v62, %v2854_v0 }
  0xbd   :  { %802 = vrot.lane.b32.xlu1 %v795_v24, %s5685_s7 }
  0xbe   :  { %v94_v35 = vadd.f32 %v93_v36, %v92_v29  ;;  %v3179_v39 = vpop.permute.xlu2 %462  ;;  %v3181_v21 = vpop.permute.xlu1 %303  ;;  %v864_v36 = vrot.slane %v855_v23, 2  ;;  %v896_v41 = vrot.slane %v887_v31, 2  ;;  %v977_v23 = vstv %s3243_s14 }
  0xc0   :  { %v95_v44 = vrot.slane %v94_v35, 2 }
  0xc2   :  { %v96_v53 = vadd.f32 %v95_v44, %v94_v35  ;;  %v897_v44 = vrot.slane %v888_v28, 2 }
  0xc4   :  { %738 = vrot.lane.b32.xlu0 %v733_v49, %s5685_s7  ;;  %835 = vrot.lane.b32.xlu2 %v828_v40, %s5682_s29  ;;  %v97_v54 = vrot.slane %v96_v53, 1  ;;  %v796_v40 = vsel %vm652_vm2, %v794_v26, %v795_v24  ;;  %v886_v49 = vmul.f32 %v884_v62, %v2860_v2 }
  0xc5   :  { %833 = vrot.lane.b32.xlu1 %v829_v16, %s5682_s29  ;;  %v898_v16 = vsel %vm652_vm2, %v896_v41, %v897_v44 }
  0xc6   :  { %v3196_v61 = vpop.permute.xlu2 %493  ;;  %v3198_v63 = vpop.permute.xlu1 %328  ;;  %v98_v52 = vadd.f32 %v97_v54, %v96_v53  ;;  %v894_v53 = vrot.slane %v886_v49, 2  ;;  %v821_v54 = vmul.f32 %v3164_v17, %v2854_v0  ;;  %v952_v17 = vmul.f32 %v950_v50, %v2893_v14 }
  0xc7   :  { %v981_v49 = vmul.f32 %v977_v23, %v2960_v37 }
  0xc8   :  { %2702 = vpush %v98_v52  ;;  %v830_v56 = vrot.slane %v821_v54, 2 }
  0xca   :  { %v832_v55 = vsel %vm652_vm2, %v830_v56, %v831_v7 }
  0xcc   :  { %769 = vrot.lane.b32.xlu0 %v762_v43, %s5685_s7  ;;  %866 = vrot.lane.b32.xlu2 %v862_v5, %s5682_s29  ;;  %v865_v43 = vsel %vm652_vm2, %v863_v38, %v864_v36  ;;  %v978_v38 = vmul.f32 %v977_v23, %v2875_v8 }
  0xcd   :  { %839 = vrot.lane.b32.xlu1 %v831_v7, %s5682_s29  ;;  %v885_v7 = vmul.f32 %v884_v62, %v2856_v1 }
  0xce   :  { %v3211_v27 = vpop.permute.xlu0 %276  ;;  %v3213_v29 = vpop.permute.xlu2 %499 }
  0xcf   :  { %5770 = vst [vmem:[#allocation15_spill] sm:$0xff] %v3211_v27  ;;  %v3216_v35 = vpop.permute.xlu1 %353  ;;  %v893_v31 = vrot.slane %v885_v7, 2 }
  0xd0   :  { %5771 = vst [vmem:[#allocation16_spill] sm:$0xff] %v3216_v35  ;;  %v3658_v35 = vstv %s2907_s15 }
  0xd1   :  { %v895_v62 = vsel %vm652_vm2, %v893_v31, %v894_v53  ;;  %v953_v31 = vmul.f32 %v950_v50, %v2952_v34 }
  0xd4   :  { %800 = vrot.lane.b32.xlu0 %v796_v40, %s5685_s7  ;;  %872 = vrot.lane.b32.xlu2 %v864_v36, %s5682_s29  ;;  %v954_v40 = vmul.f32 %v950_v50, %v2960_v37 }
  0xd5   :  { %870 = vrot.lane.b32.xlu1 %v865_v43, %s5682_s29 }
  0xd6   :  { %v3228_v24 = vpop.permute.xlu0 %301  ;;  %v3230_v51 = vpop.permute.xlu2 %530 }
  0xd7   :  { %5772 = vst [vmem:[#allocation17_spill] sm:$0xff] %v3228_v24  ;;  %v3232_v11 = vpop.permute.xlu1 %460 }
  0xd8   :  { %5773 = vst [vmem:[#allocation18_spill] sm:$0xff] %v3232_v11 }
  0xdc   :  { %806 = vrot.lane.b32.xlu0 %v798_v9, %s5685_s7  ;;  %903 = vrot.lane.b32.xlu2 %v898_v16, %s5682_s29  ;;  %v951_v9 = vmul.f32 %v950_v50, %v2875_v8  ;;  %v1004_v16 = vstv %s3270_s16 }
  0xdd   :  { %901 = vrot.lane.b32.xlu1 %v894_v53, %s5682_s29  ;;  %v1007_v53 = vmul.f32 %v1004_v16, %v2952_v34 }
  0xde   :  { %v3245_v52 = vpop.permute.xlu0 %326  ;;  %v3247_v5 = vpop.permute.xlu2 %561 }
  0xdf   :  { %5774 = vst [vmem:[#allocation19_spill] sm:$0xff] %v3245_v52  ;;  %v3249_v10 = vpop.permute.xlu1 %466  ;;  %v1005_v52 = vmul.f32 %v1004_v16, %v2875_v8 }
  0xe4   :  { %837 = vrot.lane.b32.xlu0 %v832_v55, %s5682_s29  ;;  %961 = vrot.lane.b32.xlu2 %v952_v17, %s5685_s7  ;;  %v1006_v55 = vmul.f32 %v1004_v16, %v2893_v14 }
  0xe5   :  { %959 = vrot.lane.b32.xlu1 %v951_v9, %s5685_s7  ;;  %v3299_v9 = vstv %s3285_s17 }
  0xe6   :  { %v3258_v25 = vpop.permute.xlu0 %351  ;;  %v3260_v26 = vpop.permute.xlu2 %592 }
  0xe7   :  { %5775 = vst [vmem:[#allocation20_spill] sm:$0xff] %v3258_v25  ;;  %v3262_v36 = vpop.permute.xlu1 %497  ;;  %v1188_v25 = vmul.f32 %v3371_v33, %v2875_v8 }
  0xe8   :  { %5776 = vst [vmem:[#allocation21_spill] sm:$0xff] %v3262_v36 }
  0xec   :  { %868 = vrot.lane.b32.xlu0 %v861_v60, %s5682_s29  ;;  %986 = vrot.lane.b32.xlu2 %v978_v38, %s5685_s7  ;;  %v980_v60 = vmul.f32 %v977_v23, %v2952_v34 }
  0xed   :  { %965 = vrot.lane.b32.xlu1 %v954_v40, %s5685_s7 }
  0xee   :  { %v3272_v28 = vpop.permute.xlu0 %357  ;;  %v3274_v43 = vpop.permute.xlu2 %598 }
  0xef   :  { %5777 = vst [vmem:[#allocation22_spill] sm:$0xff] %v3272_v28  ;;  %v3276_v41 = vpop.permute.xlu1 %528  ;;  %v3364_v28 = vstv %s3337_s21 }
  0xf0   :  { %5778 = vst [vmem:[#allocation23_spill] sm:$0xff] %v3276_v41 }
  0xf4   :  { %899 = vrot.lane.b32.xlu0 %v895_v62, %s5682_s29  ;;  %992 = vrot.lane.b32.xlu2 %v981_v49, %s5685_s7  ;;  %v1032_v49 = vmul.f32 %v3299_v9, %v2875_v8  ;;  %v3318_v62 = vstv %s3301_s18 }
  0xf5   :  { %990 = vrot.lane.b32.xlu1 %v980_v60, %s5685_s7 }
  0xf6   :  { %v3287_v54 = vpop.permute.xlu0 %464  ;;  %v3289_v56 = vpop.permute.xlu2 %629 }
  0xf7   :  { %5779 = vst [vmem:[#allocation24_spill] sm:$0xff] %v3287_v54  ;;  %v3291_v17 = vpop.permute.xlu1 %559 }
  0xf8   :  { %5780 = vst [vmem:[#allocation25_spill] sm:$0xff] %v3291_v17 }
  0xf9   :  { %s3322_s19 = spop %2702 }
  0xfa   :  { %5783 = sst [smem:[#allocation28_spill]] %s3322_s19  ;;  %s5681_s20 = smul.f32 0.0006510417, %s3322_s19 }
  0xfb   :  { %s3440_s19 = sld [smem:[#allocation2 + $0xe]] }
  0xfc   :  { %905 = vrot.lane.b32.xlu0 %v897_v44, %s5682_s29  ;;  %1017 = vrot.lane.b32.xlu2 %v1007_v53, %s5685_s7  ;;  %v1033_v44 = vmul.f32 %v3299_v9, %v2893_v14 }
  0xfd   :  { %1015 = vrot.lane.b32.xlu1 %v1006_v55, %s5685_s7  ;;  %v979_v55 = vmul.f32 %v977_v23, %v2893_v14 }
  0xfe   :  { %v3303_v38 = vpop.permute.xlu0 %495  ;;  %v3305_v40 = vpop.permute.xlu2 %736 }
  0xff   :  { %5781 = vst [vmem:[#allocation26_spill] sm:$0xff] %v3303_v38  ;;  %v3307_v7 = vpop.permute.xlu1 %565 }
 0x100   :  { %5782 = vst [vmem:[#allocation27_spill] sm:$0xff] %v3307_v7  ;;  %v3668_v7 = vstv %s2873_s5  ;;  %s3687_s5 = sld [smem:[#allocation2 + $0x6]] }
 0x104   :  { %963 = vrot.lane.b32.xlu0 %v953_v31, %s5685_s7  ;;  %1042 = vrot.lane.b32.xlu2 %v1033_v44, %s5682_s29  ;;  %v1059_v31 = vmul.f32 %v3318_v62, %v2875_v8  ;;  %v1035_v44 = vmul.f32 %v3299_v9, %v2960_v37 }
 0x105   :  { %1040 = vrot.lane.b32.xlu1 %v1032_v49, %s5682_s29  ;;  %v3341_v49 = vstv %s5681_s20  ;;  %s3373_s20 = sld [smem:[#allocation2 + $0x28]] }
 0x106   :  { %v3320_v60 = vpop.permute.xlu2 %767  ;;  %v3324_v50 = vpop.permute.xlu0 %526  ;;  %v102_v32 = vsub.f32 %v2856_v1, %v3341_v49  ;;  %v103_v54 = vsub.f32 %v2860_v2, %v3341_v49  ;;  %v104_v1 = vsub.f32 %v2875_v8, %v3341_v49  ;;  %v1008_v2 = vmul.f32 %v1004_v16, %v2960_v37 }
 0x107   :  { %5784 = vst [vmem:[#allocation29_spill] sm:$0xff] %v3324_v50  ;;  %v3326_v53 = vpop.permute.xlu1 %596  ;;  %v105_v16 = vsub.f32 %v2893_v14, %v3341_v49 }
 0x108   :  { %5785 = vst [vmem:[#allocation30_spill] sm:$0xff] %v3326_v53  ;;  %v114_v24 = vmul.f32 %v102_v32, %v102_v32  ;;  %v115_v50 = vmul.f32 %v103_v54, %v103_v54  ;;  %v1087_v32 = vmul.f32 %v3364_v28, %v2893_v14 }
 0x10a   :  { %v126_v54 = vsel %vm67_vm0, %v114_v24, 0.0 }
 0x10b   :  { %v3400_v11 = vstv %s3373_s20 }
 0x10c   :  { %988 = vrot.lane.b32.xlu0 %v979_v55, %s5685_s7  ;;  %1067 = vrot.lane.b32.xlu2 %v1059_v31, %s5682_s29  ;;  %v1062_v55 = vmul.f32 %v3318_v62, %v2960_v37  ;;  %5795 = vst [vmem:[#allocation40_spill] sm:$0xff] %v3400_v11 }
 0x10d   :  { %1046 = vrot.lane.b32.xlu1 %v1035_v44, %s5682_s29  ;;  %v1061_v44 = vmul.f32 %v3318_v62, %v2952_v34 }
 0x10e   :  { %v3343_v23 = vpop.permute.xlu2 %773  ;;  %v3352_v31 = vpop.permute.xlu0 %532 }
 0x10f   :  { %v3345_v38 = vpop.permute.xlu1 %627  ;;  %5788 = vst [vmem:[#allocation33_spill] sm:$0xff] %v3352_v31 }
 0x110   :  { %5786 = vst [vmem:[#allocation31_spill] sm:$0xff] %v3345_v38  ;;  %v1196_v38 = vrot.slane %v1188_v25, 1  ;;  %v1221_v25 = vmul.f32 %v3400_v11, %v2875_v8 }
 0x114   :  { %1013 = vrot.lane.b32.xlu0 %v1005_v52, %s5685_s7  ;;  %1073 = vrot.lane.b32.xlu2 %v1062_v55, %s5682_s29  ;;  %v1088_v52 = vmul.f32 %v3364_v28, %v2952_v34  ;;  %v127_v55 = vsel %vm67_vm0, %v115_v50, 0.0 }
 0x115   :  { %1071 = vrot.lane.b32.xlu1 %v1061_v44, %s5682_s29  ;;  %v1189_v44 = vmul.f32 %v3371_v33, %v2893_v14  ;;  %v128_v17 = vadd.f32 %v127_v55, %v126_v54  ;;  %v107_v55 = vsub.f32 %v2916_v22, %v3341_v49 }
 0x116   :  { %v3366_v31 = vpop.permute.xlu2 %804  ;;  %v3388_v3 = vpop.permute.xlu0 %563 }
 0x117   :  { %5789 = vst [vmem:[#allocation34_spill] sm:$0xff] %v3366_v31  ;;  %v3368_v27 = vpop.permute.xlu1 %734  ;;  %v1197_v50 = vrot.slane %v1189_v44, 1 }
 0x118   :  { %5790 = vst [vmem:[#allocation35_spill] sm:$0xff] %v3368_v27  ;;  %v116_v27 = vmul.f32 %v104_v1, %v104_v1  ;;  %v106_v1 = vsub.f32 %v2904_v19, %v3341_v49 }
 0x119   :  { %5792 = vst [vmem:[#allocation37_spill] sm:$0xff] %v3388_v3  ;;  %v117_v3 = vmul.f32 %v105_v16, %v105_v16  ;;  %v1198_v54 = vsel %vm378_vm1, %v1196_v38, %v1197_v50  ;;  %v1229_v16 = vrot.slane %v1221_v25, 1  ;;  %v109_v25 = vsub.f32 %v2885_v12, %v3341_v49 }
 0x11a   :  { %v118_v44 = vmul.f32 %v106_v1, %v106_v1  ;;  %v110_v12 = vsub.f32 %v2952_v34, %v3341_v49 }
 0x11b   :  { %v131_v53 = vsel %vm67_vm0, %v117_v3, 0.0  ;;  %v3428_v3 = vstv %s3402_s27 }
 0x11c   :  { %1019 = vrot.lane.b32.xlu0 %v1008_v2, %s5685_s7  ;;  %1098 = vrot.lane.b32.xlu2 %v1088_v52, %s5682_s29  ;;  %v129_v2 = vsel %vm67_vm0, %v116_v27, 0.0  ;;  %5798 = vst [vmem:[#allocation43_spill] sm:$0xff] %v3428_v3  ;;  %v133_v1 = vsel %vm67_vm0, %v118_v44, 0.0 }
 0x11d   :  { %1096 = vrot.lane.b32.xlu1 %v1087_v32, %s5682_s29  ;;  %v130_v52 = vadd.f32 %v129_v2, %v128_v17  ;;  %v1222_v32 = vmul.f32 %v3400_v11, %v2893_v14  ;;  %s3421_s29 = sld [smem:[#allocation2 + $0x29]] }
 0x11e   :  { %v3395_v24 = vpop.permute.xlu2 %835  ;;  %v3416_v27 = vpop.permute.xlu0 %594 }
 0x11f   :  { %5793 = vst [vmem:[#allocation38_spill] sm:$0xff] %v3395_v24  ;;  %v3397_v41 = vpop.permute.xlu1 %740  ;;  %v132_v19 = vadd.f32 %v131_v53, %v130_v52  ;;  %v1230_v38 = vrot.slane %v1222_v32, 1  ;;  %v108_v53 = vsub.f32 %v2854_v0, %v3341_v49  ;;  %v1254_v32 = vmul.f32 %v3428_v3, %v2875_v8 }
 0x120   :  { %5794 = vst [vmem:[#allocation39_spill] sm:$0xff] %v3397_v41 }
 0x121   :  { %5796 = vst [vmem:[#allocation41_spill] sm:$0xff] %v3416_v27  ;;  %v134_v2 = vadd.f32 %v133_v1, %v132_v19  ;;  %v1231_v52 = vsel %vm378_vm1, %v1229_v16, %v1230_v38  ;;  %v120_v0 = vmul.f32 %v108_v53, %v108_v53  ;;  %v1262_v1 = vrot.slane %v1254_v32, 1 }
 0x122   :  { %v121_v53 = vmul.f32 %v109_v25, %v109_v25  ;;  %v3465_v32 = vstv %s3440_s19  ;;  %v122_v25 = vmul.f32 %v110_v12, %v110_v12  ;;  %v112_v12 = vsub.f32 %v2966_v42, %v3341_v49 }
 0x123   :  { %v1319_v27 = vstv %s3421_s29  ;;  %5803 = vst [vmem:[#allocation47_spill] sm:$0xff] %v3465_v32 }
 0x124   :  { %1204 = vrot.lane.b32.xlu2 %v1197_v50, %s5685_s7  ;;  %v119_v50 = vmul.f32 %v107_v55, %v107_v55 }
 0x125   :  { %1202 = vrot.lane.b32.xlu1 %v1198_v54, %s5685_s7  ;;  %s609_s7 = sadd.f32 %s3057_s30, %s2944_s25  ;;  %v1255_v54 = vmul.f32 %v3428_v3, %v2893_v14 }
 0x126   :  { %v3419_v17 = vpop.permute.xlu2 %866  ;;  %v135_v55 = vsel %vm67_vm0, %v119_v50, 0.0  ;;  %s3467_s30 = sld [smem:[#allocation2 + $0x3f]] }
 0x127   :  { %v3425_v22 = vpop.permute.xlu1 %771  ;;  %v136_v44 = vadd.f32 %v135_v55, %v134_v2  ;;  %s693_s25 = sadd.f32 %s3423_s3, %s609_s7  ;;  %v1263_v16 = vrot.slane %v1255_v54, 1  ;;  %v1320_v2 = vmul.f32 %v1319_v27, %v2875_v8  ;;  %v111_v55 = vsub.f32 %v2960_v37, %v3341_v49 }
 0x128   :  { %5797 = vst [vmem:[#allocation42_spill] sm:$0xff] %v3425_v22  ;;  %v3451_v22 = vpop.permute.xlu0 %625 }
 0x129   :  { %5800 = vst [vmem:[#allocation44_spill] sm:$0xff] %v3451_v22  ;;  %s784_s7 = sadd.f32 %s3124_s8, %s693_s25  ;;  %v1264_v54 = vsel %vm378_vm1, %v1262_v1, %v1263_v16  ;;  %v1328_v8 = vrot.slane %v1320_v2, 1  ;;  %s5808_s25 = smov 126  }
 0x12b   :  { %s883_s8 = sadd.f32 %s3200_s12, %s784_s7 }
 0x12c   :  { %1237 = vrot.lane.b32.xlu2 %v1230_v38, %s5799_s26  ;;  %v137_v38 = vsel %vm67_vm0, %v120_v0, 0.0  ;;  %v139_v0 = vsel %vm67_vm0, %v121_v53, 0.0  ;;  %v141_v53 = vsel %vm67_vm0, %v122_v25, 0.0 }
 0x12d   :  { %1235 = vrot.lane.b32.xlu1 %v1231_v52, %s5799_s26  ;;  %v138_v50 = vadd.f32 %v137_v38, %v136_v44  ;;  %v3461_v52 = vmul.f32 %v1319_v27, %v2893_v14  ;;  %v3478_v38 = vmul.f32 %v3465_v32, %v2893_v14  ;;  %s938_s12 = sadd.f32 %s3467_s30, %s883_s8 }
 0x12e   :  { %v3448_v19 = vpop.permute.xlu2 %872 }
 0x12f   :  { %v3453_v41 = vpop.permute.xlu1 %802  ;;  %5802 = vst [vmem:[#allocation46_spill] sm:$0xff] %v3461_v52  ;;  %v140_v44 = vadd.f32 %v139_v0, %v138_v50  ;;  %v5689_v1 = vrot.slane %v3461_v52, 1  ;;  %v113_v0 = vsub.f32 %v2973_v46, %v3341_v49  ;;  %s3503_s7 = sadd.f32 %s3270_s16, %s938_s12  ;;  %v3510_v46 = vmul.f32 %v3371_v33, %v2960_v37  ;;  %v3561_v52 = vld [vmem:[#allocation7 + $0x8] sm:$0xff] }
 0x130   :  { %5801 = vst [vmem:[#allocation45_spill] sm:$0xff] %v3453_v41  ;;  %v3488_v2 = vpop.permute.xlu0 %631  ;;  %s3518_s16 = sld [smem:[#allocation2 + $0x42]] }
 0x131   :  { %5804 = vst [vmem:[#allocation48_spill] sm:$0xff] %v3478_v38  ;;  %v142_v50 = vadd.f32 %v141_v53, %v140_v44  ;;  %v1330_v14 = vsel %vm378_vm1, %v1328_v8, %v5689_v1  ;;  %v125_v8 = vmul.f32 %v113_v0, %v113_v0  ;;  %s1084_s8 = sadd.f32 %s3337_s21, %s3503_s7  ;;  %v1289_v1 = vmul.f32 %v3465_v32, %v2952_v34 }
 0x132   :  { %5807 = vst [vmem:[#allocation51_spill] sm:$0xff] %v3488_v2  ;;  %s3533_s12 = sld [smem:[#allocation2 + $0x44]] }
 0x133   :  { %5810 = vst [vmem:[#allocation53_spill] sm:$0xff] %v3510_v46  ;;  %s3544_s21 = sld [smem:[#allocation2 + $0x21]]  ;;  %v1298_v2 = vrot.slane %v1289_v1, 1 }
 0x134   :  { %1270 = vrot.lane.b32.xlu2 %v1263_v16, %s5799_s26  ;;  %v123_v16 = vmul.f32 %v111_v55, %v111_v55  ;;  %v3500_v55 = vmul.f32 %v3400_v11, %v2960_v37  ;;  %s3581_s7 = sld [smem:[#allocation2 + $0x45]] }
 0x135   :  { %1268 = vrot.lane.b32.xlu1 %v1264_v54, %s5799_s26  ;;  %v5690_v54 = vrot.slane %v3478_v38, 1 }
 0x136   :  { %v3480_v22 = vpop.permute.xlu2 %903  ;;  %v143_v42 = vsel %vm67_vm0, %v123_v16, 0.0  ;;  %5809 = vst [vmem:[#allocation52_spill] sm:$0xff] %v3500_v55  ;;  %v5691_v16 = vrot.slane %v3500_v55, 1  ;;  %v3583_v55 = vld [vmem:[#allocation7 + $0x38] sm:$0xff] }
 0x137   :  { %5805 = vst [vmem:[#allocation49_spill] sm:$0xff] %v3480_v22  ;;  %v3482_v41 = vpop.permute.xlu1 %833  ;;  %v144_v25 = vadd.f32 %v143_v42, %v142_v50  ;;  %v5693_v50 = vrot.slane %v3510_v46, 1  ;;  %v3525_v42 = vmul.f32 %v1319_v27, %v2960_v37 }
 0x138   :  { %5806 = vst [vmem:[#allocation50_spill] sm:$0xff] %v3482_v41  ;;  %v124_v41 = vmul.f32 %v112_v12, %v112_v12  ;;  %v3535_v0 = vpop.permute.xlu0 %738 }
 0x139   :  { %5814 = vst [vmem:[#allocation57_spill] sm:$0xff] %v3535_v0  ;;  %v3551_v0 = vstv %s2848_s2 }
 0x13a   :  { %v145_v12 = vsel %vm67_vm0, %v124_v41, 0.0  ;;  %v3531_v41 = vmul.f32 %v3465_v32, %v2960_v37  ;;  %5815 = vst [vmem:[#allocation58_spill] sm:$0xff] %v3551_v0  ;;  %v3579_v32 = vstv %s3533_s12 }
 0x13b   :  { %v146_v53 = vadd.f32 %v145_v12, %v144_v25  ;;  %v147_v25 = vsel %vm67_vm0, %v125_v8, 0.0  ;;  %v3539_v12 = vstv %s2895_s11  ;;  %s1161_s11 = sadd.f32 %s3518_s16, %s1084_s8  ;;  %5818 = vst [vmem:[#allocation61_spill] sm:$0xff] %v3579_v32 }
 0x13c   :  { %1334 = vrot.lane.b32.xlu2 %v1330_v14, %s5808_s25  ;;  %v1322_v14 = vmul.f32 %v1319_v27, %v2952_v34  ;;  %5813 = vst [vmem:[#allocation56_spill] sm:$0xff] %v3531_v41  ;;  %v3627_v46 = vmul.f32 %v3583_v55, %v3539_v12 }
 0x13d   :  { %1303 = vrot.lane.b32.xlu1 %v5690_v54, %s5808_s25  ;;  %v148_v27 = vadd.f32 %v147_v25, %v146_v53  ;;  %v5699_v54 = vrot.slane %v3525_v42, 1  ;;  %v3557_v53 = vld [vmem:[#allocation7] sm:$0xff]  ;;  %s1252_s2 = sadd.f32 %s3402_s27, %s1161_s11 }
 0x13e   :  { %v3512_v49 = vpop.permute.xlu2 %961  ;;  %v1331_v34 = vrot.slane %v1322_v14, 1  ;;  %v396_v25 = vmul.f32 %v3557_v53, %v3539_v12  ;;  %v3565_v14 = vmul.f32 %v3561_v52, %v3539_v12  ;;  %v186_v1 = vmul.f32 %v3557_v53, %v3551_v0  ;;  %s3593_s27 = sld [smem:[#allocation2 + $0x46]] }
 0x13f   :  { %5811 = vst [vmem:[#allocation54_spill] sm:$0xff] %v3512_v49  ;;  %v3514_v44 = vpop.permute.xlu1 %839  ;;  %s1351_s8 = sadd.f32 %s3533_s12, %s1252_s2  ;;  %v5708_v33 = vrot.slane %v3627_v46, 1 }
 0x140   :  { %5812 = vst [vmem:[#allocation55_spill] sm:$0xff] %v3514_v44  ;;  %v404_v44 = vrot.slane %v396_v25, 1  ;;  %v3602_v25 = vld [vmem:[#allocation7 + $0x18] sm:$0xff]  ;;  %s3614_s11 = sld [smem:[#allocation2 + $0x2b]] }
 0x141   :  { %5816 = vst [vmem:[#allocation59_spill] sm:$0xff] %v3565_v14  ;;  %s3651_s12 = sld [smem:[#allocation2 + $0x10]] }
 0x142   :  { %s3671_s2 = sld [smem:[#allocation2 + $0x24]] }
 0x144   :  { %1241 = vrot.lane.b32.xlu2 %v5691_v16, %s5799_s26  ;;  %v5698_v16 = vrot.slane %v3531_v41, 1 }
 0x145   :  { %1208 = vrot.lane.b32.xlu1 %v5693_v50, %s5799_s26 }
 0x146   :  { %149 = vadd.xlane.f32.xlu0 %v148_v27  ;;  %v3553_v8 = vpop.permute.xlu2 %986  ;;  %v1333_v27 = vsel %vm378_vm1, %v1331_v34, %v5699_v54  ;;  %v1300_v38 = vsel %vm378_vm1, %v1298_v2, %v5698_v16  ;;  %v3591_v34 = vmul.f32 %v3428_v3, %v2960_v37  ;;  %v255_v2 = vadd.f32 %v3150_v6, %v186_v1  ;;  %v3599_v54 = vpop.permute.xlu0 %769 }
 0x147   :  { %v3567_v50 = vpop.permute.xlu1 %870  ;;  %v3597_v16 = vstv %s3544_s21  ;;  %5820 = vst [vmem:[#allocation63_spill] sm:$0xff] %v3599_v54  ;;  %v3610_v37 = vstv %s2844_s1  ;;  %v5824_v54 = vrot.slane %v3565_v14, 1  ;;  %s1434_s1 = sadd.f32 %s3581_s7, %s1351_s8  ;;  %v3645_v14 = vld [vmem:[#allocation7 + $0x48] sm:$0xff] }
 0x148   :  { %5817 = vst [vmem:[#allocation60_spill] sm:$0xff] %v3567_v50  ;;  %v189_v50 = vmul.f32 %v3583_v55, %v3551_v0  ;;  %v176_v6 = vmul.f32 %v3561_v52, %v3610_v37  ;;  %v670_v49 = vmul.f32 %v3557_v53, %v3597_v16  ;;  %v5828_v31 = vrot.slane %v3591_v34, 1 }
 0x149   :  { %5819 = vst [vmem:[#allocation62_spill] sm:$0xff] %v3591_v34  ;;  %v406_v41 = vsel %vm378_vm1, %v404_v44, %v5824_v54  ;;  %v3638_v54 = vstv %s2852_s28  ;;  %s3661_s28 = sadd.f32 %s3593_s27, %s1434_s1 }
 0x14a   :  { %5822 = vst [vmem:[#allocation65_spill] sm:$0xff] %v3610_v37  ;;  %v258_v1 = vadd.f32 %v3122_v48, %v189_v50  ;;  %v3641_v50 = vld [vmem:[#allocation7 + $0x40] sm:$0xff]  ;;  %v3653_v48 = vld [vmem:[#allocation7 + $0x30] sm:$0xff]  ;;  %v229_v44 = vadd.f32 %v3088_v20, %v176_v6  ;;  %v678_v22 = vrot.slane %v670_v49, 2 }
 0x14b   :  { %5827 = vst [vmem:[#allocation69_spill] sm:$0xff] %v3638_v54  ;;  %v199_v36 = vmul.f32 %v3653_v48, %v3638_v54 }
 0x14c   :  { %1338 = vrot.lane.b32.xlu2 %v1333_v27, %s5808_s25  ;;  %v3606_v27 = vmul.f32 %v3602_v25, %v3579_v32  ;;  %v339_v15 = vadd.f32 %v3137_v58, %v258_v1  ;;  %v3680_v58 = vmul.f32 %v3583_v55, %v3658_v35  ;;  %v3698_v1 = vstv %s3614_s11 }
 0x14d   :  { %1305 = vrot.lane.b32.xlu1 %v1300_v38, %s5808_s25  ;;  %v336_v38 = vadd.f32 %v3120_v47, %v255_v2  ;;  %v3633_v47 = vmul.f32 %v3561_v52, %v3597_v16  ;;  %v1355_v2 = vmul.f32 %v3641_v50, %v3579_v32  ;;  %v284_v49 = vadd.f32 %v3086_v18, %v199_v36 }
 0x14e   :  { %5821 = vst [vmem:[#allocation64_spill] sm:$0xff] %v3606_v27  ;;  %v3612_v11 = vpop.permute.xlu2 %992  ;;  %v3703_v36 = vpop.permute.xlu0 %800 }
 0x14f   :  { %5823 = vst [vmem:[#allocation66_spill] sm:$0xff] %v3612_v11  ;;  %v3623_v3 = vpop.permute.xlu1 %901  ;;  %v414_v24 = vadd.f32 %v406_v41, %v336_v38  ;;  %v5830_v41 = vrot.slane %v3606_v27, 1  ;;  %v1364_v6 = vrot.slane %v1355_v2, 1  ;;  %v417_v2 = vadd.f32 %v5708_v33, %v339_v15 }
 0x150   :  { %5825 = vst [vmem:[#allocation67_spill] sm:$0xff] %v3623_v3  ;;  %v3649_v3 = vmul.f32 %v3645_v14, %v3579_v32  ;;  %v423_v32 = vmul.f32 %v3653_v48, %v3658_v35  ;;  %v178_v11 = vmul.f32 %v3583_v55, %v3610_v37  ;;  %v310_v27 = vadd.f32 %v3104_v30, %v229_v44 }
 0x151   :  { %5826 = vst [vmem:[#allocation68_spill] sm:$0xff] %v3633_v47  ;;  %v505_v20 = vadd.f32 %v3196_v61, %v414_v24  ;;  %v1034_v24 = vmul.f32 %v3641_v50, %v3299_v9  ;;  %v5833_v9 = vrot.slane %v3633_v47, 2  ;;  %v3723_v30 = vmul.f32 %v3602_v25, %v3698_v1 }
 0x152   :  { %5829 = vst [vmem:[#allocation70_spill] sm:$0xff] %v3680_v58  ;;  %v5834_v15 = vrot.slane %v3649_v3, 1  ;;  %v365_v44 = vadd.f32 %v3157_v13, %v284_v49  ;;  %v3743_v13 = vmul.f32 %v3557_v53, %v3610_v37  ;;  %v3748_v49 = vstv %s3423_s3  ;;  %s5837_s3 = sadd.f32 %s2941_s0, %s2936_s24 }
 0x153   :  { %v604_v18 = vadd.f32 %v3260_v26, %v505_v20  ;;  %5832 = vst [vmem:[#allocation72_spill] sm:$0xff] %v3703_v36  ;;  %v680_v34 = vsel %vm652_vm2, %v678_v22, %v5833_v9  ;;  %v188_v22 = vmul.f32 %v3653_v48, %v3551_v0  ;;  %v3739_v36 = vmul.f32 %v3583_v55, %v3597_v16  ;;  %s5838_s24 = sadd.f32 %s2931_s23, %s2929_s22 }
 0x154   :  { %1274 = vrot.lane.b32.xlu2 %v5828_v31, %s5799_s26  ;;  %v3691_v31 = vmul.f32 %v3561_v52, %v3668_v7  ;;  %v1366_v26 = vsel %vm378_vm1, %v1364_v6, %v5834_v15  ;;  %v3731_v6 = vstv %s3651_s12  ;;  %v508_v15 = vadd.f32 %v3213_v29, %v417_v2  ;;  %s3778_s15 = sadd.f32 %s3544_s21, %s5837_s3 }
 0x155   :  { %1369 = vrot.lane.b32.xlu1 %v5830_v41, %s5808_s25  ;;  %v432_v41 = vrot.slane %v423_v32, 1  ;;  %v3717_v32 = vld [vmem:[#allocation7 + $0x10] sm:$0xff]  ;;  %v688_v47 = vadd.f32 %v680_v34, %v604_v18  ;;  %v5836_v2 = vrot.slane %v3525_v42, 1  ;;  %v1060_v42 = vmul.f32 %v3602_v25, %v3318_v62  ;;  %s3793_s0 = sadd.f32 %s3687_s5, %s5838_s24 }
 0x156   :  { %v3693_v61 = vpop.permute.xlu2 %1017  ;;  %v1494_v20 = vmul.f32 %v3717_v32, %v3698_v1  ;;  %v5711_v9 = vrot.slane %v3691_v31, 1  ;;  %v231_v18 = vadd.f32 %v3041_v45, %v178_v11  ;;  %v257_v62 = vadd.f32 %v3055_v57, %v188_v22  ;;  %s751_s22 = sadd.f32 %s3090_s6, %s3778_s15 }
 0x157   :  { %5831 = vst [vmem:[#allocation71_spill] sm:$0xff] %v3693_v61  ;;  %v3705_v38 = vpop.permute.xlu1 %959  ;;  %v5710_v61 = vrot.slane %v3680_v58, 1  ;;  %v779_v34 = vadd.f32 %v3320_v60, %v688_v47  ;;  %v3768_v60 = vstv %s3687_s5  ;;  %v1463_v11 = vmul.f32 %v3641_v50, %v3731_v6  ;;  %s718_s23 = sadd.f32 %s3073_s4, %s3793_s0 }
 0x158   :  { %v390_v29 = vadd.f32 %v5711_v9, %v310_v27  ;;  %v3761_v27 = vmul.f32 %v3602_v25, %v3731_v6  ;;  %v3811_v22 = vmul.f32 %v3645_v14, %v3731_v6  ;;  %v3819_v58 = vmul.f32 %v3561_v52, %v3768_v60  ;;  %s3838_s6 = sld [smem:[#allocation2 + $0x9]] }
 0x159   :  { %v434_v33 = vsel %vm378_vm1, %v432_v41, %v5710_v61  ;;  %v1502_v41 = vrot.slane %v1494_v20, 2  ;;  %v607_v20 = vadd.f32 %v3274_v43, %v508_v15  ;;  %v697_v43 = vmul.f32 %v3653_v48, %v3748_v49  ;;  %v3801_v15 = vpop.permute.xlu0 %806  ;;  %s3851_s4 = sld [smem:[#allocation2 + $0x2c]] }
 0x15a   :  { %1044 = vrot.lane.b32.xlu0 %v1034_v24, %s5808_s25  ;;  %v3751_v24 = vstv %s3671_s2  ;;  %v441_v61 = vadd.f32 %v434_v33, %v365_v44  ;;  %v878_v33 = vadd.f32 %v3419_v17, %v779_v34  ;;  %v3799_v17 = vmul.f32 %v3583_v55, %v3748_v49  ;;  %5839 = vst [vmem:[#allocation74_spill] sm:$0xff] %v3801_v15  ;;  %s3854_s21 = sadd.f32 %s3161_s10, %s751_s22 }
 0x15b   :  { %5835 = vst [vmem:[#allocation73_spill] sm:$0xff] %v3751_v24  ;;  %v929_v44 = vmul.f32 %v3717_v32, %v3751_v24  ;;  %v5840_v34 = vrot.slane %v3723_v30, 2  ;;  %v473_v0 = vadd.f32 %v3179_v39, %v390_v29  ;;  %v5841_v57 = vrot.slane %v3739_v36, 2  ;;  %s3867_s8 = sadd.f32 %s3142_s9, %s718_s23 }
 0x15c   :  { %1371 = vrot.lane.b32.xlu2 %v1366_v26, %s5808_s25  ;;  %v3765_v26 = vmul.f32 %v3583_v55, %v3668_v7  ;;  %v540_v15 = vadd.f32 %v3230_v51, %v441_v61  ;;  %v312_v39 = vadd.f32 %v3181_v21, %v231_v18  ;;  %v398_v51 = vmul.f32 %v3653_v48, %v3539_v12  ;;  %s3881_s9 = sld [smem:[#allocation2 + $0xc]] }
 0x15d   :  { %1340 = vrot.lane.b32.xlu1 %v5836_v2, %s5808_s25  ;;  %v1504_v45 = vsel %vm652_vm2, %v1502_v41, %v5840_v34  ;;  %v198_v2 = vmul.f32 %v3561_v52, %v3638_v54  ;;  %v3826_v41 = vmul.f32 %v3557_v53, %v3668_v7  ;;  %v691_v37 = vadd.f32 %v5841_v57, %v607_v20  ;;  %s3896_s10 = sld [smem:[#allocation2 + $0x11]] }
 0x15e   :  { %v3770_v47 = vpop.permute.xlu2 %1042  ;;  %v5718_v34 = vrot.slane %v3765_v26, 1  ;;  %v933_v54 = vadd.f32 %v929_v44, %v878_v33  ;;  %v706_v61 = vrot.slane %v697_v43, 2  ;;  %v5717_v29 = vrot.slane %v3799_v17, 2  ;;  %s916_s1 = sadd.f32 %s3838_s6, %s3867_s8 }
 0x15f   :  { %v3785_v9 = vpop.permute.xlu1 %965  ;;  %v5842_v33 = vrot.slane %v3761_v27, 2  ;;  %v1472_v21 = vrot.slane %v1463_v11, 2  ;;  %v5719_v12 = vrot.slane %v3811_v22, 2  ;;  %v572_v18 = vadd.f32 %v3247_v5, %v473_v0  ;;  %s4080_s0 = sld [smem:[#allocation2 + $0xf]] }
 0x160   :  { %v998_v20 = vadd.f32 %v3553_v8, %v933_v54  ;;  %v639_v44 = vadd.f32 %v3289_v56, %v540_v15  ;;  %v5720_v43 = vrot.slane %v3819_v58, 2  ;;  %v3864_v56 = vstv %s3593_s27  ;;  %s927_s27 = sadd.f32 %s3671_s2, %s3854_s21 }
 0x161   :  { %v392_v0 = vadd.f32 %v5718_v34, %v312_v39  ;;  %v407_v15 = vrot.slane %v398_v51, 1  ;;  %v3876_v57 = vmul.f32 %v3583_v55, %v3768_v60  ;;  %v228_v11 = vadd.f32 %v3070_v4, %v3743_v13  ;;  %s3962_s2 = sadd.f32 %s3226_s13, %s916_s1 }
 0x162   :  { %1069 = vrot.lane.b32.xlu0 %v1060_v42, %s5808_s25  ;;  %v782_v42 = vadd.f32 %v3343_v23, %v691_v37  ;;  %v1086_v23 = vmul.f32 %v3717_v32, %v3364_v28  ;;  %v932_v37 = vmul.f32 %v3645_v14, %v3751_v24  ;;  %v1474_v39 = vsel %vm652_vm2, %v1472_v21, %v5719_v12  ;;  %s4092_s22 = sld [smem:[#allocation2 + $0x47]] }
 0x163   :  { %v379_v51 = vrot.slane %v3826_v41, 1  ;;  %v1528_v4 = vmul.f32 %v3602_v25, %v3864_v56  ;;  %v338_v13 = vadd.f32 %v3198_v63, %v257_v62  ;;  %v475_v21 = vadd.f32 %v3249_v10, %v392_v0  ;;  %s1030_s13 = sadd.f32 %s3285_s17, %s3962_s2 }
 0x164   :  { %1508 = vrot.lane.b32.xlu2 %v1504_v45, %s5799_s26  ;;  %v881_v8 = vadd.f32 %v3448_v19, %v782_v42  ;;  %v708_v19 = vsel %vm652_vm2, %v706_v61, %v5717_v29  ;;  %v283_v42 = vadd.f32 %v3139_v59, %v198_v2  ;;  %v3889_v61 = vmul.f32 %v3561_v52, %v3658_v35  ;;  %s5868_s17 = sld [smem:[#allocation32_spill]] }
 0x165   :  { %1477 = vrot.lane.b32.xlu1 %v5842_v33, %s5799_s26  ;;  %v1527_v59 = vmul.f32 %v3717_v32, %v3864_v56  ;;  %v664_v2 = vadd.f32 %v5720_v43, %v572_v18  ;;  %v715_v41 = vadd.f32 %v708_v19, %v639_v44  ;;  %v3903_v33 = vpop.permute.xlu0 %837  ;;  %v3911_v62 = vstv %s3467_s30  ;;  %v5844_v44 = vld [vmem:[#allocation34_spill] sm:$0xff]  ;;  %s3931_s30 = sadd.f32 %s3243_s14, %s927_s27 }
 0x166   :  { %v1068_v45 = vpop.permute.xlu2 %1067  ;;  %v5845_v19 = vld [vmem:[#allocation66_spill] sm:$0xff]  ;;  %v5846_v10 = vrot.slane %v3649_v3, 1  ;;  %v1089_v0 = vmul.f32 %v3645_v14, %v3364_v28  ;;  %s3949_s14 = sld [smem:[#allocation2 + $0x27]]  ;;  %v5721_v43 = vrot.slane %v3889_v61, 1 }
 0x167   :  { %v3859_v54 = vadd.f32 %v1068_v45, %v998_v20  ;;  %v3861_v5 = vpop.permute.xlu1 %990  ;;  %v936_v20 = vadd.f32 %v932_v37, %v881_v8  ;;  %v5843_v45 = vrot.slane %v3627_v46, 1  ;;  %v747_v18 = vadd.f32 %v3305_v40, %v664_v2  ;;  %v5847_v40 = vld [vmem:[#allocation49_spill] sm:$0xff]  ;;  %s1057_s5 = sadd.f32 %s3301_s18, %s3931_s30 }
 0x168   :  { %v814_v8 = vadd.f32 %v5844_v44, %v715_v41  ;;  %v3917_v37 = vstv %s3838_s6  ;;  %v942_v41 = vmul.f32 %v3641_v50, %v3911_v62  ;;  %v5848_v44 = vld [vmem:[#allocation36_spill] sm:$0xff]  ;;  %s4024_s3 = sadd.f32 %s3881_s9, %s1030_s13 }
 0x169   :  { %v1001_v29 = vadd.f32 %v5845_v19, %v936_v20  ;;  %v1190_v28 = vmul.f32 %v3641_v50, %v5848_v44  ;;  %v5850_v19 = vld [vmem:[#allocation38_spill] sm:$0xff]  ;;  %s4215_s27 = sld [smem:[#allocation2 + $0x13]] }
 0x16a   :  { %1094 = vrot.lane.b32.xlu0 %v1086_v23, %s5808_s25  ;;  %v409_v23 = vsel %vm378_vm1, %v407_v15, %v5843_v45  ;;  %v1536_v15 = vrot.slane %v1528_v4, 2  ;;  %v1535_v45 = vrot.slane %v1527_v59, 2  ;;  %v913_v2 = vadd.f32 %v5847_v40, %v814_v8  ;;  %v5849_v4 = vld [vmem:[#allocation27_spill] sm:$0xff]  ;;  %v5852_v44 = vld [vmem:[#allocation16_spill] sm:$0xff]  ;;  %s4265_s1 = sld [smem:[#allocation2 + $0x49]] }
 0x16b   :  { %v574_v59 = vadd.f32 %v5849_v4, %v475_v21  ;;  %v672_v8 = vmul.f32 %v3653_v48, %v3597_v16  ;;  %v919_v40 = vmul.f32 %v3602_v25, %v3917_v37  ;;  %v364_v4 = vadd.f32 %v5852_v44, %v283_v42  ;;  %s4283_s30 = sld [smem:[#allocation2 + $0x2f]] }
 0x16c   :  { %1479 = vrot.lane.b32.xlu2 %v1474_v39, %s5799_s26  ;;  %v3928_v39 = vstv %s3851_s4  ;;  %v416_v16 = vadd.f32 %v409_v23, %v338_v13  ;;  %v946_v63 = vadd.f32 %v942_v41, %v913_v2  ;;  %v1199_v42 = vrot.slane %v1190_v28, 1  ;;  %s3998_s18 = sadd.f32 %s3949_s14, %s1057_s5 }
 0x16d   :  { %1373 = vrot.lane.b32.xlu1 %v5846_v10, %s5808_s25  ;;  %v846_v10 = vadd.f32 %v5850_v19, %v747_v18  ;;  %v1593_v34 = vmul.f32 %v3717_v32, %v3928_v39  ;;  %v3955_v21 = vmul.f32 %v3602_v25, %v3928_v39  ;;  %v3958_v18 = vstv %s3881_s9  ;;  %s4213_s9 = sld [smem:[#allocation2 + $0x2e]] }
 0x16e   :  { %v1074_v46 = vpop.permute.xlu2 %1073  ;;  %v3967_v19 = vstv %s3896_s10  ;;  %v5854_v44 = vrot.slane %v3876_v57, 2  ;;  %v681_v23 = vrot.slane %v672_v8, 2  ;;  %v440_v8 = vadd.f32 %v5721_v43, %v364_v4  ;;  %v5863_v4 = vld [vmem:[#allocation40_spill] sm:$0xff]  ;;  %s1219_s15 = sadd.f32 %s3373_s20, %s3998_s18 }
 0x16f   :  { %v3936_v3 = vadd.f32 %v1074_v46, %v1001_v29  ;;  %v3938_v20 = vpop.permute.xlu1 %1015  ;;  %v5851_v29 = vld [vmem:[#allocation14_spill] sm:$0xff]  ;;  %v1601_v2 = vrot.slane %v1593_v34, 2  ;;  %v3989_v28 = vmul.f32 %v3602_v25, %v3967_v19  ;;  %v5859_v34 = vld [vmem:[#allocation54_spill] sm:$0xff]  ;;  %v5865_v43 = vrot.slane %v3739_v36, 2  ;;  %s1186_s20 = sadd.f32 %s5868_s17, %s4024_s3 }
 0x170   :  { %v309_v46 = vadd.f32 %v5851_v29, %v228_v11  ;;  %v1537_v11 = vsel %vm652_vm2, %v1535_v45, %v1536_v15  ;;  %v5853_v29 = vrot.slane %v3691_v31, 1  ;;  %v666_v13 = vadd.f32 %v5854_v44, %v574_v59  ;;  %s4054_s24 = sadd.f32 %s3421_s29, %s1219_s15 }
 0x171   :  { %v3980_v31 = vmul.f32 %v3602_v25, %v3958_v18  ;;  %v644_v36 = vmul.f32 %v3557_v53, %v3768_v60  ;;  %s4071_s29 = sld [smem:[#allocation2 + $0x2a]] }
 0x172   :  { %1100 = vrot.lane.b32.xlu0 %v1089_v0, %s5808_s25  ;;  %v381_v12 = vsel %vm378_vm1, %v379_v51, %v5853_v29  ;;  %v923_v0 = vadd.f32 %v919_v40, %v846_v10  ;;  %v5855_v51 = vld [vmem:[#allocation71_spill] sm:$0xff]  ;;  %v3983_v29 = vpop.permute.xlu0 %868  ;;  %s4095_s23 = sadd.f32 %s3440_s19, %s1186_s20 }
 0x173   :  { %v1027_v45 = vadd.f32 %v5855_v51, %v946_v63  ;;  %5856 = vst [vmem:[#allocation34_spill] sm:$0xff] %v3983_v29  ;;  %v389_v59 = vadd.f32 %v381_v12, %v309_v46  ;;  %v5857_v10 = vld [vmem:[#allocation21_spill] sm:$0xff]  ;;  %v5861_v12 = vld [vmem:[#allocation53_spill] sm:$0xff]  ;;  %v683_v29 = vsel %vm652_vm2, %v681_v23, %v5865_v43  ;;  %v4030_v43 = vmul.f32 %v3561_v52, %v3748_v49  ;;  %s4297_s2 = sld [smem:[#allocation2 + $0x4a]] }
 0x174   :  { %1543 = vrot.lane.b32.xlu2 %v1536_v15, %s5799_s26  ;;  %v507_v15 = vadd.f32 %v5857_v10, %v416_v16  ;;  %v5858_v40 = vld [vmem:[#allocation39_spill] sm:$0xff]  ;;  %v5862_v46 = vrot.slane %v5861_v12, 1  ;;  %v1223_v10 = vmul.f32 %v3641_v50, %v5863_v4  ;;  %v5867_v12 = vrot.slane %v3955_v21, 2  ;;  %s1384_s6 = sadd.f32 %s4080_s0, %s4095_s23 }
 0x175   :  { %1541 = vrot.lane.b32.xlu1 %v1537_v11, %s5799_s26  ;;  %v749_v63 = vadd.f32 %v5858_v40, %v666_v13  ;;  %v972_v11 = vadd.f32 %v5859_v34, %v923_v0  ;;  %v5864_v13 = vld [vmem:[#allocation30_spill] sm:$0xff]  ;;  %v5723_v4 = vrot.slane %v3980_v31, 1  ;;  %s4305_s5 = sld [smem:[#allocation2 + $0x2d]] }
 0x176   :  { %v1099_v44 = vpop.permute.xlu2 %1098  ;;  %v1201_v16 = vsel %vm378_vm1, %v1199_v42, %v5862_v46  ;;  %v606_v40 = vadd.f32 %v5864_v13, %v507_v15  ;;  %v5866_v0 = vld [vmem:[#allocation55_spill] sm:$0xff]  ;;  %v1603_v42 = vsel %vm652_vm2, %v1601_v2, %v5867_v12  ;;  %v5722_v46 = vrot.slane %v3989_v28, 2  ;;  %v5870_v13 = vld [vmem:[#allocation23_spill] sm:$0xff]  ;;  %v5872_v12 = vld [vmem:[#allocation31_spill] sm:$0xff]  ;;  %s4312_s13 = sld [smem:[#allocation2 + $0x31]] }
 0x177   :  { %v4001_v51 = vadd.f32 %v1099_v44, %v1027_v45  ;;  %v4003_v41 = vpop.permute.xlu1 %1040  ;;  %v848_v45 = vadd.f32 %v5866_v0, %v749_v63  ;;  %v921_v44 = vmul.f32 %v3645_v14, %v3917_v37  ;;  %v1053_v34 = vadd.f32 %v3770_v47, %v972_v11  ;;  %v5869_v63 = vld [vmem:[#allocation18_spill] sm:$0xff]  ;;  %s1409_s19 = sadd.f32 %s4071_s29, %s4054_s24 }
 0x178   :  { %v1232_v47 = vrot.slane %v1223_v10, 1  ;;  %v690_v23 = vadd.f32 %v683_v29, %v606_v40  ;;  %v4038_v15 = vmul.f32 %v3645_v14, %v3698_v1  ;;  %v472_v11 = vadd.f32 %v5869_v63, %v389_v59  ;;  %v5871_v29 = vld [vmem:[#allocation42_spill] sm:$0xff]  ;;  %s4318_s18 = sld [smem:[#allocation2 + $0x16]] }
 0x179   :  { %5860 = vst [vmem:[#allocation66_spill] sm:$0xff] %v4001_v51  ;;  %v925_v2 = vadd.f32 %v921_v44, %v848_v45  ;;  %v539_v0 = vadd.f32 %v5870_v13, %v440_v8  ;;  %v1132_v52 = vadd.f32 %v5723_v4, %v1053_v34  ;;  %v5724_v40 = vrot.slane %v4030_v43, 2  ;;  %v5873_v13 = vld [vmem:[#allocation52_spill] sm:$0xff]  ;;  %s4147_s21 = sadd.f32 %s3614_s11, %s1409_s19 }
 0x17a   :  { %1206 = vrot.lane.b32.xlu0 %v1201_v16, %s5799_s26  ;;  %v653_v16 = vrot.slane %v644_v36, 2  ;;  %v781_v10 = vadd.f32 %v5871_v29, %v690_v23  ;;  %v4056_v8 = vpop.permute.xlu0 %899  ;;  %v5874_v34 = vrot.slane %v5873_v13, 1  ;;  %v5876_v29 = vld [vmem:[#allocation60_spill] sm:$0xff]  ;;  %v4078_v13 = vmul.f32 %v3645_v14, %v3928_v39  ;;  %s4328_s17 = sld [smem:[#allocation2 + $0x12]] }
 0x17b   :  { %v974_v45 = vadd.f32 %v3785_v9, %v925_v2  ;;  %v638_v59 = vadd.f32 %v5872_v12, %v539_v0  ;;  %v931_v2 = vmul.f32 %v3641_v50, %v3751_v24  ;;  %v5726_v12 = vrot.slane %v4038_v15, 2  ;;  %s1591_s8 = sadd.f32 %s3851_s4, %s4147_s21 }
 0x17c   :  { %1607 = vrot.lane.b32.xlu2 %v1603_v42, %s5808_s25  ;;  %v1234_v36 = vsel %vm378_vm1, %v1232_v47, %v5874_v34  ;;  %v880_v9 = vadd.f32 %v5876_v29, %v781_v10  ;;  %v1595_v47 = vmul.f32 %v3641_v50, %v3928_v39  ;;  %v5880_v34 = vrot.slane %v3811_v22, 2  ;;  %s4330_s3 = sld [smem:[#allocation2 + $0x4c]] }
 0x17d   :  { %1576 = vrot.lane.b32.xlu1 %v5722_v46, %s5808_s25  ;;  %v5875_v46 = vld [vmem:[#allocation47_spill] sm:$0xff]  ;;  %v5727_v29 = vrot.slane %v4078_v13, 2  ;;  %s4333_s15 = sld [smem:[#allocation2 + $0x48]] }
 0x17e   :  { %v1205_v44 = vpop.permute.xlu2 %1204  ;;  %v1287_v23 = vmul.f32 %v3717_v32, %v5875_v46  ;;  %v5878_v46 = vrot.slane %v3819_v58, 2  ;;  %v714_v58 = vadd.f32 %v5724_v40, %v638_v59  ;;  %s4339_s20 = sld [smem:[#allocation2 + $0x32]] }
 0x17f   :  { %v4058_v42 = vadd.f32 %v1205_v44, %v1132_v52  ;;  %v1047_v63 = vpop.permute.xlu1 %1046  ;;  %v5877_v52 = vld [vmem:[#allocation25_spill] sm:$0xff]  ;;  %s4350_s24 = sld [smem:[#allocation2 + $0x17]] }
 0x180   :  { %v4068_v0 = vadd.f32 %v1047_v63, %v974_v45  ;;  %v571_v44 = vadd.f32 %v5877_v52, %v472_v11  ;;  %v655_v10 = vsel %vm652_vm2, %v653_v16, %v5878_v46  ;;  %v1562_v45 = vmul.f32 %v3641_v50, %v3967_v19  ;;  %v5881_v52 = vld [vmem:[#allocation45_spill] sm:$0xff]  ;;  %s4372_s19 = sld [smem:[#allocation2 + $0x4d]] }
 0x181   :  { %v4090_v11 = vmul.f32 %v3645_v14, %v3967_v19  ;;  %v1295_v39 = vrot.slane %v1287_v23, 1  ;;  %v935_v16 = vadd.f32 %v931_v2, %v880_v9  ;;  %v813_v23 = vadd.f32 %v5881_v52, %v714_v58 }
 0x182   :  { %1239 = vrot.lane.b32.xlu0 %v1234_v36, %s5799_s26  ;;  %v663_v63 = vadd.f32 %v655_v10, %v571_v44  ;;  %v1604_v36 = vrot.slane %v1595_v47, 2  ;;  %v1571_v59 = vrot.slane %v1562_v45, 2  ;;  %v5883_v44 = vld [vmem:[#allocation48_spill] sm:$0xff]  ;;  %v5885_v47 = vld [vmem:[#allocation35_spill] sm:$0xff]  ;;  %v4126_v40 = vpop.permute.xlu0 %905 }
 0x183   :  { %5879 = vst [vmem:[#allocation49_spill] sm:$0xff] %v4090_v11  ;;  %v1000_v46 = vadd.f32 %v3861_v5, %v935_v16  ;;  %v5725_v9 = vrot.slane %v4090_v11, 2  ;;  %v5884_v10 = vrot.slane %v5883_v44, 1  ;;  %v941_v5 = vmul.f32 %v3602_v25, %v3911_v62 }
 0x184   :  { %1514 = vrot.lane.b32.xlu2 %v5726_v12, %s5799_s26  ;;  %v746_v58 = vadd.f32 %v5885_v47, %v663_v63  ;;  %v918_v16 = vmul.f32 %v3717_v32, %v3917_v37  ;;  %v4132_v44 = vstv %s3518_s16  ;;  %v5888_v63 = vld [vmem:[#allocation50_spill] sm:$0xff]  ;;  %s4152_s16 = sadd.f32 %s3651_s12, %s1384_s6 }
 0x185   :  { %1481 = vrot.lane.b32.xlu1 %v5880_v34, %s5799_s26  ;;  %v1297_v22 = vsel %vm378_vm1, %v1295_v39, %v5884_v10  ;;  %v5886_v34 = vld [vmem:[#allocation67_spill] sm:$0xff]  ;;  %v1606_v39 = vsel %vm652_vm2, %v1604_v36, %v5727_v29  ;;  %v4144_v10 = vstv %s4092_s22  ;;  %v1113_v36 = vmul.f32 %v3717_v32, %v3958_v18  ;;  %s1624_s12 = sadd.f32 %s4092_s22, %s3661_s28 }
 0x186   :  { %v4108_v4 = vpop.permute.xlu2 %1237  ;;  %v912_v52 = vadd.f32 %v5886_v34, %v813_v23  ;;  %v845_v23 = vadd.f32 %v5888_v63, %v746_v58  ;;  %v4164_v47 = vmul.f32 %v3602_v25, %v4144_v10  ;;  %s1558_s11 = sadd.f32 %s3896_s10, %s4152_s16 }
 0x187   :  { %5882 = vst [vmem:[#allocation36_spill] sm:$0xff] %v4108_v4  ;;  %v1072_v2 = vpop.permute.xlu1 %1071  ;;  %v1121_v63 = vrot.slane %v1113_v36, 1  ;;  %v4175_v4 = vstv %s3949_s14  ;;  %s4289_s14 = sld [smem:[#allocation2 + $0x14]] }
 0x188   :  { %v4122_v45 = vadd.f32 %v1072_v2, %v1000_v46  ;;  %v1573_v46 = vsel %vm652_vm2, %v1571_v59, %v5725_v9  ;;  %v4141_v2 = vmul.f32 %v3602_v25, %v4132_v44  ;;  %v4157_v59 = vmul.f32 %v3645_v14, %v3864_v56  ;;  %v5889_v9 = vld [vmem:[#allocation43_spill] sm:$0xff]  ;;  %5890 = vst [vmem:[#allocation38_spill] sm:$0xff] %v4175_v4  ;;  %s4368_s23 = sadd.f32 %s4328_s17, %s1558_s11 }
 0x189   :  { %v922_v58 = vadd.f32 %v918_v16, %v845_v23  ;;  %v1256_v12 = vmul.f32 %v3641_v50, %v5889_v9  ;;  %v1629_v23 = vmul.f32 %v3645_v14, %v4144_v10  ;;  %s4384_s4 = sadd.f32 %s4333_s15, %s1624_s12 }
 0x18a   :  { %5887 = vst [vmem:[#allocation27_spill] sm:$0xff] %v4122_v45  ;;  %1301 = vrot.lane.b32.xlu0 %v1297_v22, %s5808_s25  ;;  %v945_v22 = vadd.f32 %v941_v5, %v912_v52  ;;  %v5728_v5 = vrot.slane %v4141_v2, 1  ;;  %s4388_s10 = sld [smem:[#allocation2 + $0x30]] }
 0x18b   :  { %v971_v29 = vadd.f32 %v3705_v38, %v922_v58  ;;  %v5891_v38 = vld [vmem:[#allocation46_spill] sm:$0xff]  ;;  %v4190_v58 = vpop.permute.xlu0 %963  ;;  %v1265_v16 = vrot.slane %v1256_v12, 1  ;;  %v4211_v12 = vmul.f32 %v3645_v14, %v4175_v4  ;;  %s4393_s6 = sld [smem:[#allocation2 + $0x15]] }
 0x18c   :  { %1611 = vrot.lane.b32.xlu2 %v1606_v39, %s5808_s25  ;;  %v1026_v34 = vadd.f32 %v3938_v20, %v945_v22  ;;  %v1628_v20 = vmul.f32 %v3641_v50, %v4144_v10  ;;  %v5892_v22 = vrot.slane %v5891_v38, 1  ;;  %v5896_v38 = vrot.slane %v4164_v47, 2  ;;  %s4397_s28 = sld [smem:[#allocation2 + $0x4b]] }
 0x18d   :  { %1578 = vrot.lane.b32.xlu1 %v1573_v46, %s5808_s25  ;;  %v1052_v36 = vadd.f32 %v4003_v41, %v971_v29  ;;  %v1138_v46 = vmul.f32 %v3717_v32, %v4175_v4  ;;  %v4199_v41 = vmul.f32 %v3602_v25, %v4175_v4  ;;  %5897 = vst [vmem:[#allocation16_spill] sm:$0xff] %v4211_v12  ;;  %s1690_s22 = sadd.f32 %s4215_s27, %s4368_s23 }
 0x18e   :  { %v1271_v52 = vpop.permute.xlu2 %1270  ;;  %s1744_s16 = sadd.f32 %s4265_s1, %s4384_s4 }
 0x18f   :  { %v1097_v39 = vpop.permute.xlu1 %1096  ;;  %5894 = vst [vmem:[#allocation14_spill] sm:$0xff] %v4199_v41  ;;  %v1146_v45 = vrot.slane %v1138_v46, 1 }
 0x190   :  { %v1107_v51 = vadd.f32 %v1097_v39, %v1026_v34  ;;  %v5893_v34 = vrot.slane %v3980_v31, 1  ;;  %v1637_v31 = vrot.slane %v1628_v20, 2  ;;  %v5731_v20 = vrot.slane %v4199_v41, 1  ;;  %s1825_s12 = sadd.f32 %s4297_s2, %s1744_s16 }
 0x191   :  { %v4347_v41 = vstv %s4289_s14  ;;  %s4528_s16 = sld [smem:[#allocation2 + $0x34]] }
 0x192   :  { %v1182_v9 = vadd.f32 %v5728_v5, %v1107_v51  ;;  %1336 = vrot.lane.b32.xlu0 %v5892_v22, %s5808_s25  ;;  %v1123_v39 = vsel %vm378_vm1, %v1121_v63, %v5893_v34  ;;  %v5895_v51 = vrot.slane %v4157_v59, 2  ;;  %v1638_v63 = vrot.slane %v1629_v23, 2  ;;  %v5900_v23 = vld [vmem:[#allocation61_spill] sm:$0xff] }
 0x193   :  { %v1131_v34 = vadd.f32 %v1123_v39, %v1052_v36  ;;  %v5732_v36 = vrot.slane %v4211_v12, 1  ;;  %v1148_v39 = vsel %vm378_vm1, %v1146_v45, %v5731_v20  ;;  %v4232_v46 = vpop.permute.xlu0 %988 }
 0x194   :  { %1547 = vrot.lane.b32.xlu2 %v5895_v51, %s5799_s26  ;;  %v4204_v29 = vadd.f32 %v1271_v52, %v1182_v9  ;;  %v5898_v52 = vld [vmem:[#allocation62_spill] sm:$0xff]  ;;  %v1639_v11 = vsel %vm652_vm2, %v1637_v31, %v1638_v63  ;;  %5902 = vst [vmem:[#allocation21_spill] sm:$0xff] %v4232_v46  ;;  %v1496_v46 = vmul.f32 %v3641_v50, %v3698_v1  ;;  %v5915_v1 = vrot.slane %v3723_v30, 2 }
 0x195   :  { %1642 = vrot.lane.b32.xlu1 %v5896_v38, %s5808_s25  ;;  %v5899_v9 = vrot.slane %v5898_v52, 1  ;;  %v1353_v38 = vmul.f32 %v3717_v32, %v5900_v23  ;;  %v5903_v52 = vrot.slane %v4078_v13, 2  ;;  %v1159_v31 = vadd.f32 %v5732_v36, %v3936_v3  ;;  %v5905_v23 = vld [vmem:[#allocation64_spill] sm:$0xff]  ;;  %v4256_v36 = vld [vmem:[#allocation7 + $0x28] sm:$0xff] }
 0x196   :  { %v1335_v22 = vpop.permute.xlu2 %1334  ;;  %v421_v30 = vmul.f32 %v3557_v53, %v3658_v35 }
 0x197   :  { %v1203_v51 = vpop.permute.xlu1 %1202  ;;  %v1267_v5 = vsel %vm378_vm1, %v1265_v16, %v5899_v9  ;;  %v1361_v16 = vrot.slane %v1353_v38, 1  ;;  %v4245_v9 = vstv %s4215_s27  ;;  %v5906_v38 = vrot.slane %v5905_v23, 1  ;;  %s1902_s27 = sadd.f32 %s4397_s28, %s1825_s12 }
 0x198   :  { %v4223_v24 = vadd.f32 %v1203_v51, %v1131_v34  ;;  %v4241_v34 = vstv %s4213_s9  ;;  %v1156_v51 = vadd.f32 %v1148_v39, %v3859_v54  ;;  %v1693_v54 = vmul.f32 %v4256_v36, %v4245_v9 }
 0x199   :  { %5904 = vst [vmem:[#allocation39_spill] sm:$0xff] %v4241_v34  ;;  %v1363_v20 = vsel %vm378_vm1, %v1361_v16, %v5906_v38 }
 0x19a   :  { %5901 = vst [vmem:[#allocation71_spill] sm:$0xff] %v4223_v24  ;;  %1272 = vrot.lane.b32.xlu0 %v1267_v5, %s5799_s26 }
 0x19c   :  { %1644 = vrot.lane.b32.xlu2 %v1639_v11, %s5808_s25 }
 0x19d   :  { %1613 = vrot.lane.b32.xlu1 %v5903_v52, %s5808_s25  ;;  %v4252_v52 = vld [vmem:[#allocation7 + $0x20] sm:$0xff] }
 0x19e   :  { %v1242_v5 = vpop.permute.xlu2 %1241  ;;  %v1719_v3 = vmul.f32 %v4252_v52, %v4241_v34 }
 0x19f   :  { %v4247_v45 = vadd.f32 %v1242_v5, %v1159_v31  ;;  %v1236_v11 = vpop.permute.xlu1 %1235  ;;  %v4269_v31 = vpop.permute.xlu0 %1013 }
 0x1a0   :  { %v1247_v13 = vadd.f32 %v1236_v11, %v1156_v51  ;;  %v4275_v51 = vld [vmem:[#allocation7 + $0x50] sm:$0xff]  ;;  %v5908_v11 = vld [vmem:[#allocation56_spill] sm:$0xff] }
 0x1a1   :  { %v5909_v23 = vrot.slane %v5908_v11, 1  ;;  %v4303_v11 = vstv %s4071_s29  ;;  %s4358_s29 = sadd.f32 %s4305_s5, %s1591_s8 }
 0x1a2   :  { %v4260_v39 = vadd.f32 %v1335_v22, %v1247_v13  ;;  %1367 = vrot.lane.b32.xlu0 %v1363_v20, %s5808_s25  ;;  %v1461_v22 = vmul.f32 %v3717_v32, %v3731_v6  ;;  %v1694_v20 = vmul.f32 %v4275_v51, %v4245_v9  ;;  %v4287_v13 = vstv %s4265_s1  ;;  %s1771_s8 = sadd.f32 %s4289_s14, %s1690_s22 }
 0x1a3   :  { %s1717_s21 = sadd.f32 %s4213_s9, %s4358_s29 }
 0x1a4   :  { %1727 = vrot.lane.b32.xlu2 %v1719_v3, %s5799_s26  ;;  %v1469_v38 = vrot.slane %v1461_v22, 2  ;;  %v4295_v3 = vmul.f32 %v3645_v14, %v3958_v18  ;;  %v5911_v22 = vrot.slane %v3761_v27, 2  ;;  %v1746_v27 = vmul.f32 %v4252_v52, %v4287_v13  ;;  %s4470_s14 = sadd.f32 %s4330_s3, %s1902_s27 }
 0x1a5   :  { %1702 = vrot.lane.b32.xlu1 %v1693_v54, %s5799_s26  ;;  %s1798_s11 = sadd.f32 %s4283_s30, %s1717_s21 }
 0x1a6   :  { %v4267_v16 = vpop.permute.xlu2 %1338  ;;  %s2092_s4 = sadd.f32 %s4372_s19, %s4470_s14 }
 0x1a7   :  { %5907 = vst [vmem:[#allocation54_spill] sm:$0xff] %v4267_v16  ;;  %v4271_v5 = vpop.permute.xlu1 %1268  ;;  %v4314_v14 = vpop.permute.xlu0 %1019  ;;  %s1877_s9 = sadd.f32 %s4388_s10, %s1798_s11 }
 0x1a8   :  { %s4499_s22 = sld [smem:[#allocation2 + $0x18]] }
 0x1a9   :  { %s4516_s21 = sld [smem:[#allocation2 + $0x4e]] }
 0x1aa   :  { %1307 = vrot.lane.b32.xlu0 %v5909_v23, %s5808_s25  ;;  %v1747_v23 = vmul.f32 %v4256_v36, %v4287_v13 }
 0x1ac   :  { %1704 = vrot.lane.b32.xlu2 %v1694_v20, %s5799_s26  ;;  %v1471_v20 = vsel %vm652_vm2, %v1469_v38, %v5911_v22  ;;  %v5734_v38 = vrot.slane %v4295_v3, 1  ;;  %v4337_v22 = vstv %s4283_s30  ;;  %s4463_s30 = sadd.f32 %s4312_s13, %s1877_s9 }
 0x1ad   :  { %1646 = vrot.lane.b32.xlu1 %v1638_v63, %s5808_s25 }
 0x1ae   :  { %v4291_v6 = vpop.permute.xlu2 %1274  ;;  %v1134_v16 = vadd.f32 %v5734_v38, %v4068_v0  ;;  %v1800_v0 = vmul.f32 %v4252_v52, %v4337_v22  ;;  %v1774_v38 = vmul.f32 %v4256_v36, %v4347_v41  ;;  %s2059_s23 = sadd.f32 %s4339_s20, %s4463_s30 }
 0x1af   :  { %5910 = vst [vmem:[#allocation53_spill] sm:$0xff] %v4291_v6  ;;  %v1304_v54 = vpop.permute.xlu1 %1303  ;;  %v1505_v6 = vrot.slane %v1496_v46, 2 }
 0x1b0   :  { %v4308_v63 = vadd.f32 %v1304_v54, %v4058_v42  ;;  %v1411_v42 = vmul.f32 %v3717_v32, %v4303_v11  ;;  %v4326_v54 = vmul.f32 %v3602_v25, %v4303_v11 }
 0x1b2   :  { %1475 = vrot.lane.b32.xlu0 %v1471_v20, %s5799_s26  ;;  %5912 = vst [vmem:[#allocation40_spill] sm:$0xff] %v4326_v54 }
 0x1b4   :  { %1756 = vrot.lane.b32.xlu2 %v1747_v23, %s5799_s26  ;;  %v1419_v23 = vrot.slane %v1411_v42, 2 }
 0x1b5   :  { %1754 = vrot.lane.b32.xlu1 %v1746_v27, %s5799_s26 }
 0x1b6   :  { %v4341_v20 = vpop.permute.xlu2 %1371 }
 0x1b7   :  { %5913 = vst [vmem:[#allocation30_spill] sm:$0xff] %v4341_v20  ;;  %v1209_v27 = vpop.permute.xlu1 %1208 }
 0x1b8   :  { %v4360_v20 = vadd.f32 %v1209_v27, %v1134_v16  ;;  %v5916_v16 = vrot.slane %v4326_v54, 2 }
 0x1b9   :  { %v150_v42 = vpop.xlane.xlu0 %149 }
 0x1ba   :  { %5914 = vst [vmem:[#allocation55_spill] sm:$0xff] %v4360_v20  ;;  %v151_v24 = vrot.slane %v150_v42, 4  ;;  %1510 = vrot.lane.b32.xlu0 %v5915_v1, %s5799_s26  ;;  %v1421_v27 = vsel %vm652_vm2, %v1419_v23, %v5916_v16  ;;  %v5917_v20 = vld [vmem:[#allocation69_spill] sm:$0xff]  ;;  %v5918_v16 = vld [vmem:[#allocation12_spill] sm:$0xff] }
 0x1bb   :  { %v197_v12 = vmul.f32 %v3557_v53, %v5917_v20  ;;  %v1429_v23 = vadd.f32 %v1421_v27, %v4260_v39  ;;  %v1560_v39 = vmul.f32 %v3717_v32, %v3967_v19  ;;  %v4413_v27 = vld [vmem:[#allocation7 + $0x58] sm:$0xff] }
 0x1bc   :  { %v152_v4 = vadd.f32 %v151_v24, %v150_v42  ;;  %1808 = vrot.lane.b32.xlu2 %v1800_v0, %s5808_s25  ;;  %v429_v42 = vrot.slane %v421_v30, 1  ;;  %v4426_v30 = vstv %s3581_s7  ;;  %s1852_s7 = sadd.f32 %s4393_s6, %s1771_s8 }
 0x1bd   :  { %1783 = vrot.lane.b32.xlu1 %v1774_v38, %s5808_s25  ;;  %v282_v54 = vadd.f32 %v5918_v16, %v197_v12  ;;  %v5920_v38 = vrot.slane %v4038_v15, 2  ;;  %v1722_v12 = vmul.f32 %v4413_v27, %v4241_v34  ;;  %v5921_v15 = vld [vmem:[#allocation65_spill] sm:$0xff]  ;;  %v5922_v16 = vld [vmem:[#allocation20_spill] sm:$0xff]  ;;  %v200_v34 = vmul.f32 %v3583_v55, %v5917_v20  ;;  %s4536_s8 = sld [smem:[#allocation2 + $0x4f]] }
 0x1be   :  { %v153_v46 = vrot.slane %v152_v4, 2  ;;  %v1509_v1 = vpop.permute.xlu2 %1508  ;;  %v5924_v55 = vld [vmem:[#allocation11_spill] sm:$0xff]  ;;  %s4456_s1 = sadd.f32 %s4318_s18, %s1852_s7 }
 0x1bf   :  { %v4402_v35 = vadd.f32 %v1509_v1, %v1429_v23  ;;  %v4404_v24 = vpop.permute.xlu1 %1305  ;;  %v1507_v0 = vsel %vm652_vm2, %v1505_v6, %v5920_v38  ;;  %v1695_v1 = vmul.f32 %v4413_v27, %v4245_v9  ;;  %v177_v6 = vmul.f32 %v3653_v48, %v5921_v15  ;;  %s4572_s7 = sadd.f32 %s4516_s21, %s2092_s4 }
 0x1c0   :  { %5919 = vst [vmem:[#allocation18_spill] sm:$0xff] %v4404_v24  ;;  %v154_v23 = vadd.f32 %v153_v46, %v152_v4  ;;  %v363_v38 = vadd.f32 %v5922_v16, %v282_v54  ;;  %v372_v4 = vmul.f32 %v3653_v48, %v3668_v7  ;;  %v1568_v46 = vrot.slane %v1560_v39, 2  ;;  %s2026_s29 = sadd.f32 %s4350_s24, %s4456_s1 }
 0x1c1   :  { %v5923_v15 = vrot.slane %v3889_v61, 1  ;;  %v695_v24 = vmul.f32 %v3557_v53, %v3748_v49  ;;  %v4445_v7 = vmul.f32 %v3602_v25, %v4426_v30  ;;  %v230_v61 = vadd.f32 %v5924_v55, %v177_v6  ;;  %v5931_v55 = vld [vmem:[#allocation44_spill] sm:$0xff] }
 0x1c2   :  { %1512 = vrot.lane.b32.xlu0 %v1507_v0, %s5799_s26  ;;  %v155_v19 = vrot.slane %v154_v23, 1  ;;  %v382_v53 = vrot.slane %v372_v4, 1  ;;  %v1802_v16 = vmul.f32 %v4275_v51, %v4337_v22  ;;  %v1775_v4 = vmul.f32 %v4275_v51, %v4347_v41  ;;  %s4548_s11 = sadd.f32 %s4499_s22, %s2026_s29 }
 0x1c3   :  { %v431_v0 = vsel %vm378_vm1, %v429_v42, %v5923_v15  ;;  %v5925_v42 = vrot.slane %v3989_v28, 2  ;;  %v703_v6 = vrot.slane %v695_v24, 2 }
 0x1c4   :  { %1733 = vrot.lane.b32.xlu2 %v1722_v12, %s5799_s26  ;;  %v156_v54 = vadd.f32 %v155_v19, %v154_v23  ;;  %v439_v49 = vadd.f32 %v431_v0, %v363_v38  ;;  %v5926_v23 = vld [vmem:[#allocation15_spill] sm:$0xff]  ;;  %v5927_v38 = vld [vmem:[#allocation29_spill] sm:$0xff]  ;;  %v5930_v0 = vrot.slane %v3765_v26, 1 }
 0x1c5   :  { %1706 = vrot.lane.b32.xlu1 %v1695_v1, %s5799_s26  ;;  %v1570_v12 = vsel %vm652_vm2, %v1568_v46, %v5925_v42  ;;  %v285_v1 = vadd.f32 %v5926_v23, %v200_v34  ;;  %v5748_v46 = vrot.slane %v4445_v7, 2  ;;  %v5928_v34 = vld [vmem:[#allocation17_spill] sm:$0xff]  ;;  %v4484_v42 = vstv %s4080_s0  ;;  %s4510_s0 = sld [smem:[#allocation2 + $0x33]] }
 0x1c6   :  { %2704 = vpush %v156_v54  ;;  %v4449_v20 = vpop.permute.xlu2 %1479  ;;  %v538_v28 = vadd.f32 %v5927_v38, %v439_v49  ;;  %v311_v24 = vadd.f32 %v5928_v34, %v230_v61  ;;  %v384_v54 = vsel %vm378_vm1, %v382_v53, %v5930_v0  ;;  %v5932_v61 = vrot.slane %v4030_v43, 2 }
 0x1c7   :  { %v1370_v39 = vpop.permute.xlu1 %1369  ;;  %v4504_v43 = vstv %s4297_s2  ;;  %v1529_v34 = vmul.f32 %v3641_v50, %v3864_v56  ;;  %s4523_s2 = sld [smem:[#allocation2 + $0x19]]  ;;  %v5938_v56 = vld [vmem:[#allocation37_spill] sm:$0xff] }
 0x1c8   :  { %v1380_v19 = vadd.f32 %v1370_v39, %v4204_v29  ;;  %v5929_v29 = vld [vmem:[#allocation22_spill] sm:$0xff]  ;;  %v637_v49 = vadd.f32 %v5931_v55, %v538_v28  ;;  %v646_v39 = vmul.f32 %v3653_v48, %v3768_v60  ;;  %v705_v23 = vsel %vm652_vm2, %v703_v6, %v5932_v61  ;;  %v5933_v60 = vld [vmem:[#allocation70_spill] sm:$0xff]  ;;  %v5939_v61 = vld [vmem:[#allocation51_spill] sm:$0xff] }
 0x1c9   :  { %v366_v15 = vadd.f32 %v5929_v29, %v285_v1  ;;  %v391_v48 = vadd.f32 %v384_v54, %v311_v24  ;;  %v5934_v53 = vrot.slane %v5933_v60, 1  ;;  %v4508_v6 = vmul.f32 %v3602_v25, %v4484_v42  ;;  %v5935_v24 = vld [vmem:[#allocation24_spill] sm:$0xff]  ;;  %v5937_v55 = vld [vmem:[#allocation72_spill] sm:$0xff] }
 0x1ca   :  { %1574 = vrot.lane.b32.xlu0 %v1570_v12, %s5808_s25  ;;  %v1455_v26 = vadd.f32 %v5748_v46, %v1380_v19  ;;  %v713_v28 = vadd.f32 %v705_v23, %v637_v49  ;;  %v1749_v54 = vmul.f32 %v4413_v27, %v4287_v13  ;;  %v1828_v50 = vmul.f32 %v4256_v36, %v4504_v43 }
 0x1cb   :  { %v442_v12 = vadd.f32 %v5934_v53, %v366_v15  ;;  %v474_v29 = vadd.f32 %v5935_v24, %v391_v48  ;;  %v5936_v15 = vld [vmem:[#allocation33_spill] sm:$0xff]  ;;  %v5941_v48 = vrot.slane %v3876_v57, 2  ;;  %v1163_v57 = vmul.f32 %v3717_v32, %v4132_v44  ;;  %s4565_s12 = sadd.f32 %s4510_s0, %s2059_s23 }
 0x1cc   :  { %v4491_v1 = vpop.permute.xlu0 %1044  ;;  %1812 = vrot.lane.b32.xlu2 %v1802_v16, %s5808_s25  ;;  %v656_v16 = vrot.slane %v646_v39, 2  ;;  %v812_v49 = vadd.f32 %v5937_v55, %v713_v28 }
 0x1cd   :  { %1785 = vrot.lane.b32.xlu1 %v1775_v4, %s5808_s25  ;;  %v541_v0 = vadd.f32 %v5936_v15, %v442_v12  ;;  %v573_v39 = vadd.f32 %v5938_v56, %v474_v29  ;;  %v940_v12 = vmul.f32 %v3717_v32, %v3911_v62  ;;  %v4580_v15 = vstv %s4312_s13  ;;  %s2200_s9 = sadd.f32 %s4523_s2, %s4548_s11 }
 0x1ce   :  { %v1544_v38 = vpop.permute.xlu2 %1543  ;;  %v658_v60 = vsel %vm652_vm2, %v656_v16, %v5941_v48  ;;  %v911_v53 = vadd.f32 %v4056_v8, %v812_v49  ;;  %v4555_v16 = vld [vmem:[#allocation7 + $0x48] sm:$0xff]  ;;  %v5943_v49 = vrot.slane %v4157_v59, 2  ;;  %s2233_s27 = sadd.f32 %s4528_s16, %s4565_s12  ;;  %v1962_v59 = vmul.f32 %v4252_v52, %v4580_v15 }
 0x1cf   :  { %v4512_v4 = vadd.f32 %v1544_v38, %v1455_v26  ;;  %v1341_v19 = vpop.permute.xlu1 %1340  ;;  %v640_v23 = vadd.f32 %v5939_v61, %v541_v0  ;;  %v5740_v26 = vrot.slane %v4508_v6, 2  ;;  %v4559_v8 = vmul.f32 %v4555_v16, %v4303_v11  ;;  %s2266_s13 = sadd.f32 %s4536_s8, %s4572_s7 }
 0x1d0   :  { %v1349_v25 = vadd.f32 %v1341_v19, %v4247_v45  ;;  %v5940_v45 = vrot.slane %v3955_v21, 2  ;;  %v1538_v21 = vrot.slane %v1529_v34, 2  ;;  %v665_v28 = vadd.f32 %v658_v60, %v573_v39  ;;  %v5945_v60 = vld [vmem:[#allocation74_spill] sm:$0xff] }
 0x1d1   :  { %v5942_v19 = vrot.slane %v3799_v17, 2  ;;  %v1405_v29 = vadd.f32 %v5740_v26, %v4308_v63  ;;  %v944_v0 = vadd.f32 %v940_v12, %v911_v53  ;;  %v1171_v63 = vrot.slane %v1163_v57, 1  ;;  %v5946_v12 = vld [vmem:[#allocation57_spill] sm:$0xff] }
 0x1d2   :  { %1609 = vrot.lane.b32.xlu0 %v5940_v45, %s5808_s25  ;;  %v1540_v17 = vsel %vm652_vm2, %v1538_v21, %v5943_v49  ;;  %v1829_v39 = vmul.f32 %v4275_v51, %v4504_v43  ;;  %v5742_v61 = vrot.slane %v4559_v8, 2  ;;  %v5944_v45 = vld [vmem:[#allocation58_spill] sm:$0xff]  ;;  %v748_v21 = vadd.f32 %v5946_v12, %v665_v28 }
 0x1d3   :  { %v716_v34 = vadd.f32 %v5942_v19, %v640_v23  ;;  %v4607_v23 = vmul.f32 %v4256_v36, %v4580_v15  ;;  %v1025_v57 = vadd.f32 %v4269_v31, %v944_v0  ;;  %v1970_v31 = vrot.slane %v1962_v59, 1  ;;  %v5948_v0 = vld [vmem:[#allocation13_spill] sm:$0xff] }
 0x1d4   :  { %v4550_v38 = vpop.permute.xlu0 %1069  ;;  %1760 = vrot.lane.b32.xlu2 %v1749_v54, %s5799_s26 }
 0x1d5   :  { %1837 = vrot.lane.b32.xlu1 %v1828_v50, %s5808_s25  ;;  %v1626_v50 = vmul.f32 %v3717_v32, %v4144_v10  ;;  %v4610_v32 = vstv %s4318_s18  ;;  %v2746_v10 = vld [vmem:[#allocation7 + $0x8] sm:$0xff]  ;;  %v815_v53 = vadd.f32 %v5945_v60, %v716_v34 }
 0x1d6   :  { %v1608_v24 = vpop.permute.xlu2 %1607  ;;  %v187_v48 = vmul.f32 %v2746_v10, %v5944_v45  ;;  %v4626_v34 = vmul.f32 %v4256_v36, %v4610_v32  ;;  %v5949_v45 = vrot.slane %v4164_v47, 2  ;;  %v4657_v47 = vmul.f32 %v4413_v27, %v4610_v32 }
 0x1d7   :  { %v4585_v54 = vadd.f32 %v1608_v24, %v4402_v35  ;;  %v1478_v55 = vpop.permute.xlu1 %1477  ;;  %v1803_v35 = vmul.f32 %v4413_v27, %v4337_v22  ;;  %v1634_v19 = vrot.slane %v1626_v50, 2  ;;  %v914_v24 = vadd.f32 %v4126_v40, %v815_v53  ;;  %v4634_v50 = vld [vmem:[#allocation7 + $0x40] sm:$0xff] }
 0x1d8   :  { %v4594_v56 = vadd.f32 %v1478_v55, %v1405_v29  ;;  %v943_v29 = vmul.f32 %v4555_v16, %v3911_v62  ;;  %v5947_v55 = vrot.slane %v4141_v2, 1  ;;  %v1432_v40 = vadd.f32 %v5742_v61, %v1349_v25 }
 0x1d9   :  { %v5741_v62 = vrot.slane %v4607_v23, 1  ;;  %v256_v2 = vadd.f32 %v5948_v0, %v187_v48  ;;  %v1636_v25 = vsel %vm652_vm2, %v1634_v19, %v5949_v45  ;;  %v4645_v48 = vmul.f32 %v4555_v16, %v4132_v44 }
 0x1da   :  { %1545 = vrot.lane.b32.xlu0 %v1540_v17, %s5799_s26  ;;  %v1173_v49 = vsel %vm378_vm1, %v1171_v63, %v5947_v55  ;;  %v847_v17 = vadd.f32 %v3903_v33, %v748_v21  ;;  %v920_v63 = vmul.f32 %v4634_v50, %v3917_v37  ;;  %v947_v59 = vadd.f32 %v943_v29, %v914_v24  ;;  %v5950_v21 = vld [vmem:[#allocation19_spill] sm:$0xff] }
 0x1db   :  { %v5745_v33 = vrot.slane %v4626_v34, 1  ;;  %v1115_v60 = vmul.f32 %v4634_v50, %v3958_v18  ;;  %v1972_v37 = vsel %vm378_vm1, %v1970_v31, %v5741_v62  ;;  %v1931_v53 = vmul.f32 %v4275_v51, %v4610_v32 }
 0x1dc   :  { %v1095_v26 = vpop.permute.xlu0 %1094  ;;  %1839 = vrot.lane.b32.xlu2 %v1829_v39, %s5808_s25  ;;  %v924_v19 = vadd.f32 %v920_v63, %v847_v17  ;;  %v1028_v18 = vadd.f32 %v4314_v14, %v947_v59  ;;  %v5749_v29 = vrot.slane %v4645_v48, 1  ;;  %v4674_v14 = vmul.f32 %v4555_v16, %v4426_v30  ;;  %v5954_v59 = vld [vmem:[#allocation26_spill] sm:$0xff] }
 0x1dd   :  { %v1106_v28 = vadd.f32 %v1095_v26, %v1025_v57  ;;  %1814 = vrot.lane.b32.xlu1 %v1803_v35, %s5808_s25  ;;  %v337_v57 = vadd.f32 %v5950_v21, %v256_v2  ;;  %v1388_v17 = vmul.f32 %v4634_v50, %v4484_v42  ;;  %v4684_v63 = vmul.f32 %v4555_v16, %v4484_v42  ;;  %v5956_v21 = vld [vmem:[#allocation38_spill] sm:$0xff]  ;;  %v5957_v16 = vld [vmem:[#allocation53_spill] sm:$0xff] }
 0x1de   :  { %v1515_v39 = vpop.permute.xlu2 %1514  ;;  %v973_v24 = vadd.f32 %v4190_v58, %v924_v19  ;;  %v5951_v58 = vld [vmem:[#allocation59_spill] sm:$0xff] }
 0x1df   :  { %v1181_v10 = vadd.f32 %v1173_v49, %v1106_v28  ;;  %v4638_v26 = vadd.f32 %v1515_v39, %v1432_v40  ;;  %v1374_v35 = vpop.permute.xlu1 %1373  ;;  %v1124_v49 = vrot.slane %v1115_v60, 1  ;;  %v1941_v40 = vrot.slane %v4657_v47, 1 }
 0x1e0   :  { %v5952_v31 = vrot.slane %v5951_v58, 1  ;;  %v1054_v39 = vadd.f32 %v4491_v1, %v973_v24  ;;  %v5743_v24 = vrot.slane %v4674_v14, 2  ;;  %v1397_v58 = vrot.slane %v1388_v17, 2 }
 0x1e1   :  { %v4660_v12 = vadd.f32 %v4271_v5, %v1181_v10  ;;  %v1940_v5 = vrot.slane %v1931_v53, 1  ;;  %v5978_v47 = vrot.slane %v4645_v48, 1  ;;  %v5979_v48 = vld [vmem:[#allocation66_spill] sm:$0xff] }
 0x1e2   :  { %1640 = vrot.lane.b32.xlu0 %v1636_v25, %s5808_s25  ;;  %v415_v0 = vadd.f32 %v5952_v31, %v337_v57  ;;  %v4692_v25 = vstv %s4330_s3  ;;  %v1140_v57 = vmul.f32 %v4634_v50, %v5956_v21  ;;  %v5747_v31 = vrot.slane %v4684_v63, 2 }
 0x1e3   :  { %v1942_v1 = vsel %vm378_vm1, %v1940_v5, %v1941_v40  ;;  %v5960_v5 = vld [vmem:[#allocation41_spill] sm:$0xff] }
 0x1e4   :  { %v1101_v55 = vpop.permute.xlu0 %1100  ;;  %1976 = vrot.lane.b32.xlu2 %v1972_v37, %s5799_s26  ;;  %v506_v60 = vadd.f32 %v5954_v59, %v415_v0  ;;  %v5955_v37 = vrot.slane %v4295_v3, 1  ;;  %v1996_v3 = vmul.f32 %v4256_v36, %v4692_v25  ;;  %v1149_v21 = vrot.slane %v1140_v57, 1 }
 0x1e5   :  { %v1109_v28 = vadd.f32 %v1101_v55, %v1028_v18  ;;  %1945 = vrot.lane.b32.xlu1 %v5745_v33, %s5799_s26  ;;  %v1830_v18 = vmul.f32 %v4413_v27, %v4504_v43  ;;  %v5958_v55 = vld [vmem:[#allocation49_spill] sm:$0xff] }
 0x1e6   :  { %v4678_v2 = vpop.permute.xlu2 %1611  ;;  %v1126_v53 = vsel %vm378_vm1, %v1124_v49, %v5955_v37  ;;  %v1995_v49 = vmul.f32 %v4252_v52, %v4692_v25  ;;  %v605_v0 = vadd.f32 %v5960_v5, %v506_v60  ;;  %v2004_v62 = vrot.slane %v1996_v3, 1 }
 0x1e7   :  { %5953 = vst [vmem:[#allocation23_spill] sm:$0xff] %v4678_v2  ;;  %v1184_v10 = vadd.f32 %v5749_v29, %v1109_v28  ;;  %v4689_v45 = vpop.permute.xlu1 %1541  ;;  %v5959_v28 = vrot.slane %v5958_v55, 2  ;;  %v2060_v60 = vstv %s4339_s20  ;;  %v4829_v2 = vstv %s4333_s15  ;;  %s5110_s15 = sld [smem:[#allocation2 + $0x50]] }
 0x1e8   :  { %v2003_v61 = vrot.slane %v1995_v49, 1 }
 0x1e9   :  { %v1283_v19 = vadd.f32 %v5957_v16, %v1184_v10  ;;  %v1133_v10 = vadd.f32 %v1126_v53, %v1054_v39  ;;  %v5961_v39 = vld [vmem:[#allocation68_spill] sm:$0xff] }
 0x1ea   :  { %1580 = vrot.lane.b32.xlu0 %v5959_v28, %s5808_s25  ;;  %v1692_v28 = vmul.f32 %v4252_v52, %v4245_v9  ;;  %v5962_v53 = vrot.slane %v5961_v39, 2  ;;  %v5964_v9 = vld [vmem:[#allocation16_spill] sm:$0xff]  ;;  %v2748_v39 = vld [vmem:[#allocation7 + $0x18] sm:$0xff] }
 0x1eb   :  { %v1382_v59 = vadd.f32 %v1374_v35, %v1283_v19  ;;  %v1399_v35 = vsel %vm652_vm2, %v1397_v58, %v5747_v31  ;;  %v5963_v19 = vld [vmem:[#allocation18_spill] sm:$0xff]  ;;  %v5965_v3 = vrot.slane %v5964_v9, 1  ;;  %v4740_v58 = vmul.f32 %v4256_v36, %v2060_v60 }
 0x1ec   :  { %v1207_v37 = vpop.permute.xlu0 %1206  ;;  %1947 = vrot.lane.b32.xlu2 %v1942_v1, %s5799_s26  ;;  %v689_v57 = vadd.f32 %v5962_v53, %v605_v0  ;;  %v5969_v53 = vld [vmem:[#allocation73_spill] sm:$0xff] }
 0x1ed   :  { %v1216_v16 = vadd.f32 %v1207_v37, %v1133_v10  ;;  %1841 = vrot.lane.b32.xlu1 %v1830_v18, %s5808_s25  ;;  %v1457_v55 = vadd.f32 %v5743_v24, %v1382_v59  ;;  %v1151_v49 = vsel %vm378_vm1, %v1149_v21, %v5965_v3  ;;  %v5966_v59 = vld [vmem:[#allocation63_spill] sm:$0xff]  ;;  %v2061_v24 = vmul.f32 %v4252_v52, %v2060_v60 }
 0x1ee   :  { %v1548_v17 = vpop.permute.xlu2 %1547  ;;  %v780_v37 = vadd.f32 %v5966_v59, %v689_v57  ;;  %5967 = vst [vmem:[#allocation42_spill] sm:$0xff] %v4740_v58  ;;  %v930_v21 = vmul.f32 %v2748_v39, %v5969_v53  ;;  %v5972_v59 = vld [vmem:[#allocation39_spill] sm:$0xff] }
 0x1ef   :  { %v1315_v1 = vadd.f32 %v5963_v19, %v1216_v16  ;;  %v4729_v18 = vadd.f32 %v1548_v17, %v1457_v55  ;;  %v1577_v5 = vpop.permute.xlu1 %1576  ;;  %v2005_v16 = vsel %vm378_vm1, %v2003_v61, %v2004_v62  ;;  %v4745_v55 = vstv %s4350_s24  ;;  %v5970_v19 = vld [vmem:[#allocation27_spill] sm:$0xff]  ;;  %s6005_s24 = sld [smem:[#allocation28_spill]] }
 0x1f0   :  { %v4732_v10 = vadd.f32 %v1577_v5, %v4594_v56  ;;  %v5968_v56 = vld [vmem:[#allocation34_spill] sm:$0xff]  ;;  %v1158_v57 = vadd.f32 %v1151_v49, %v5970_v19  ;;  %v2069_v61 = vrot.slane %v2061_v24, 1  ;;  %v1720_v49 = vmul.f32 %v4256_v36, %v5972_v59 }
 0x1f1   :  { %v1406_v0 = vadd.f32 %v1399_v35, %v1315_v1  ;;  %v879_v17 = vadd.f32 %v5968_v56, %v780_v37  ;;  %v4758_v1 = vmul.f32 %v4256_v36, %v4745_v55  ;;  %v4781_v19 = vmul.f32 %v4413_v27, %v4580_v15 }
 0x1f2   :  { %1700 = vrot.lane.b32.xlu0 %v1692_v28, %s5799_s26  ;;  %v5744_v28 = vrot.slane %v4740_v58, 1 }
 0x1f3   :  { %v1489_v5 = vadd.f32 %v4449_v20, %v1406_v0  ;;  %v4765_v20 = vstv %s4305_s5  ;;  %v934_v37 = vadd.f32 %v930_v21, %v879_v17  ;;  %v5973_v0 = vld [vmem:[#allocation21_spill] sm:$0xff]  ;;  %v5746_v56 = vrot.slane %v4758_v1, 1  ;;  %s4966_s5 = sld [smem:[#allocation2 + $0x35]] }
 0x1f4   :  { %v1240_v9 = vpop.permute.xlu0 %1239  ;;  %2011 = vrot.lane.b32.xlu2 %v2004_v62, %s5799_s26  ;;  %v1670_v39 = vmul.f32 %v4252_v52, %v4765_v20 }
 0x1f5   :  { %v4752_v35 = vadd.f32 %v1240_v9, %v1158_v57  ;;  %2009 = vrot.lane.b32.xlu1 %v2005_v16, %s5799_s26  ;;  %v999_v24 = vadd.f32 %v5973_v0, %v934_v37  ;;  %v2071_v16 = vsel %vm378_vm1, %v2069_v61, %v5744_v28  ;;  %v5974_v57 = vld [vmem:[#allocation71_spill] sm:$0xff]  ;;  %v5975_v37 = vld [vmem:[#allocation14_spill] sm:$0xff] }
 0x1f6   :  { %v4760_v3 = vpop.permute.xlu2 %1644  ;;  %v1674_v61 = vadd.f32 %v1670_v39, %v4585_v54  ;;  %v5976_v0 = vrot.slane %v5975_v37, 1  ;;  %v2063_v39 = vmul.f32 %v4275_v51, %v2060_v60 }
 0x1f7   :  { %5971 = vst [vmem:[#allocation31_spill] sm:$0xff] %v4760_v3  ;;  %s2705_s18 = spop %2704  ;;  %v4767_v62 = vpop.permute.xlu1 %1481  ;;  %v1080_v17 = vadd.f32 %v4550_v38, %v999_v24 }
 0x1f8   :  { %s158_s3 = smul.f32 0.0006510417, %s2705_s18  ;;  %v2072_v46 = vrot.slane %v2063_v39, 1 }
 0x1f9   :  { %v1157_v24 = vadd.f32 %v5976_v0, %v1080_v17 }
 0x1fa   :  { %s159_s20 = sadd.f32 1e-05, %s158_s3  ;;  %1729 = vrot.lane.b32.xlu0 %v1720_v49, %s5799_s26  ;;  %v1721_v49 = vmul.f32 %v4275_v51, %v5972_v59  ;;  %v4806_v59 = vmul.f32 %v4413_v27, %v2060_v60  ;;  %v1773_v60 = vmul.f32 %v4252_v52, %v4347_v41 }
 0x1fc   :  { %v160_v53 = vstv %s159_s20  ;;  %v1302_v21 = vpop.permute.xlu0 %1301  ;;  %2075 = vrot.lane.b32.xlu2 %v2071_v16, %s5808_s25 }
 0x1fd   :  { %2729 = vrsqrt.f32 %v160_v53  ;;  %v4784_v9 = vadd.f32 %v1302_v21, %v5974_v57  ;;  %2044 = vrot.lane.b32.xlu1 %v5746_v56, %s5808_s25  ;;  %v5750_v21 = vrot.slane %v4781_v19, 1  ;;  %v4798_v57 = vstv %s4328_s17  ;;  %s4987_s17 = sld [smem:[#allocation2 + $0x1a]] }
 0x1fe   :  { %v1728_v38 = vpop.permute.xlu2 %1727  ;;  %v1165_v56 = vmul.f32 %v4634_v50, %v4132_v44  ;;  %v1661_v54 = vmul.f32 %v4275_v51, %v4798_v57  ;;  %vm167_vm4 = vweird.f32 %v160_v53 }
 0x1ff   :  { %v4794_v16 = vadd.f32 %v1728_v38, %v1674_v61  ;;  %v1579_v28 = vpop.permute.xlu1 %1578  ;;  %v5977_v61 = vld [vmem:[#allocation36_spill] sm:$0xff] }
 0x200   :  { %v1588_v33 = vadd.f32 %v1579_v28, %v1489_v5  ;;  %v2030_v5 = vmul.f32 %v4275_v51, %v4745_v55  ;;  %v4813_v28 = vmul.f32 %v4413_v27, %v4745_v55  ;;  %v1248_v44 = vadd.f32 %v5977_v61, %v1157_v24 }
 0x201   :  { %v2073_v24 = vrot.slane %v4806_v59, 1 }
 0x202   :  { %1731 = vrot.lane.b32.xlu0 %v1721_v49, %s5799_s26  ;;  %v1174_v49 = vrot.slane %v1165_v56, 1  ;;  %v1665_v31 = vadd.f32 %v1661_v54, %v1588_v33  ;;  %v2039_v3 = vrot.slane %v2030_v5, 1  ;;  %v1682_v54 = vmul.f32 %v4256_v36, %v4829_v2  ;;  %v2749_v5 = vld [vmem:[#allocation7 + $0x10] sm:$0xff] }
 0x203   :  { %v2730_v17 = vpop.eup %2729  ;;  %s2299_s29 = sadd.f32 %s4987_s17, %s2200_s9 }
 0x204   :  { %v162_v38 = vmul.f32 %v2730_v17, %v160_v53  ;;  %v1337_v37 = vpop.permute.xlu0 %1336  ;;  %1982 = vrot.lane.b32.xlu2 %v5750_v21, %s5799_s26  ;;  %v5752_v21 = vrot.slane %v4813_v28, 1  ;;  %v1176_v33 = vsel %vm378_vm1, %v1174_v49, %v5978_v47  ;;  %vm168_vm3 = vweird.f32 %v2730_v17 }
 0x205   :  { %v4821_v0 = vadd.f32 %v1337_v37, %v1248_v44  ;;  %1949 = vrot.lane.b32.xlu1 %v1941_v40, %s5799_s26  ;;  %v2074_v40 = vsel %vm378_vm1, %v2072_v46, %v2073_v24  ;;  %vm169_vm5 = vmor %vm167_vm4, %vm168_vm3 }
 0x206   :  { %v163_v61 = vmul.f32 %v2730_v17, %v162_v38  ;;  %v1705_v29 = vpop.permute.xlu2 %1704  ;;  %v1436_v38 = vmul.f32 %v2749_v5, %v4426_v30 }
 0x207   :  { %v4831_v58 = vadd.f32 %v1705_v29, %v1665_v31  ;;  %v1643_v56 = vpop.permute.xlu1 %1642  ;;  %v2041_v29 = vsel %vm378_vm1, %v2039_v3, %v5752_v21  ;;  %v1183_v31 = vadd.f32 %v1176_v33, %v5979_v48  ;;  %v1801_v33 = vmul.f32 %v4256_v36, %v4337_v22 }
 0x208   :  { %v164_v44 = vmul.f32 0.5, %v163_v61  ;;  %v1653_v37 = vadd.f32 %v1643_v56, %v4512_v4  ;;  %v4847_v4 = vstv %s4372_s19  ;;  %v1660_v22 = vmul.f32 %v4256_v36, %v4798_v57 }
 0x209   :  { %v4861_v56 = vmul.f32 %v4256_v36, %v4847_v4 }
 0x20a   :  { %v165_v39 = vsub.f32 1.5, %v164_v44  ;;  %1781 = vrot.lane.b32.xlu0 %v1773_v60, %s5808_s25  ;;  %v4854_v60 = vmul.f32 %v4413_v27, %v4692_v25  ;;  %v1686_v3 = vadd.f32 %v1682_v54, %v1653_v37  ;;  %v2096_v37 = vmul.f32 %v4275_v51, %v4847_v4 }
 0x20b   :  { %v5753_v54 = vrot.slane %v4861_v56, 1 }
 0x20c   :  { %v1273_v49 = vpop.permute.xlu0 %1272  ;;  %2079 = vrot.lane.b32.xlu2 %v2074_v40, %s5808_s25  ;;  %v166_v46 = vmul.f32 %v2730_v17, %v165_v39  ;;  %v1444_v39 = vrot.slane %v1436_v38, 2 }
 0x20d   :  { %v4856_v61 = vadd.f32 %v1273_v49, %v1183_v31  ;;  %2046 = vrot.lane.b32.xlu1 %v2041_v29, %s5808_s25  ;;  %v5761_v29 = vrot.slane %v4854_v60, 1  ;;  %v5980_v31 = vrot.slane %v4445_v7, 2  ;;  %v2105_v49 = vrot.slane %v2096_v37, 1 }
 0x20e   :  { %v170_v44 = vsel %vm169_vm5, %v2730_v17, %v166_v46  ;;  %v1757_v47 = vpop.permute.xlu2 %1756  ;;  %v4873_v17 = vmul.f32 %v4413_v27, %v4847_v4  ;;  %v1664_v7 = vadd.f32 %v1660_v22, %v4732_v10  ;;  %v1386_v10 = vmul.f32 %v2749_v5, %v4484_v42  ;;  %v5981_v5 = vld [vmem:[#allocation55_spill] sm:$0xff] }
 0x20f   :  { %2706 = vpush %v170_v44  ;;  %v4865_v53 = vadd.f32 %v1757_v47, %v1686_v3  ;;  %v1614_v40 = vpop.permute.xlu1 %1613  ;;  %v1748_v47 = vmul.f32 %v4275_v51, %v4287_v13 }
 0x210   :  { %v1622_v48 = vadd.f32 %v1614_v40, %v4638_v26  ;;  %v1446_v26 = vsel %vm652_vm2, %v1444_v39, %v5980_v31  ;;  %v2106_v46 = vrot.slane %v4873_v17, 1 }
 0x212   :  { %1810 = vrot.lane.b32.xlu0 %v1801_v33, %s5808_s25  ;;  %v4894_v33 = vstv %s4528_s16 }
 0x213   :  { %v2235_v13 = vmul.f32 %v4252_v52, %v4894_v33  ;;  %v4911_v22 = vmul.f32 %v4256_v36, %v4894_v33 }
 0x214   :  { %v1368_v38 = vpop.permute.xlu0 %1367  ;;  %2015 = vrot.lane.b32.xlu2 %v5761_v29, %s5799_s26 }
 0x215   :  { %v1379_v3 = vadd.f32 %v1368_v38, %v4660_v12  ;;  %2110 = vrot.lane.b32.xlu1 %v5753_v54, %s5808_s25  ;;  %v2107_v12 = vsel %vm378_vm1, %v2105_v49, %v2106_v46  ;;  %v1673_v38 = vmul.f32 %v4413_v27, %v4765_v20 }
 0x216   :  { %v1809_v44 = vpop.permute.xlu2 %1808 }
 0x217   :  { %v1454_v40 = vadd.f32 %v1446_v26, %v1379_v3  ;;  %v4897_v39 = vadd.f32 %v1809_v44, %v4794_v16  ;;  %v1703_v37 = vpop.permute.xlu1 %1702  ;;  %v4914_v16 = vstv %s4523_s2  ;;  %v1394_v3 = vrot.slane %v1386_v10, 2 }
 0x218   :  { %v4899_v31 = vadd.f32 %v1703_v37, %v1664_v7  ;;  %v4923_v42 = vmul.f32 %v4256_v36, %v4914_v16  ;;  %v1677_v7 = vadd.f32 %v1673_v38, %v1622_v48  ;;  %v2243_v37 = vrot.slane %v2235_v13, 2 }
 0x219   :  { %v4917_v26 = vadd.f32 %v4689_v45, %v1454_v40  ;;  %v5754_v45 = vrot.slane %v4911_v22, 2 }
 0x21a   :  { %1758 = vrot.lane.b32.xlu0 %v1748_v47, %s5799_s26  ;;  %v1827_v47 = vmul.f32 %v4252_v52, %v4504_v43  ;;  %v2204_v43 = vmul.f32 %v4275_v51, %v4914_v16 }
 0x21b   :  { %v2245_v48 = vsel %vm652_vm2, %v2243_v37, %v5754_v45  ;;  %v4973_v37 = vstv %s4536_s8 }
 0x21c   :  { %v1308_v49 = vpop.permute.xlu0 %1307  ;;  %2112 = vrot.lane.b32.xlu2 %v2107_v12, %s5808_s25  ;;  %v5982_v12 = vrot.slane %v4684_v63, 2  ;;  %v4948_v63 = vmul.f32 %v4413_v27, %v4914_v16  ;;  %v2213_v13 = vrot.slane %v2204_v43, 2 }
 0x21d   :  { %v1316_v44 = vadd.f32 %v1308_v49, %v5981_v5  ;;  %2081 = vrot.lane.b32.xlu1 %v2073_v24, %s5808_s25  ;;  %v5983_v5 = vrot.slane %v4508_v6, 2  ;;  %v5755_v24 = vrot.slane %v4923_v42, 2 }
 0x21e   :  { %v1734_v40 = vpop.permute.xlu2 %1733 }
 0x21f   :  { %v1407_v10 = vadd.f32 %v5982_v12, %v1316_v44  ;;  %v4934_v21 = vadd.f32 %v1734_v40, %v1677_v7  ;;  %v1647_v54 = vpop.permute.xlu1 %1646  ;;  %v1396_v59 = vsel %vm652_vm2, %v1394_v3, %v5983_v5  ;;  %v2214_v3 = vrot.slane %v4948_v63, 2 }
 0x220   :  { %v1655_v49 = vadd.f32 %v1647_v54, %v4729_v18  ;;  %v1404_v6 = vadd.f32 %v1396_v59, %v4784_v9  ;;  %v1929_v7 = vmul.f32 %v4252_v52, %v4610_v32  ;;  %v1413_v40 = vmul.f32 %v4634_v50, %v4303_v11  ;;  %v5984_v11 = vld [vmem:[#allocation40_spill] sm:$0xff] }
 0x221   :  { %v4951_v18 = vadd.f32 %v4767_v62, %v1407_v10  ;;  %v1776_v62 = vmul.f32 %v4413_v27, %v4347_v41  ;;  %v1684_v12 = vmul.f32 %v4413_v27, %v4829_v2  ;;  %v2269_v41 = vmul.f32 %v4256_v36, %v4973_v37 }
 0x222   :  { %1835 = vrot.lane.b32.xlu0 %v1827_v47, %s5808_s25  ;;  %v2215_v47 = vsel %vm652_vm2, %v2213_v13, %v2214_v3  ;;  %v2268_v32 = vmul.f32 %v4252_v52, %v4973_v37  ;;  %v5985_v10 = vrot.slane %v5984_v11, 2  ;;  %v1937_v59 = vrot.slane %v1929_v7, 1 }
 0x223   :  { %v1422_v43 = vrot.slane %v1413_v40, 2  ;;  %v5987_v40 = vrot.slane %v4626_v34, 1 }
 0x224   :  { %v1476_v54 = vpop.permute.xlu0 %1475  ;;  %2249 = vrot.lane.b32.xlu2 %v2245_v48, %s5799_s26  ;;  %v1430_v5 = vadd.f32 %v5985_v10, %v4821_v0  ;;  %v2276_v45 = vrot.slane %v2268_v32, 2  ;;  %v5986_v0 = vld [vmem:[#allocation54_spill] sm:$0xff] }
 0x225   :  { %v4956_v38 = vadd.f32 %v1476_v54, %v1404_v6  ;;  %2218 = vrot.lane.b32.xlu1 %v5755_v24, %s5799_s26  ;;  %v1688_v54 = vadd.f32 %v1684_v12, %v1655_v49  ;;  %v2333_v24 = vstv %s4966_s5  ;;  %v1348_v11 = vadd.f32 %v5986_v0, %v4752_v35 }
 0x226   :  { %v4962_v44 = vpop.permute.xlu2 %1812  ;;  %v2334_v12 = vmul.f32 %v4252_v52, %v2333_v24  ;;  %v5017_v35 = vmul.f32 %v4256_v36, %v2333_v24 }
 0x227   :  { %v4968_v9 = vpop.permute.xlu1 %1754 }
 0x22a   :  { %1787 = vrot.lane.b32.xlu0 %v1776_v62, %s5808_s25  ;;  %v2277_v62 = vrot.slane %v2269_v41, 2  ;;  %v5022_v41 = vstv %s4987_s17 }
 0x22c   :  { %v1511_v48 = vpop.permute.xlu0 %1510  ;;  %2220 = vrot.lane.b32.xlu2 %v2215_v47, %s5799_s26  ;;  %v1939_v47 = vsel %vm378_vm1, %v1937_v59, %v5987_v40  ;;  %v2278_v34 = vsel %vm652_vm2, %v2276_v45, %v2277_v62  ;;  %v5758_v45 = vrot.slane %v5017_v35, 2 }
 0x22d   :  { %v4993_v6 = vadd.f32 %v1511_v48, %v1430_v5  ;;  %2114 = vrot.lane.b32.xlu1 %v2106_v46, %s5808_s25  ;;  %v5007_v5 = vstv %s4388_s10  ;;  %v5988_v46 = vrot.slane %v4559_v8, 2  ;;  %s2692_s10 = sld [smem:[#allocation5 + $0x1]] }
 0x22e   :  { %v1761_v13 = vpop.permute.xlu2 %1760  ;;  %v1879_v32 = vmul.f32 %v4252_v52, %v5007_v5 }
 0x22f   :  { %v5001_v7 = vadd.f32 %v1761_v13, %v1688_v54  ;;  %v1784_v10 = vpop.permute.xlu1 %1783  ;;  %v1424_v49 = vsel %vm652_vm2, %v1422_v43, %v5988_v46  ;;  %v2342_v43 = vrot.slane %v2334_v12, 2  ;;  %v5037_v54 = vmul.f32 %v4256_v36, %v5022_v41 }
 0x230   :  { %v5010_v17 = vadd.f32 %v1784_v10, %v4899_v31  ;;  %v5028_v31 = vmul.f32 %v4256_v36, %v5007_v5  ;;  %v1431_v8 = vadd.f32 %v1424_v49, %v1348_v11  ;;  %v1887_v13 = vrot.slane %v1879_v32, 1 }
 0x231   :  { %v2344_v10 = vsel %vm652_vm2, %v2342_v43, %v5758_v45  ;;  %v5759_v40 = vrot.slane %v5037_v54, 2  ;;  %v5989_v36 = vrot.slane %v4607_v23, 1  ;;  %v5068_v32 = vmul.f32 %v4413_v27, %v4894_v33 }
 0x232   :  { %1943 = vrot.lane.b32.xlu0 %v1939_v47, %s5799_s26  ;;  %v5756_v0 = vrot.slane %v5028_v31, 1  ;;  %v5051_v47 = vstv %s4393_s6  ;;  %s2332_s6 = sadd.f32 %s4966_s5, %s2233_s27 }
 0x233   :  { %v1856_v49 = vmul.f32 %v4275_v51, %v5051_v47 }
 0x234   :  { %v1513_v59 = vpop.permute.xlu0 %1512  ;;  %2284 = vrot.lane.b32.xlu2 %v2277_v62, %s5799_s26  ;;  %v1964_v62 = vmul.f32 %v4275_v51, %v4580_v15  ;;  %v1889_v46 = vsel %vm378_vm1, %v1887_v13, %v5756_v0  ;;  %v5063_v15 = vmul.f32 %v4413_v27, %v5051_v47 }
 0x235   :  { %v5031_v48 = vadd.f32 %v1513_v59, %v1431_v8  ;;  %2282 = vrot.lane.b32.xlu1 %v2278_v34, %s5799_s26  ;;  %v1897_v51 = vadd.f32 %v1889_v46, %v4897_v39  ;;  %v1865_v59 = vrot.slane %v1856_v49, 1  ;;  %v5760_v39 = vrot.slane %v5068_v32, 2  ;;  %v5091_v49 = vld [vmem:[#allocation7 + $0x50] sm:$0xff] }
 0x236   :  { %v5039_v52 = vpop.permute.xlu2 %1839  ;;  %v1973_v12 = vrot.slane %v1964_v62, 1  ;;  %v5757_v43 = vrot.slane %v5063_v15, 1  ;;  %v1438_v46 = vmul.f32 %v4634_v50, %v4426_v30  ;;  %v5108_v30 = vstv %s4397_s28  ;;  %s6006_s28 = smul.f32 0.0006510417, %s6005_s24 }
 0x237   :  { %v5042_v11 = vpop.permute.xlu1 %1706 }
 0x23a   :  { %1978 = vrot.lane.b32.xlu0 %v5989_v36, %s5799_s26 }
 0x23c   :  { %v1575_v34 = vpop.permute.xlu0 %1574  ;;  %2348 = vrot.lane.b32.xlu2 %v2344_v10, %s5808_s25  ;;  %v5990_v10 = vrot.slane %v4781_v19, 1  ;;  %v5095_v19 = vmul.f32 %v4413_v27, %v2333_v24 }
 0x23d   :  { %v5071_v23 = vadd.f32 %v1575_v34, %v4956_v38  ;;  %2317 = vrot.lane.b32.xlu1 %v5759_v40, %s5808_s25  ;;  %v5083_v38 = vld [vmem:[#allocation7 + $0x20] sm:$0xff] }
 0x23e   :  { %v1977_v8 = vpop.permute.xlu2 %1976  ;;  %v1975_v36 = vsel %vm378_vm1, %v1973_v12, %v5990_v10  ;;  %v2028_v34 = vmul.f32 %v5083_v38, %v4745_v55  ;;  %v1867_v55 = vsel %vm378_vm1, %v1865_v59, %v5757_v43  ;;  %v5105_v12 = vmul.f32 %v4413_v27, %v5022_v41 }
 0x23f   :  { %v5078_v13 = vadd.f32 %v1977_v8, %v1897_v51  ;;  %v1786_v62 = vpop.permute.xlu1 %1785  ;;  %v2336_v51 = vmul.f32 %v5091_v49, %v2333_v24  ;;  %v1447_v8 = vrot.slane %v1438_v46, 2 }
 0x240   :  { %v1795_v0 = vadd.f32 %v1786_v62, %v4831_v58  ;;  %v2303_v58 = vmul.f32 %v5091_v49, %v5022_v41  ;;  %v2036_v50 = vrot.slane %v2028_v34, 1  ;;  %v5122_v34 = vld [vmem:[#allocation7 + $0x28] sm:$0xff]  ;;  %s2707_s19 = spop %2706 }
 0x241   :  { %v2345_v62 = vrot.slane %v2336_v51, 2  ;;  %v5126_v43 = vmul.f32 %v5122_v34, %v5108_v30  ;;  %v5762_v51 = vrot.slane %v5105_v12, 2  ;;  %s5317_s1 = smul.f32 %s2707_s19, %s6006_s28 }
 0x242   :  { %1980 = vrot.lane.b32.xlu0 %v1975_v36, %s5799_s26  ;;  %v1874_v10 = vadd.f32 %v1867_v55, %v1795_v0  ;;  %v2346_v36 = vrot.slane %v5095_v19, 2  ;;  %v2312_v46 = vrot.slane %v2303_v58, 2  ;;  %v5993_v55 = vrot.slane %v4674_v14, 2 }
 0x243   :  { %v1913_v29 = vrot.slane %v5126_v43, 1  ;;  %v5152_v14 = vmul.f32 %v4413_v27, %v4973_v37  ;;  %s2416_s30 = smul.f32 %s5317_s1, %s2332_s6 }
 0x244   :  { %v1610_v24 = vpop.permute.xlu0 %1609  ;;  %2255 = vrot.lane.b32.xlu2 %v5760_v39, %s5799_s26  ;;  %v1449_v39 = vsel %vm652_vm2, %v1447_v8, %v5993_v55  ;;  %v2347_v58 = vsel %vm652_vm2, %v2345_v62, %v2346_v36  ;;  %s2404_s23 = smul.f32 %s5317_s1, %s2299_s29 }
 0x245   :  { %v5116_v59 = vadd.f32 %v1610_v24, %v4993_v6  ;;  %2222 = vrot.lane.b32.xlu1 %v2214_v3, %s5799_s26  ;;  %v5991_v6 = vld [vmem:[#allocation30_spill] sm:$0xff]  ;;  %v5992_v3 = vrot.slane %v4758_v1, 1  ;;  %s2417_s14 = ssub.f32 %s2692_s10, %s2416_s30 }
 0x246   :  { %v1948_v45 = vpop.permute.xlu2 %1947  ;;  %v1381_v24 = vadd.f32 %v5991_v6, %v4856_v61  ;;  %v2314_v61 = vsel %vm652_vm2, %v2312_v46, %v5762_v51 }
 0x247   :  { %v5131_v40 = vadd.f32 %v1948_v45, %v1874_v10  ;;  %v1838_v63 = vpop.permute.xlu1 %1837  ;;  %v2038_v0 = vsel %vm378_vm1, %v2036_v50, %v5992_v3  ;;  %v5147_v45 = vstv %s5110_s15  ;;  %v5764_v3 = vrot.slane %v5152_v14, 2 }
 0x248   :  { %v1848_v19 = vadd.f32 %v1838_v63, %v4865_v53  ;;  %v1456_v1 = vadd.f32 %v1449_v39, %v1381_v24  ;;  %v5161_v62 = vmul.f32 %v5122_v34, %v5147_v45  ;;  %v5165_v39 = vmul.f32 %v5122_v34, %v5051_v47 }
 0x249   :  { %v1997_v24 = vmul.f32 %v5091_v49, %v4692_v25 }
 0x24a   :  { %2042 = vrot.lane.b32.xlu0 %v2038_v0, %s5808_s25  ;;  %v1923_v8 = vadd.f32 %v1913_v29, %v1848_v19  ;;  %v5763_v0 = vrot.slane %v5161_v62, 2  ;;  %v5994_v19 = vld [vmem:[#allocation42_spill] sm:$0xff] }
 0x24b   :  { %v5995_v55 = vrot.slane %v5994_v19, 1 }
 0x24c   :  { %v1546_v50 = vpop.permute.xlu0 %1545  ;;  %2352 = vrot.lane.b32.xlu2 %v2347_v58, %s5808_s25  ;;  %v1863_v58 = vrot.slane %v5165_v39, 1  ;;  %v6011_v39 = vrot.slane %v5105_v12, 2 }
 0x24d   :  { %v5154_v53 = vadd.f32 %v1546_v50, %v1456_v1  ;;  %2319 = vrot.lane.b32.xlu1 %v2314_v61, %s5808_s25  ;;  %v1681_v61 = vmul.f32 %v5083_v38, %v4829_v2  ;;  %v2006_v1 = vrot.slane %v1997_v24, 1 }
 0x24e   :  { %v2012_v10 = vpop.permute.xlu2 %2011 }
 0x24f   :  { %v5167_v46 = vadd.f32 %v2012_v10, %v1923_v8  ;;  %v1815_v6 = vpop.permute.xlu1 %1814  ;;  %v1873_v10 = vadd.f32 %v1863_v58, %v5010_v17  ;;  %v1662_v17 = vmul.f32 %v4413_v27, %v4798_v57 }
 0x250   :  { %v1823_v63 = vadd.f32 %v1815_v6, %v4934_v21  ;;  %v5189_v21 = vmul.f32 %v4413_v27, %v5007_v5  ;;  %v1659_v27 = vmul.f32 %v5083_v38, %v4798_v57 }
 0x252   :  { %2077 = vrot.lane.b32.xlu0 %v5995_v55, %s5808_s25 }
 0x254   :  { %v1641_v50 = vpop.permute.xlu0 %1640  ;;  %2288 = vrot.lane.b32.xlu2 %v5764_v3, %s5799_s26 }
 0x255   :  { %v1652_v25 = vadd.f32 %v1641_v50, %v4917_v26  ;;  %2383 = vrot.lane.b32.xlu1 %v5763_v0, %s5808_s25  ;;  %v5996_v26 = vrot.slane %v4854_v60, 1  ;;  %v2094_v50 = vmul.f32 %v5083_v38, %v4847_v4  ;;  %v1891_v0 = vrot.slane %v5189_v21, 1 }
 0x256   :  { %v2076_v8 = vpop.permute.xlu2 %2075 }
 0x257   :  { %v1685_v6 = vadd.f32 %v1681_v61, %v1652_v25  ;;  %v5195_v24 = vadd.f32 %v2076_v8, %v5078_v13  ;;  %v1946_v19 = vpop.permute.xlu1 %1945  ;;  %v2008_v55 = vsel %vm378_vm1, %v2006_v1, %v5996_v26  ;;  %v2102_v13 = vrot.slane %v2094_v50, 1 }
 0x258   :  { %v1956_v51 = vadd.f32 %v1946_v19, %v1873_v10  ;;  %v1900_v4 = vadd.f32 %v1891_v0, %v1823_v63  ;;  %v5997_v10 = vrot.slane %v4861_v56, 1 }
 0x259   :  { %v5204_v3 = vadd.f32 %v4968_v9, %v1685_v6 }
 0x25a   :  { %2013 = vrot.lane.b32.xlu0 %v2008_v55, %s5799_s26  ;;  %v2104_v6 = vsel %vm378_vm1, %v2102_v13, %v5997_v10  ;;  %v5226_v55 = vld [vmem:[#allocation7 + $0x58] sm:$0xff] }
 0x25b   :  { %v5230_v56 = vmul.f32 %v5226_v55, %v5108_v30 }
 0x25c   :  { %v1581_v61 = vpop.permute.xlu0 %1580 }
 0x25d   :  { %v1589_v60 = vadd.f32 %v1581_v61, %v4951_v18  ;;  %2354 = vrot.lane.b32.xlu1 %v2346_v36, %s5808_s25  ;;  %v1663_v36 = vadd.f32 %v1659_v27, %v5071_v23  ;;  %v1916_v23 = vrot.slane %v5230_v56, 1  ;;  %v6000_v27 = vrot.slane %v4923_v42, 2 }
 0x25e   :  { %v1983_v1 = vpop.permute.xlu2 %1982  ;;  %v2237_v42 = vmul.f32 %v5091_v49, %v4894_v33 }
 0x25f   :  { %v1666_v25 = vadd.f32 %v1662_v17, %v1589_v60  ;;  %v5213_v8 = vadd.f32 %v1983_v1, %v1900_v4  ;;  %v1842_v9 = vpop.permute.xlu1 %1841  ;;  %v5998_v17 = vrot.slane %v4813_v28, 1 }
 0x260   :  { %v1850_v19 = vadd.f32 %v1842_v9, %v5001_v7  ;;  %v1671_v7 = vmul.f32 %v5122_v34, %v4765_v20  ;;  %v5999_v9 = vld [vmem:[#allocation23_spill] sm:$0xff] }
 0x261   :  { %v5222_v18 = vadd.f32 %v5042_v11, %v1666_v25  ;;  %v2202_v11 = vmul.f32 %v5083_v38, %v4914_v16  ;;  %v1621_v10 = vadd.f32 %v5999_v9, %v5031_v48  ;;  %v2301_v9 = vmul.f32 %v5083_v38, %v5022_v41 }
 0x262   :  { %2108 = vrot.lane.b32.xlu0 %v2104_v6, %s5808_s25  ;;  %v1675_v13 = vadd.f32 %v1671_v7, %v5116_v59  ;;  %v1925_v1 = vadd.f32 %v1916_v23, %v1850_v19  ;;  %v1672_v59 = vmul.f32 %v5091_v49, %v4765_v20  ;;  %v2246_v20 = vrot.slane %v2237_v42, 2 }
 0x263   :  { %v2210_v61 = vrot.slane %v2202_v11, 2  ;;  %v2309_v33 = vrot.slane %v2301_v9, 2  ;;  %v6004_v41 = vrot.slane %v5037_v54, 2  ;;  %v5304_v54 = vstv %s4499_s22  ;;  %s2693_s22 = sld [smem:[#allocation5 + $0x2]] }
 0x264   :  { %v1701_v63 = vpop.permute.xlu0 %1700  ;;  %v2270_v9 = vmul.f32 %v5091_v49, %v4973_v37 }
 0x265   :  { %v1712_v26 = vadd.f32 %v1701_v63, %v1663_v36  ;;  %v2212_v28 = vsel %vm652_vm2, %v2210_v61, %v6000_v27  ;;  %v1676_v63 = vadd.f32 %v1672_v59, %v1621_v10 }
 0x266   :  { %v5232_v50 = vpop.permute.xlu2 %2079 }
 0x267   :  { %v5234_v57 = vpop.permute.xlu1 %2009 }
 0x26a   :  { %2048 = vrot.lane.b32.xlu0 %v5998_v17, %s5808_s25  ;;  %v6001_v17 = vrot.slane %v4911_v22, 2 }
 0x26c   :  { %v1730_v60 = vpop.permute.xlu0 %1729 }
 0x26d   :  { %v1740_v4 = vadd.f32 %v1730_v60, %v1675_v13 }
 0x26e   :  { %v2016_v25 = vpop.permute.xlu2 %2015 }
 0x26f   :  { %v5249_v6 = vadd.f32 %v2016_v25, %v1925_v1  ;;  %v2045_v16 = vpop.permute.xlu1 %2044  ;;  %v6002_v1 = vrot.slane %v5068_v32, 2  ;;  %v6003_v32 = vld [vmem:[#allocation31_spill] sm:$0xff] }
 0x270   :  { %v2055_v36 = vadd.f32 %v2045_v16, %v1956_v51  ;;  %v5280_v16 = vstv %s4510_s0 }
 0x271   :  { %v2248_v25 = vsel %vm652_vm2, %v2246_v20, %v6002_v1  ;;  %v5323_v1 = vmul.f32 %v5122_v34, %v5304_v54 }
 0x272   :  { %2216 = vrot.lane.b32.xlu0 %v2212_v28, %s5799_s26  ;;  %v1654_v28 = vadd.f32 %v6003_v32, %v5154_v53  ;;  %v6007_v32 = vrot.slane %v5017_v35, 2 }
 0x274   :  { %v1732_v7 = vpop.permute.xlu0 %1731 }
 0x275   :  { %v5257_v19 = vadd.f32 %v1732_v7, %v1676_v63  ;;  %v1683_v63 = vmul.f32 %v5091_v49, %v4829_v2  ;;  %v5297_v7 = vmul.f32 %v5122_v34, %v5280_v16 }
 0x276   :  { %v5259_v11 = vpop.permute.xlu2 %2112 }
 0x277   :  { %v5261_v48 = vpop.permute.xlu1 %1949  ;;  %v1687_v42 = vadd.f32 %v1683_v63, %v1654_v28  ;;  %v2161_v20 = vrot.slane %v5297_v7, 2  ;;  %v2136_v28 = vrot.slane %v5323_v1, 2 }
 0x279   :  { %v2146_v35 = vadd.f32 %v2136_v28, %v2055_v36  ;;  %v1854_v36 = vmul.f32 %v5083_v38, %v5051_v47 }
 0x27a   :  { %2251 = vrot.lane.b32.xlu0 %v6001_v17, %s5799_s26 }
 0x27c   :  { %v1782_v51 = vpop.permute.xlu0 %1781 }
 0x27d   :  { %v5268_v13 = vadd.f32 %v1782_v51, %v1712_v26  ;;  %v1904_v51 = vmul.f32 %v5083_v38, %v5108_v30 }
 0x27e   :  { %v2250_v61 = vpop.permute.xlu2 %2249 }
 0x27f   :  { %v2047_v60 = vpop.permute.xlu1 %2046 }
 0x280   :  { %v5276_v10 = vadd.f32 %v2047_v60, %v5131_v40  ;;  %v2311_v40 = vsel %vm652_vm2, %v2309_v33, %v6004_v41  ;;  %v2279_v41 = vrot.slane %v2270_v9, 2  ;;  %v2367_v9 = vmul.f32 %v5083_v38, %v5147_v45 }
 0x282   :  { %2253 = vrot.lane.b32.xlu0 %v2248_v25, %s5799_s26 }
 0x284   :  { %v1811_v22 = vpop.permute.xlu0 %1810 }
 0x285   :  { %v5282_v26 = vadd.f32 %v1811_v22, %v1740_v4  ;;  %v2152_v4 = vmul.f32 %v5083_v38, %v5280_v16  ;;  %v1912_v22 = vrot.slane %v1904_v51, 1 }
 0x286   :  { %v5284_v27 = vpop.permute.xlu2 %2220 }
 0x287   :  { %v2111_v59 = vpop.permute.xlu1 %2110  ;;  %v2160_v17 = vrot.slane %v2152_v4, 2 }
 0x288   :  { %v5300_v53 = vadd.f32 %v2111_v59, %v5167_v46 }
 0x289   :  { %v2162_v33 = vsel %vm652_vm2, %v2160_v17, %v2161_v20 }
 0x28a   :  { %2315 = vrot.lane.b32.xlu0 %v2311_v40, %s5808_s25  ;;  %v2170_v59 = vadd.f32 %v2162_v33, %v5195_v24  ;;  %v1914_v40 = vsel %vm378_vm1, %v1912_v22, %v1913_v29  ;;  %v2369_v24 = vmul.f32 %v5091_v49, %v5147_v45 }
 0x28c   :  { %v1759_v2 = vpop.permute.xlu0 %1758  ;;  %v2261_v63 = vadd.f32 %v2250_v61, %v2170_v59  ;;  %v6008_v61 = vrot.slane %v5152_v14, 2 }
 0x28d   :  { %v5309_v60 = vadd.f32 %v1759_v2, %v1687_v42  ;;  %v5342_v42 = vstv %s2707_s19  ;;  %v2370_v2 = vmul.f32 %v5226_v55, %v5147_v45  ;;  %v2375_v45 = vrot.slane %v2367_v9, 2  ;;  %s6013_s19 = sld [smem:[#allocation75_spill]] }
 0x28e   :  { %v5319_v46 = vpop.permute.xlu2 %2284 }
 0x28f   :  { %v5325_v25 = vpop.permute.xlu1 %2081  ;;  %v2379_v22 = vrot.slane %v2370_v2, 2  ;;  %v6010_v2 = vrot.slane %v5161_v62, 2 }
 0x292   :  { %2350 = vrot.lane.b32.xlu0 %v6007_v32, %s5808_s25  ;;  %v2378_v32 = vrot.slane %v2369_v24, 2  ;;  %v2377_v24 = vsel %vm652_vm2, %v2375_v45, %v6010_v2 }
 0x294   :  { %v1836_v37 = vpop.permute.xlu0 %1835  ;;  %v2380_v14 = vsel %vm652_vm2, %v2378_v32, %v2379_v22 }
 0x295   :  { %v1847_v4 = vadd.f32 %v1836_v37, %v5204_v3  ;;  %v2281_v3 = vsel %vm652_vm2, %v2279_v41, %v6008_v61  ;;  %2385 = vrot.lane.b32.xlu2 %v2380_v14, %s5808_s25 }
 0x296   :  { %v2349_v17 = vpop.permute.xlu2 %2348 }
 0x297   :  { %v1922_v43 = vadd.f32 %v1914_v40, %v1847_v4  ;;  %v2360_v51 = vadd.f32 %v2349_v17, %v2261_v63  ;;  %v2219_v29 = vpop.permute.xlu1 %2218  ;;  %v5361_v40 = vstv %s2417_s14  ;;  %v1862_v63 = vrot.slane %v1854_v36, 1 }
 0x298   :  { %v2229_v33 = vadd.f32 %v2219_v29, %v2146_v35  ;;  %v6009_v4 = vrot.slane %v5063_v15, 1  ;;  %v1822_v36 = vadd.f32 %v4962_v44, %v5257_v19 }
 0x299   :  { %v2411_v59 = vmul.f32 %v5342_v42, %v2360_v51  ;;  %v5359_v37 = vadd.f32 %v5234_v57, %v1922_v43  ;;  %v1864_v51 = vsel %vm378_vm1, %v1862_v63, %v1863_v58  ;;  %v6012_v58 = vrot.slane %v5028_v31, 1 }
 0x29a   :  { %2286 = vrot.lane.b32.xlu0 %v2281_v3, %s5799_s26  ;;  %v1872_v15 = vadd.f32 %v1864_v51, %v5268_v13  ;;  %s2402_s26 = sld [smem:[#allocation5]]  ;;  %v5412_v31 = vmul.f32 %v5226_v55, %v5304_v54 }
 0x29b   :  { %v5366_v41 = vadd.f32 %v5361_v40, %v2411_v59  ;;  %v2129_v59 = vmul.f32 %v5091_v49, %v5304_v54 }
 0x29c   :  { %v1788_v47 = vpop.permute.xlu0 %1787  ;;  %v2139_v14 = vrot.slane %v5412_v31, 2 }
 0x29d   :  { %v1796_v57 = vadd.f32 %v1788_v47, %v5222_v18 }
 0x29f   :  { %v1875_v17 = vadd.f32 %v6009_v4, %v1796_v57  ;;  %v2115_v35 = vpop.permute.xlu1 %2114  ;;  %v5428_v57 = vstv %s4516_s21 }
 0x2a0   :  { %v5376_v43 = vadd.f32 %v2115_v35, %v5249_v6  ;;  %v1881_v6 = vmul.f32 %v5091_v49, %v5007_v5  ;;  %s2405_s4 = ssub.f32 %s2402_s26, %s2404_s23  ;;  %v5433_v4 = vmul.f32 %v5122_v34, %v5428_v57 }
 0x2a1   :  { %v5382_v29 = vadd.f32 %v5261_v48, %v1875_v17  ;;  %v1898_v48 = vadd.f32 %v6012_v58, %v5282_v26 }
 0x2a2   :  { %2381 = vrot.lane.b32.xlu0 %v2377_v24, %s5808_s25  ;;  %v1890_v3 = vrot.slane %v1881_v6, 1  ;;  %v5416_v44 = vstv %s2405_s4  ;;  %v2186_v51 = vrot.slane %v5433_v4, 2 }
 0x2a4   :  { %v1944_v18 = vpop.permute.xlu0 %1943  ;;  %v1892_v12 = vsel %vm378_vm1, %v1890_v3, %v1891_v0  ;;  %v2196_v34 = vadd.f32 %v2186_v51, %v5300_v53 }
 0x2a5   :  { %v1955_v61 = vadd.f32 %v1944_v18, %v1872_v15  ;;  %v1899_v19 = vadd.f32 %v1892_v12, %v1822_v36  ;;  %v1906_v18 = vmul.f32 %v5091_v49, %v5108_v30  ;;  %v1849_v30 = vadd.f32 %v5039_v52, %v5309_v60 }
 0x2a6   :  { %v2295_v58 = vadd.f32 %v5319_v46, %v2196_v34 }
 0x2a7   :  { %v5390_v62 = vpop.permute.xlu1 %2282 }
 0x2aa   :  { %2321 = vrot.lane.b32.xlu0 %v6011_v39, %s5808_s25  ;;  %v1915_v39 = vrot.slane %v1906_v18, 1 }
 0x2ac   :  { %v1979_v13 = vpop.permute.xlu0 %1978  ;;  %v1917_v36 = vsel %vm378_vm1, %v1915_v39, %v1916_v23 }
 0x2ad   :  { %v5401_v9 = vadd.f32 %v1979_v13, %v1898_v48  ;;  %v2090_v13 = vadd.f32 %v5325_v25, %v5213_v8  ;;  %v1924_v46 = vadd.f32 %v1917_v36, %v1849_v30 }
 0x2af   :  { %v2318_v32 = vpop.permute.xlu1 %2317 }
 0x2b0   :  { %v2328_v5 = vadd.f32 %v2318_v32, %v2229_v33  ;;  %v2138_v33 = vrot.slane %v2129_v59, 2 }
 0x2b2   :  { %v2399_v26 = vmul.f32 %v5342_v42, %v2328_v5  ;;  %2387 = vrot.lane.b32.xlu0 %v2379_v22, %s5808_s25  ;;  %v2140_v63 = vsel %vm652_vm2, %v2138_v33, %v2139_v14  ;;  %s2365_s25 = sadd.f32 %s5110_s15, %s2266_s13  ;;  %v2256_v5 = vpop.permute.xlu2 %2255 }
 0x2b3   :  { %v2147_v22 = vadd.f32 %v2140_v63, %v5276_v10 }
 0x2b4   :  { %v5419_v21 = vadd.f32 %v5416_v44, %v2399_v26  ;;  %v1981_v0 = vpop.permute.xlu0 %1980  ;;  %s2428_s0 = smul.f32 %s5317_s1, %s2365_s25 }
 0x2b5   :  { %v1990_v45 = vadd.f32 %v1981_v0, %v1899_v19  ;;  %v2230_v2 = vadd.f32 %v5284_v27, %v2147_v22 }
 0x2b6   :  { %s2429_s21 = ssub.f32 %s2693_s22, %s2428_s0 }
 0x2b7   :  { %v5422_v47 = vpop.permute.xlu1 %2222  ;;  %v2089_v18 = vadd.f32 %v5232_v50, %v1990_v45 }
 0x2b8   :  { %v5462_v12 = vstv %s2429_s21 }
 0x2ba   :  { %v2353_v30 = vpop.permute.xlu2 %2352 }
 0x2bc   :  { %v2043_v17 = vpop.permute.xlu0 %2042 }
 0x2bd   :  { %v2054_v35 = vadd.f32 %v2043_v17, %v1955_v61  ;;  %v2155_v61 = vmul.f32 %v5226_v55, %v5280_v16 }
 0x2bf   :  { %v2320_v24 = vpop.permute.xlu1 %2319  ;;  %v2164_v3 = vrot.slane %v2155_v61, 2 }
 0x2c0   :  { %v2329_v15 = vadd.f32 %v2320_v24, %v2230_v2  ;;  %v2154_v2 = vmul.f32 %v5091_v49, %v5280_v16 }
 0x2c1   :  { %v2173_v59 = vadd.f32 %v2164_v3, %v2090_v13 }
 0x2c2   :  { %v2400_v10 = vmul.f32 %v5342_v42, %v2329_v15  ;;  %v2163_v15 = vrot.slane %v2154_v2, 2 }
 0x2c3   :  { %v2264_v19 = vadd.f32 %v2256_v5, %v2173_v59 }
 0x2c4   :  { %v5451_v27 = vadd.f32 %v5416_v44, %v2400_v10  ;;  %v2078_v6 = vpop.permute.xlu0 %2077  ;;  %v2165_v10 = vsel %vm652_vm2, %v2163_v15, %v2164_v3 }
 0x2c5   :  { %v2172_v61 = vadd.f32 %v2165_v10, %v2089_v18  ;;  %v2088_v45 = vadd.f32 %v2078_v6, %v5401_v9  ;;  %v2177_v9 = vmul.f32 %v5083_v38, %v5428_v57 }
 0x2c7   :  { %v2384_v48 = vpop.permute.xlu1 %2383  ;;  %v2171_v1 = vadd.f32 %v2161_v20, %v2088_v45  ;;  %v2185_v7 = vrot.slane %v2177_v9, 2 }
 0x2c8   :  { %v2394_v53 = vadd.f32 %v2384_v48, %v2295_v58 }
 0x2ca   :  { %v2424_v32 = vmul.f32 %v5342_v42, %v2394_v53 }
 0x2cc   :  { %v5465_v26 = vadd.f32 %v5462_v12, %v2424_v32  ;;  %v2014_v52 = vpop.permute.xlu0 %2013  ;;  %v2179_v32 = vmul.f32 %v5091_v49, %v5428_v57 }
 0x2cd   :  { %v2023_v60 = vadd.f32 %v2014_v52, %v1924_v46  ;;  %v2289_v46 = vpop.permute.xlu2 %2288 }
 0x2ce   :  { %v2188_v59 = vrot.slane %v2179_v32, 2  ;;  %v2471_v32 = vsel %vm2437_vm7, %v5465_v26, 0.0 }
 0x2cf   :  { %v2122_v8 = vadd.f32 %v5259_v11, %v2023_v60  ;;  %v2355_v25 = vpop.permute.xlu1 %2354  ;;  %v2127_v11 = vmul.f32 %v5083_v38, %v5304_v54 }
 0x2d0   :  { %v2363_v0 = vadd.f32 %v2355_v25, %v2264_v19  ;;  %v2187_v25 = vsel %vm652_vm2, %v2185_v7, %v2186_v51 }
 0x2d1   :  { %v2135_v34 = vrot.slane %v2127_v11, 2 }
 0x2d2   :  { %v2414_v56 = vmul.f32 %v5342_v42, %v2363_v0 }
 0x2d4   :  { %v5470_v23 = vadd.f32 %v5361_v40, %v2414_v56  ;;  %v2109_v33 = vpop.permute.xlu0 %2108 }
 0x2d5   :  { %v2120_v63 = vadd.f32 %v2109_v33, %v5359_v37  ;;  %v2137_v37 = vsel %vm652_vm2, %v2135_v34, %v2136_v28 }
 0x2d6   :  { %v2145_v16 = vadd.f32 %v2137_v37, %v2054_v35  ;;  %v2180_v35 = vmul.f32 %v5226_v55, %v5428_v57  ;;  %v2453_v55 = vsel %vm2435_vm6, %v5366_v41, 0.0  ;;  %v2458_v11 = vsel %vm2437_vm7, %v5470_v23, 0.0 }
 0x2d8   :  { %v2189_v60 = vrot.slane %v2180_v35, 2 }
 0x2da   :  { %v2190_v20 = vsel %vm652_vm2, %v2188_v59, %v2189_v60  ;;  %v2198_v31 = vadd.f32 %v2189_v60, %v5376_v43 }
 0x2db   :  { %v2197_v57 = vadd.f32 %v2190_v20, %v2122_v8 }
 0x2dc   :  { %v2049_v22 = vpop.permute.xlu0 %2048 }
 0x2dd   :  { %v2057_v4 = vadd.f32 %v2049_v22, %v5382_v29  ;;  %v2438_v22 = vsel %vm2437_vm7, %v5419_v21, 0.0 }
 0x2e4   :  { %v2217_v17 = vpop.permute.xlu0 %2216 }
 0x2e5   :  { %v2228_v53 = vadd.f32 %v2217_v17, %v2145_v16 }
 0x2ec   :  { %v2252_v24 = vpop.permute.xlu0 %2251 }
 0x2ed   :  { %v2262_v5 = vadd.f32 %v2252_v24, %v2171_v1  ;;  %v2195_v24 = vadd.f32 %v2187_v25, %v2120_v63  ;;  %v2148_v63 = vadd.f32 %v2139_v14, %v2057_v4  ;;  %v2440_v14 = vsel %vm2435_vm6, %v5451_v27, 0.0 }
 0x2ef   :  { %v2386_v33 = vpop.permute.xlu2 %2385  ;;  %v2294_v10 = vadd.f32 %v5390_v62, %v2195_v24  ;;  %v2231_v37 = vadd.f32 %v5422_v47, %v2148_v63 }
 0x2f4   :  { %v2254_v39 = vpop.permute.xlu0 %2253 }
 0x2f5   :  { %v2263_v58 = vadd.f32 %v2254_v39, %v2172_v61 }
 0x2f7   :  { %v2362_v48 = vadd.f32 %v2353_v30, %v2263_v58 }
 0x2f9   :  { %v2413_v13 = vmul.f32 %v5342_v42, %v2362_v48 }
 0x2fb   :  { %v5484_v54 = vadd.f32 %v5361_v40, %v2413_v13 }
 0x2fc   :  { %v2316_v50 = vpop.permute.xlu0 %2315 }
 0x2fd   :  { %v2327_v3 = vadd.f32 %v2316_v50, %v2228_v53  ;;  %v2297_v50 = vadd.f32 %v2289_v46, %v2198_v31 }
 0x2ff   :  { %v2398_v36 = vmul.f32 %v5342_v42, %v2327_v3 }
 0x301   :  { %v5493_v28 = vadd.f32 %v5416_v44, %v2398_v36 }
 0x303   :  { %v2436_v30 = vsel %vm2435_vm6, %v5493_v28, 0.0 }
 0x304   :  { %v2351_v6 = vpop.permute.xlu0 %2350  ;;  %v2439_v62 = vadd.f32 %v2438_v22, %v2436_v30 }
 0x305   :  { %v2361_v52 = vadd.f32 %v2351_v6, %v2262_v5 }
 0x306   :  { %v2441_v53 = vadd.f32 %v2440_v14, %v2439_v62 }
 0x307   :  { %v2412_v49 = vmul.f32 %v5342_v42, %v2361_v52 }
 0x309   :  { %v5502_v19 = vadd.f32 %v5361_v40, %v2412_v49  ;;  %v2456_v40 = vsel %vm2435_vm6, %v5484_v54, 0.0 }
 0x30b   :  { %v2454_v38 = vsel %vm2437_vm7, %v5502_v19, 0.0 }
 0x30c   :  { %v2455_v0 = vadd.f32 %v2454_v38, %v2453_v55  ;;  %v2287_v56 = vpop.permute.xlu0 %2286 }
 0x30d   :  { %v2296_v17 = vadd.f32 %v2287_v56, %v2197_v57 }
 0x30e   :  { %v2457_v2 = vadd.f32 %v2456_v40, %v2455_v0 }
 0x30f   :  { %v2395_v15 = vadd.f32 %v2386_v33, %v2296_v17 }
 0x310   :  { %v2459_v18 = vadd.f32 %v2458_v11, %v2457_v2 }
 0x311   :  { %v2425_v8 = vmul.f32 %v5342_v42, %v2395_v15 }
 0x312   :  { %2460 = vadd.xlane.f32.xlu2 %v2459_v18 }
 0x313   :  { %v5518_v51 = vadd.f32 %v5462_v12, %v2425_v8 }
 0x314   :  { %v2382_v34 = vpop.permute.xlu0 %2381 }
 0x315   :  { %v2393_v61 = vadd.f32 %v2382_v34, %v2294_v10 }
 0x317   :  { %v2423_v39 = vmul.f32 %v5342_v42, %v2393_v61 }
 0x319   :  { %v2431_v58 = vadd.f32 %v5462_v12, %v2423_v39 }
 0x31b   :  { %v2470_v47 = vsel %vm2435_vm6, %v2431_v58, 0.0 }
 0x31c   :  { %v2322_v29 = vpop.permute.xlu0 %2321  ;;  %v2472_v43 = vadd.f32 %v2471_v32, %v2470_v47 }
 0x31d   :  { %v2330_v48 = vadd.f32 %v2322_v29, %v2231_v37 }
 0x31f   :  { %v2401_v16 = vmul.f32 %v5342_v42, %v2330_v48 }
 0x321   :  { %v5535_v13 = vadd.f32 %v5416_v44, %v2401_v16  ;;  %v2473_v44 = vsel %vm2435_vm6, %v5518_v51, 0.0 }
 0x322   :  { %v2474_v46 = vadd.f32 %v2473_v44, %v2472_v43 }
 0x323   :  { %v2442_v45 = vsel %vm2437_vm7, %v5535_v13, 0.0 }
 0x324   :  { %v2388_v3 = vpop.permute.xlu0 %2387  ;;  %v2443_v36 = vadd.f32 %v2442_v45, %v2441_v53 }
 0x325   :  { %v2396_v1 = vadd.f32 %v2388_v3, %v2297_v50 }
 0x326   :  { %2444 = vadd.xlane.f32.xlu1 %v2443_v36 }
 0x327   :  { %v2426_v35 = vmul.f32 %v5342_v42, %v2396_v1 }
 0x329   :  { %v2434_v5 = vadd.f32 %v5462_v12, %v2426_v35 }
 0x32b   :  { %v2475_v9 = vsel %vm2437_vm7, %v2434_v5, 0.0 }
 0x32c   :  { %v2476_v6 = vadd.f32 %v2475_v9, %v2474_v46 }
 0x32e   :  { %2477 = vadd.xlane.f32.xlu0 %v2476_v6 }
 0x385   :  { %v2461_v59 = vpop.xlane.xlu2 %2460 }
 0x386   :  { %v2462_v52 = vrot.slane %v2461_v59, 4 }
 0x388   :  { %v2463_v60 = vadd.f32 %v2462_v52, %v2461_v59 }
 0x38a   :  { %v2464_v49 = vrot.slane %v2463_v60, 2 }
 0x38c   :  { %v2465_v38 = vadd.f32 %v2464_v49, %v2463_v60 }
 0x38e   :  { %v2466_v0 = vrot.slane %v2465_v38, 1 }
 0x390   :  { %v2467_v40 = vadd.f32 %v2466_v0, %v2465_v38 }
 0x399   :  { %v2445_v7 = vpop.xlane.xlu1 %2444 }
 0x39a   :  { %v2446_v20 = vrot.slane %v2445_v7, 4 }
 0x39c   :  { %v2447_v55 = vadd.f32 %v2446_v20, %v2445_v7 }
 0x39e   :  { %v2448_v57 = vrot.slane %v2447_v55, 2 }
 0x3a0   :  { %v2449_v42 = vadd.f32 %v2448_v57, %v2447_v55 }
 0x3a1   :  { %v2478_v25 = vpop.xlane.xlu0 %2477 }
 0x3a2   :  { %v2479_v56 = vrot.slane %v2478_v25, 4  ;;  %v2450_v33 = vrot.slane %v2449_v42, 1 }
 0x3a4   :  { %v2480_v12 = vadd.f32 %v2479_v56, %v2478_v25  ;;  %v2451_v17 = vadd.f32 %v2450_v33, %v2449_v42 }
 0x3a6   :  { %v2481_v2 = vrot.slane %v2480_v12, 2  ;;  %2708 = vpush %v2451_v17 }
 0x3a7   :  { %2710 = vpush %v2467_v40 }
 0x3a8   :  { %v2482_v24 = vadd.f32 %v2481_v2, %v2480_v12 }
 0x3aa   :  { %v2483_v15 = vrot.slane %v2482_v24, 1 }
 0x3ac   :  { %v2484_v11 = vadd.f32 %v2483_v15, %v2482_v24 }
 0x3ae   :  { %2712 = vpush %v2484_v11 }
 0x3d7   :  { %s2709_s2 = spop %2708 }
 0x3d8   :  { %s2711_s16 = spop %2710 }
 0x3d9   :  { %s2469_s8 = sadd.f32 %s2711_s16, %s2709_s2 }
 0x3df   :  { %s2713_s11 = spop %2712 }
 0x3e0   :  { %s2486_s12 = sadd.f32 %s2713_s11, %s2469_s8 }
 0x3e2   :  { %s2487_s7 = smul.f32 0.0008503401, %s2486_s12 }
 0x3e4   :  { %v2488_v18 = vstv %s2487_s7 }
 0x3e5   :  { %v5547_v8 = vsub.f32 %v2431_v58, %v2488_v18  ;;  %v5550_v4 = vsub.f32 %v5465_v26, %v2488_v18  ;;  %v5553_v10 = vsub.f32 %v5518_v51, %v2488_v18  ;;  %v5555_v34 = vsub.f32 %v2434_v5, %v2488_v18 }
 0x3e6   :  { %v5558_v61 = vsub.f32 %v5366_v41, %v2488_v18  ;;  %v5561_v63 = vsub.f32 %v5502_v19, %v2488_v18  ;;  %v5564_v39 = vsub.f32 %v5484_v54, %v2488_v18  ;;  %v5567_v58 = vsub.f32 %v5470_v23, %v2488_v18 }
 0x3e7   :  { %v2543_v26 = vmul.f32 %v5547_v8, %v5547_v8  ;;  %v2544_v51 = vmul.f32 %v5550_v4, %v5550_v4  ;;  %v2545_v30 = vmul.f32 %v5553_v10, %v5553_v10  ;;  %v2546_v23 = vmul.f32 %v5555_v34, %v5555_v34 }
 0x3e8   :  { %v2518_v41 = vmul.f32 %v5558_v61, %v5558_v61  ;;  %v2519_v19 = vmul.f32 %v5561_v63, %v5561_v63  ;;  %v2520_v54 = vmul.f32 %v5564_v39, %v5564_v39  ;;  %v2521_v48 = vmul.f32 %v5567_v58, %v5567_v58 }
 0x3e9   :  { %v2547_v37 = vsel %vm2435_vm6, %v2543_v26, 0.0  ;;  %v2548_v29 = vsel %vm2437_vm7, %v2544_v51, 0.0  ;;  %v2550_v31 = vsel %vm2435_vm6, %v2545_v30, 0.0  ;;  %v5591_v53 = vsub.f32 %v5493_v28, %v2488_v18 }
 0x3ea   :  { %v2549_v22 = vadd.f32 %v2548_v29, %v2547_v37  ;;  %v2522_v62 = vsel %vm2435_vm6, %v2518_v41, 0.0  ;;  %v2523_v16 = vsel %vm2437_vm7, %v2519_v19, 0.0  ;;  %v5594_v50 = vsub.f32 %v5419_v21, %v2488_v18 }
 0x3eb   :  { %v2524_v14 = vadd.f32 %v2523_v16, %v2522_v62  ;;  %v2525_v45 = vsel %vm2435_vm6, %v2520_v54, 0.0  ;;  %v5598_v3 = vsub.f32 %v5451_v27, %v2488_v18  ;;  %v5601_v36 = vsub.f32 %v5535_v13, %v2488_v18 }
 0x3ec   :  { %v2551_v47 = vadd.f32 %v2550_v31, %v2549_v22  ;;  %v2552_v32 = vsel %vm2437_vm7, %v2546_v23, 0.0  ;;  %v2493_v43 = vmul.f32 %v5591_v53, %v5591_v53  ;;  %v2494_v28 = vmul.f32 %v5594_v50, %v5594_v50 }
 0x3ed   :  { %v2526_v1 = vadd.f32 %v2525_v45, %v2524_v14  ;;  %v2527_v35 = vsel %vm2437_vm7, %v2521_v48, 0.0  ;;  %v2495_v44 = vmul.f32 %v5598_v3, %v5598_v3  ;;  %v2496_v13 = vmul.f32 %v5601_v36, %v5601_v36 }
 0x3ee   :  { %v2553_v21 = vadd.f32 %v2552_v32, %v2551_v47  ;;  %v2497_v5 = vsel %vm2435_vm6, %v2493_v43, 0.0  ;;  %v2498_v46 = vsel %vm2437_vm7, %v2494_v28, 0.0 }
 0x3ef   :  { %v2528_v27 = vadd.f32 %v2527_v35, %v2526_v1  ;;  %v2499_v9 = vadd.f32 %v2498_v46, %v2497_v5  ;;  %v2500_v6 = vsel %vm2435_vm6, %v2495_v44, 0.0  ;;  %v2502_v52 = vsel %vm2437_vm7, %v2496_v13, 0.0 }
 0x3f0   :  { %2554 = vadd.xlane.f32.xlu0 %v2553_v21 }
 0x3f1   :  { %2529 = vadd.xlane.f32.xlu1 %v2528_v27  ;;  %v2501_v59 = vadd.f32 %v2500_v6, %v2499_v9 }
 0x3f3   :  { %v2503_v60 = vadd.f32 %v2502_v52, %v2501_v59 }
 0x3f5   :  { %2504 = vadd.xlane.f32.xlu2 %v2503_v60 }
 0x463   :  { %v2555_v49 = vpop.xlane.xlu0 %2554 }
 0x464   :  { %v2556_v7 = vrot.slane %v2555_v49, 4  ;;  %v2530_v20 = vpop.xlane.xlu1 %2529 }
 0x465   :  { %v2531_v55 = vrot.slane %v2530_v20, 4 }
 0x466   :  { %v2557_v38 = vadd.f32 %v2556_v7, %v2555_v49 }
 0x467   :  { %v2532_v57 = vadd.f32 %v2531_v55, %v2530_v20 }
 0x468   :  { %v2558_v42 = vrot.slane %v2557_v38, 2  ;;  %v2505_v0 = vpop.xlane.xlu2 %2504 }
 0x469   :  { %v2533_v25 = vrot.slane %v2532_v57, 2  ;;  %v2506_v56 = vrot.slane %v2505_v0, 4 }
 0x46a   :  { %v2559_v12 = vadd.f32 %v2558_v42, %v2557_v38 }
 0x46b   :  { %v2534_v33 = vadd.f32 %v2533_v25, %v2532_v57  ;;  %v2507_v17 = vadd.f32 %v2506_v56, %v2505_v0 }
 0x46c   :  { %v2560_v15 = vrot.slane %v2559_v12, 1 }
 0x46d   :  { %v2508_v40 = vrot.slane %v2507_v17, 2  ;;  %v2535_v2 = vrot.slane %v2534_v33, 1 }
 0x46e   :  { %v2561_v51 = vadd.f32 %v2560_v15, %v2559_v12 }
 0x46f   :  { %v2509_v24 = vadd.f32 %v2508_v40, %v2507_v17  ;;  %v2536_v18 = vadd.f32 %v2535_v2, %v2534_v33 }
 0x471   :  { %v2510_v11 = vrot.slane %v2509_v24, 1 }
 0x473   :  { %v2511_v26 = vadd.f32 %v2510_v11, %v2509_v24 }
 0x475   :  { %2714 = vpush %v2511_v26 }
 0x476   :  { %2716 = vpush %v2536_v18 }
 0x477   :  { %2718 = vpush %v2561_v51 }
 0x4a6   :  { %s2715_s9 = spop %2714 }
 0x4a7   :  { %s2717_s27 = spop %2716 }
 0x4a8   :  { %s2538_s13 = sadd.f32 %s2717_s27, %s2715_s9  ;;  %s2719_s18 = spop %2718 }
 0x4aa   :  { %s2563_s3 = sadd.f32 %s2719_s18, %s2538_s13 }
 0x4ac   :  { %s2564_s20 = smul.f32 0.0008503401, %s2563_s3 }
 0x4ae   :  { %s2565_s5 = sadd.f32 1e-05, %s2564_s20 }
 0x4b0   :  { %v2566_v30 = vstv %s2565_s5 }
 0x4b1   :  { %2731 = vrsqrt.f32 %v2566_v30  ;;  %vm2573_vm9 = vweird.f32 %v2566_v30 }
 0x4b7   :  { %v2732_v41 = vpop.eup %2731 }
 0x4b8   :  { %v2568_v19 = vmul.f32 %v2732_v41, %v2566_v30  ;;  %vm2574_vm8 = vweird.f32 %v2732_v41 }
 0x4b9   :  { %vm2575_vm10 = vmor %vm2573_vm9, %vm2574_vm8 }
 0x4ba   :  { %v2569_v54 = vmul.f32 %v2732_v41, %v2568_v19 }
 0x4bc   :  { %v2570_v23 = vmul.f32 0.5, %v2569_v54 }
 0x4be   :  { %v2571_v37 = vsub.f32 1.5, %v2570_v23 }
 0x4c0   :  { %v2572_v29 = vmul.f32 %v2732_v41, %v2571_v37 }
 0x4c2   :  { %v2576_v22 = vsel %vm2575_vm10, %v2732_v41, %v2572_v29 }
 0x4c3   :  { %2720 = vpush %v2576_v22 }
 0x4f4   :  { %s2721_s17 = spop %2720 }
 0x4f5   :  { %v2578_v48 = vstv %s2721_s17 }
 0x4f6   :  { %v2579_v62 = vmul.f32 %v2578_v48, %v5591_v53  ;;  %v2580_v16 = vmul.f32 %v2578_v48, %v5594_v50  ;;  %v2581_v31 = vmul.f32 %v2578_v48, %v5598_v3  ;;  %v2582_v14 = vmul.f32 %v2578_v48, %v5601_v36 }
 0x4f7   :  { %v2587_v47 = vmul.f32 %v2578_v48, %v5558_v61  ;;  %v2588_v53 = vmul.f32 %v2578_v48, %v5561_v63  ;;  %v2589_v50 = vmul.f32 %v2578_v48, %v5564_v39  ;;  %v2590_v61 = vmul.f32 %v2578_v48, %v5567_v58 }
 0x4f8   :  { %2583 = vst.msk [vmem:[%s6013_s19] sm:$0xff] %vm2435_vm6, %v2579_v62  ;;  %v2596_v63 = vmul.f32 %v2578_v48, %v5547_v8  ;;  %v2597_v39 = vmul.f32 %v2578_v48, %v5550_v4  ;;  %v2598_v58 = vmul.f32 %v2578_v48, %v5553_v10  ;;  %v2599_v8 = vmul.f32 %v2578_v48, %v5555_v34 }
 0x4f9   :  { %2584 = vst.msk [vmem:[%s6013_s19 + $0x8] sm:$0x3f] %vm2437_vm7, %v2580_v16 }
 0x4fa   :  { %2585 = vst.msk [vmem:[%s6013_s19 + $0x30] sm:$0xff] %vm2435_vm6, %v2581_v31 }
 0x4fb   :  { %2586 = vst.msk [vmem:[%s6013_s19 + $0x38] sm:$0x3f] %vm2437_vm7, %v2582_v14 }
 0x4fc   :  { %2694 = vst.msk [vmem:[%s6013_s19 + $0x10] sm:$0xff] %vm2435_vm6, %v2587_v47 }
 0x4fd   :  { %2695 = vst.msk [vmem:[%s6013_s19 + $0x18] sm:$0x3f] %vm2437_vm7, %v2588_v53 }
 0x4fe   :  { %2696 = vst.msk [vmem:[%s6013_s19 + $0x40] sm:$0xff] %vm2435_vm6, %v2589_v50 }
 0x4ff   :  { %2697 = vst.msk [vmem:[%s6013_s19 + $0x48] sm:$0x3f] %vm2437_vm7, %v2590_v61 }
 0x500   :  { %2698 = vst.msk [vmem:[%s6013_s19 + $0x20] sm:$0xff] %vm2435_vm6, %v2596_v63 }
 0x501   :  { %2699 = vst.msk [vmem:[%s6013_s19 + $0x28] sm:$0x3f] %vm2437_vm7, %v2597_v39 }
 0x502   :  { %2700 = vst.msk [vmem:[%s6013_s19 + $0x50] sm:$0xff] %vm2435_vm6, %v2598_v58 }
 0x503   :  { %2701 = vst.msk [vmem:[%s6013_s19 + $0x58] sm:$0x3f] %vm2437_vm7, %v2599_v8 }
 0x504   :  { %2609 = vsyncpa [#allocation3], 1 }
 0x505   :  { %2610 = vsyncpa [#allocation4], 1 }
 0x506   :  { %2611 = vsyncpa [#allocation6], 1 }

</bundles_post_ra>
